<compile_context>
chip_gen: v7x
topology: tpu7x:2x2x1
jax: 0.10.0
libtpu: 0.0.40
codegen_flags: <defaults>
</compile_context>

<pallas_src>
import numpy as np
import jax
import jax.numpy as jnp
from jax import lax
from jax.experimental import pallas as pl
from jax.experimental.pallas import tpu as pltpu


def _upsample_matrix(n_in, n_out):
    """Dense 1-D bilinear resize matrix, align_corners=True (reference / W mix)."""
    A = np.zeros((n_out, n_in), np.float32)
    if n_in == 1:
        A[:, 0] = 1.0
        return A
    for o in range(n_out):
        pos = o * (n_in - 1) / (n_out - 1)
        i0 = min(int(np.floor(pos)), n_in - 2)
        frac = pos - i0
        A[o, i0] += 1.0 - frac
        A[o, i0 + 1] += frac
    return A


def _upsample_taps(n_in, n_out):
    """Per-output (i0, w0, w1) 2-tap weights for 1-D bilinear, align_corners=True."""
    taps = []
    for o in range(n_out):
        if n_in == 1:
            taps.append((0, 1.0, 0.0))
            continue
        pos = o * (n_in - 1) / (n_out - 1)
        i0 = min(int(np.floor(pos)), n_in - 2)
        f = float(pos - i0)
        taps.append((i0, 1.0 - f, f))
    return taps


def _fold_bn(gamma, beta, mean, var, eps=1e-5):
    scale = gamma / jnp.sqrt(var + eps)
    bias = beta - mean * scale
    return (scale.reshape(1, -1).astype(jnp.float32),
            bias.reshape(1, -1).astype(jnp.float32))


def _vmem_limit_bytes():
    """Generation-aware VMEM limit: ~48 MiB on v7x (64 MiB phys), up to 100 MiB on v5e/v6e."""
    try:
        cap = int(pltpu.get_tpu_info().vmem_capacity_bytes)
    except Exception:
        cap = 64 * 1024 * 1024
    return int(min(max(cap - 16 * 1024 * 1024, 32 * 1024 * 1024),
                   100 * 1024 * 1024))


def _make_up_kernel(*, Hin, Win, C1, H2, W2, C2, top, left, Wp, Hflat,
                    Cmid, Cout, h_taps, compute_dtype, out_dtype):
    Hup, Wup = 2 * Hin, 2 * Win
    Ctot = C1 + C2
    rows_out = H2 * Wp
    HWp = Hflat * Wp
    tap_offsets = [ky * Wp + kx for ky in range(3) for kx in range(3)]

    def conv3x3_bn_relu(src_ref, w_ref, s_ref, b_ref):
        # 3x3 conv over the flat padded buffer: tap (ky,kx) is the contiguous
        # row slice at offset ky*Wp+kx -> one MXU matmul per tap, no strided
        # window gathers.  Two accumulator chains (started from the first two
        # dots) keep MRF pops and VPU adds interleaved on v5e/v6e; v7x's MRB
        # accumulates in place anyway.
        # TODO(synk): fold taps into the contraction dim when channels are tiny.
        def tap(k):
            off = tap_offsets[k]
            return jnp.dot(src_ref[off:off + rows_out, :], w_ref[k],
                           preferred_element_type=jnp.float32)
        acc0, acc1 = tap(0), tap(1)
        for k in range(2, 9):
            if k % 2 == 0:
                acc0 = acc0 + tap(k)
            else:
                acc1 = acc1 + tap(k)
        return jnp.maximum((acc0 + acc1) * s_ref[...] + b_ref[...], 0.0)

    def kernel(x1_ref, x2_ref, aw_ref, w1_ref, w2_ref,
               s1_ref, b1_ref, s2_ref, b2_ref, out_ref, cat_scr, h1p_scr):
        # Zero-fill the padded scratches so the halo rows/columns act as the
        # convs' zero padding (replaces the old width-mask input entirely).
        # TODO(synk): zero only the halo strips at production sizes.
        cat_scr[...] = jnp.zeros((HWp, Ctot), compute_dtype)
        h1p_scr[...] = jnp.zeros((HWp, Cmid), compute_dtype)

        # ---- separable bilinear 2x upsample (align_corners=True), in f32 ----
        # W mix: one small MXU matmul (Wup, Win) @ (Win, Hin*C1).
        uw = jnp.dot(aw_ref[...], x1_ref[0], preferred_element_type=jnp.float32)
        # H mix (<=2 taps per output row) fused with the F.pad placement: each
        # upsampled row ho is one contiguous run of Wup flat rows of cat_scr.
        for ho, (i0, a0, a1) in enumerate(h_taps):
            col = a0 * uw[:, i0 * C1:(i0 + 1) * C1]
            if a1 != 0.0:
                col = col + a1 * uw[:, (i0 + 1) * C1:(i0 + 2) * C1]
            row0 = (1 + top + ho) * Wp + 1 + left
            cat_scr[row0:row0 + Wup, C2:Ctot] = col.astype(compute_dtype)

        # ---- channel concat: place the unpadded NHWC skip rows --------------
        for h in range(H2):
            row0 = (1 + h) * Wp + 1
            cat_scr[row0:row0 + W2, 0:C2] = x2_ref[0, h].astype(compute_dtype)

        # ---- conv1 + BN1 + ReLU (DropBlock2D is identity at inference) ------
        h1 = conv3x3_bn_relu(cat_scr, w1_ref, s1_ref, b1_ref).astype(compute_dtype)

        # Copy only the valid W2 columns of each row into the zero-filled conv2
        # input; the Wp-W2 pad columns stay zero -> correct zero padding.
        for h in range(H2):
            src0 = h * Wp
            dst0 = (1 + h) * Wp + 1
            h1p_scr[dst0:dst0 + W2, :] = h1[src0:src0 + W2, :]

        # ---- conv2 + BN2 + ReLU; store only the valid (unpadded) columns ----
        y = conv3x3_bn_relu(h1p_scr, w2_ref, s2_ref, b2_ref)
        for h in range(H2):
            out_ref[0, h] = y[h * Wp:h * Wp + W2, :].astype(out_dtype)

    return kernel


def up_forward_nhwc(x1_nhwc, x2_nhwc, params, *, compute_dtype=jnp.bfloat16,
                    out_dtype=None):
    """Pallas Up.forward (bilinear=True). NHWC in / NHWC out (no layout passes)."""
    N, Hin, Win, C1 = x1_nhwc.shape
    N2, H2, W2, C2 = x2_nhwc.shape
    assert N == N2
    Hup, Wup = 2 * Hin, 2 * Win
    diff_y, diff_x = H2 - Hup, W2 - Wup
    assert diff_y >= 0 and diff_x >= 0
    top, left = diff_y // 2, diff_x // 2
    if out_dtype is None:
        out_dtype = compute_dtype

    w1 = params["conv1_w"]          # (Cmid, C2+C1, 3, 3) torch OIHW
    w2 = params["conv2_w"]          # (Cout, Cmid, 3, 3)
    Cmid, Cout = w1.shape[0], w2.shape[0]
    assert w1.shape[1] == C1 + C2 and w2.shape[1] == Cmid

    # Padded flat geometry: +1 conv halo each side, width rounded up to the
    # compute-dtype sublane granule, +1 spare row so all 9 tap offsets fit.
    gran = 8 * max(1, 4 // jnp.dtype(compute_dtype).itemsize)
    Wp = ((W2 + 2 + gran - 1) // gran) * gran
    Hflat = H2 + 3
    HWp = Hflat * Wp
    rows_out = H2 * Wp

    # x1 for the separable upsample: W-major (Win, Hin*C1), kept in f32 so the
    # bilinear weights stay full precision (this matmul is a tiny FLOP share).
    x1w = jnp.transpose(x1_nhwc, (0, 2, 1, 3)).reshape(N, Win, Hin * C1)
    x1w = x1w.astype(jnp.float32)
    # x2 (the big tensor) goes in unpadded NHWC; halo placement is in-kernel.

    aw = jnp.asarray(_upsample_matrix(Win, Wup))            # (Wup, Win) f32
    h_taps = _upsample_taps(Hin, Hup)

    w1r = jnp.transpose(w1, (2, 3, 1, 0)).reshape(9, C1 + C2, Cmid).astype(compute_dtype)
    w2r = jnp.transpose(w2, (2, 3, 1, 0)).reshape(9, Cmid, Cout).astype(compute_dtype)
    s1, b1 = _fold_bn(params["bn1_gamma"], params["bn1_beta"],
                      params["bn1_mean"], params["bn1_var"])
    s2, b2 = _fold_bn(params["bn2_gamma"], params["bn2_beta"],
                      params["bn2_mean"], params["bn2_var"])

    kernel = _make_up_kernel(Hin=Hin, Win=Win, C1=C1, H2=H2, W2=W2, C2=C2,
                             top=top, left=left, Wp=Wp, Hflat=Hflat,
                             Cmid=Cmid, Cout=Cout, h_taps=h_taps,
                             compute_dtype=compute_dtype, out_dtype=out_dtype)

    in_arrays = (x1w, x2_nhwc, aw, w1r, w2r, s1, b1, s2, b2)
    flops = N * (2 * Wup * Win * Hin * C1 + 4 * Hup * Wup * C1
                 + 2 * rows_out * 9 * (C1 + C2) * Cmid
                 + 2 * rows_out * 9 * Cmid * Cout)
    bytes_accessed = int(sum(int(a.size) * a.dtype.itemsize for a in in_arrays)
                         + N * H2 * W2 * Cout * jnp.dtype(out_dtype).itemsize)

    out = pl.pallas_call(
        kernel,
        out_shape=jax.ShapeDtypeStruct((N, H2, W2, Cout), out_dtype),
        grid=(N,),
        in_specs=[
            pl.BlockSpec((1, Win, Hin * C1), lambda n: (n, 0, 0)),     # x1 (W-major)
            pl.BlockSpec((1, H2, W2, C2), lambda n: (n, 0, 0, 0)),     # x2 (NHWC)
            pl.BlockSpec((Wup, Win), lambda n: (0, 0)),                # Aw
            pl.BlockSpec((9, C1 + C2, Cmid), lambda n: (0, 0, 0)),     # w1
            pl.BlockSpec((9, Cmid, Cout), lambda n: (0, 0, 0)),        # w2
            pl.BlockSpec((1, Cmid), lambda n: (0, 0)),                 # s1
            pl.BlockSpec((1, Cmid), lambda n: (0, 0)),                 # b1
            pl.BlockSpec((1, Cout), lambda n: (0, 0)),                 # s2
            pl.BlockSpec((1, Cout), lambda n: (0, 0)),                 # b2
        ],
        out_specs=pl.BlockSpec((1, H2, W2, Cout), lambda n: (n, 0, 0, 0)),
        scratch_shapes=[
            pltpu.VMEM((HWp, C1 + C2), compute_dtype),   # padded cat([x2, up(x1)])
            pltpu.VMEM((HWp, Cmid), compute_dtype),      # padded conv1 output
        ],
        compiler_params=pltpu.CompilerParams(
            dimension_semantics=("parallel",),
            vmem_limit_bytes=_vmem_limit_bytes()),
        cost_estimate=pl.CostEstimate(flops=int(flops), transcendentals=0,
                                      bytes_accessed=bytes_accessed),
    )(*in_arrays)
    return out


def up_forward(x1_nchw, x2_nchw, params, *, compute_dtype=jnp.bfloat16,
               out_dtype=None):
    """NCHW convenience wrapper matching the PyTorch module signature."""
    x1 = jnp.transpose(x1_nchw, (0, 2, 3, 1))
    x2 = jnp.transpose(x2_nchw, (0, 2, 3, 1))
    y = up_forward_nhwc(x1, x2, params, compute_dtype=compute_dtype,
                        out_dtype=out_dtype)
    return jnp.transpose(y, (0, 3, 1, 2))


def up_reference(x1_nchw, x2_nchw, params):
    """Plain-JAX reference of Up.forward (eval-mode semantics)."""
    N, C1, Hin, Win = x1_nchw.shape
    _, C2, H2, W2 = x2_nchw.shape
    x1 = jnp.transpose(x1_nchw, (0, 2, 3, 1))
    x2 = jnp.transpose(x2_nchw, (0, 2, 3, 1))
    Ah = jnp.asarray(_upsample_matrix(Hin, 2 * Hin))
    Aw = jnp.asarray(_upsample_matrix(Win, 2 * Win))
    up = jnp.einsum('oh,nhwc->nowc', Ah, x1, precision=lax.Precision.HIGHEST)
    up = jnp.einsum('pw,nowc->nopc', Aw, up, precision=lax.Precision.HIGHEST)
    dy, dx = H2 - up.shape[1], W2 - up.shape[2]
    up = jnp.pad(up, ((0, 0), (dy // 2, dy - dy // 2),
                      (dx // 2, dx - dx // 2), (0, 0)))
    cat = jnp.concatenate([x2, up], axis=-1)
    w1 = jnp.transpose(params["conv1_w"], (2, 3, 1, 0))
    w2 = jnp.transpose(params["conv2_w"], (2, 3, 1, 0))
    s1, b1 = _fold_bn(params["bn1_gamma"], params["bn1_beta"],
                      params["bn1_mean"], params["bn1_var"])
    s2, b2 = _fold_bn(params["bn2_gamma"], params["bn2_beta"],
                      params["bn2_mean"], params["bn2_var"])
    h = lax.conv_general_dilated(cat, w1, (1, 1), ((1, 1), (1, 1)),
                                 dimension_numbers=('NHWC', 'HWIO', 'NHWC'),
                                 precision=lax.Precision.HIGHEST)
    h = jnp.maximum(h * s1.reshape(1, 1, 1, -1) + b1.reshape(1, 1, 1, -1), 0.0)
    y = lax.conv_general_dilated(h, w2, (1, 1), ((1, 1), (1, 1)),
                                 dimension_numbers=('NHWC', 'HWIO', 'NHWC'),
                                 precision=lax.Precision.HIGHEST)
    y = jnp.maximum(y * s2.reshape(1, 1, 1, -1) + b2.reshape(1, 1, 1, -1), 0.0)
    return jnp.transpose(y, (0, 3, 1, 2))


if __name__ == "__main__":
    key = jax.random.PRNGKey(0)
    ks = jax.random.split(key, 12)

    N = 2
    in_channels, out_channels = 8, 4        # Up(8, 4, bilinear=True)
    C1 = in_channels // 2                   # x1 (low-res) channels
    C2 = in_channels - C1                   # x2 (skip) channels
    Cmid = in_channels // 2                 # DoubleConv mid_channels
    Hin = Win = 8
    H2 = W2 = 16

    x1 = jax.random.normal(ks[0], (N, C1, Hin, Win), jnp.float32)
    x2 = jax.random.normal(ks[1], (N, C2, H2, W2), jnp.float32)

    params = {
        "conv1_w": 0.2 * jax.random.normal(ks[2], (Cmid, in_channels, 3, 3), jnp.float32),
        "bn1_gamma": 0.8 + 0.4 * jax.random.uniform(ks[3], (Cmid,), jnp.float32),
        "bn1_beta": 0.05 * jax.random.normal(ks[4], (Cmid,), jnp.float32),
        "bn1_mean": 0.05 * jax.random.normal(ks[5], (Cmid,), jnp.float32),
        "bn1_var": 0.8 + 0.4 * jax.random.uniform(ks[6], (Cmid,), jnp.float32),
        "conv2_w": 0.2 * jax.random.normal(ks[7], (out_channels, Cmid, 3, 3), jnp.float32),
        "bn2_gamma": 0.8 + 0.4 * jax.random.uniform(ks[8], (out_channels,), jnp.float32),
        "bn2_beta": 0.05 * jax.random.normal(ks[9], (out_channels,), jnp.float32),
        "bn2_mean": 0.05 * jax.random.normal(ks[10], (out_channels,), jnp.float32),
        "bn2_var": 0.8 + 0.4 * jax.random.uniform(ks[11], (out_channels,), jnp.float32),
    }

    ref = jax.block_until_ready(up_reference(x1, x2, params))

    # f32 compute path: tight check against the f32 reference.
    out_f32 = jax.block_until_ready(
        up_forward(x1, x2, params, compute_dtype=jnp.float32))
    assert out_f32.shape == (N, out_channels, H2, W2), out_f32.shape
    if not np.allclose(np.asarray(out_f32), np.asarray(ref), rtol=1e-2, atol=1e-2):
        err = float(np.max(np.abs(np.asarray(out_f32) - np.asarray(ref))))
        raise AssertionError(f"f32 Pallas kernel mismatch vs reference, max abs err={err}")

    # bf16 matmul path (default, MXU-native): bf16 output, bf16-level tolerance.
    out_bf16 = jax.block_until_ready(up_forward(x1, x2, params))
    assert out_bf16.shape == (N, out_channels, H2, W2), out_bf16.shape
    out_bf16_f = np.asarray(out_bf16.astype(jnp.float32))
    if not np.allclose(out_bf16_f, np.asarray(ref), rtol=5e-2, atol=5e-2):
        err = float(np.max(np.abs(out_bf16_f - np.asarray(ref))))
        raise AssertionError(f"bf16 Pallas kernel mismatch vs reference, max abs err={err}")

    print("KERNEL_OK")
</pallas_src>

<mosaic_0001>
module attributes {stable_mosaic.version = 11 : i64} {
  func.func @kernel(%arg0: i32, %arg1: memref<1x8x32xf32, #tpu.memory_space<vmem>>, %arg2: memref<1x16x16x4xf32, #tpu.memory_space<vmem>>, %arg3: memref<16x8xf32, #tpu.memory_space<vmem>>, %arg4: memref<9x8x4xf32, #tpu.memory_space<vmem>>, %arg5: memref<9x4x4xf32, #tpu.memory_space<vmem>>, %arg6: memref<1x4xf32, #tpu.memory_space<vmem>>, %arg7: memref<1x4xf32, #tpu.memory_space<vmem>>, %arg8: memref<1x4xf32, #tpu.memory_space<vmem>>, %arg9: memref<1x4xf32, #tpu.memory_space<vmem>>, %arg10: memref<1x16x16x4xf32, #tpu.memory_space<vmem>>, %arg11: memref<456x8xf32, #tpu.memory_space<vmem>>, %arg12: memref<456x4xf32, #tpu.memory_space<vmem>>) attributes {dimension_semantics = [#tpu.dimension_semantics<parallel>], iteration_bounds = array<i64: 2>, scalar_prefetch = 0 : i64, scratch_operands = 2 : i64, tpu.core_type = #tpu.core_type<tc>, window_params = [{transform_indices = @transform_0, window_bounds = array<i64: 1, 8, 32>}, {transform_indices = @transform_1, window_bounds = array<i64: 1, 16, 16, 4>}, {pipeline_mode = #tpu.pipeline_mode<synchronous>, transform_indices = @transform_2, window_bounds = array<i64: 16, 8>}, {pipeline_mode = #tpu.pipeline_mode<synchronous>, transform_indices = @transform_3, window_bounds = array<i64: 9, 8, 4>}, {pipeline_mode = #tpu.pipeline_mode<synchronous>, transform_indices = @transform_4, window_bounds = array<i64: 9, 4, 4>}, {pipeline_mode = #tpu.pipeline_mode<synchronous>, transform_indices = @transform_5, window_bounds = array<i64: 1, 4>}, {pipeline_mode = #tpu.pipeline_mode<synchronous>, transform_indices = @transform_6, window_bounds = array<i64: 1, 4>}, {pipeline_mode = #tpu.pipeline_mode<synchronous>, transform_indices = @transform_7, window_bounds = array<i64: 1, 4>}, {pipeline_mode = #tpu.pipeline_mode<synchronous>, transform_indices = @transform_8, window_bounds = array<i64: 1, 4>}, {transform_indices = @transform_9, window_bounds = array<i64: 1, 16, 16, 4>}]} {
    %cst = arith.constant 0.000000e+00 : f32
    %0 = vector.broadcast %cst : f32 to vector<456x8xf32>
    %c0 = arith.constant 0 : index
    %c0_0 = arith.constant 0 : index
    %1 = vector.load %arg11[%c0, %c0_0] : memref<456x8xf32, #tpu.memory_space<vmem>>, vector<456x8xf32>
    tpu.vector_store %arg11[%c0, %c0_0], %0 {strides = array<i32>} : memref<456x8xf32, #tpu.memory_space<vmem>>, vector<456x8xf32>,
    %cst_1 = arith.constant 0.000000e+00 : f32
    %2 = vector.broadcast %cst_1 : f32 to vector<456x4xf32>
    %c0_2 = arith.constant 0 : index
    %c0_3 = arith.constant 0 : index
    %3 = vector.load %arg12[%c0_2, %c0_3] : memref<456x4xf32, #tpu.memory_space<vmem>>, vector<456x4xf32>
    tpu.vector_store %arg12[%c0_2, %c0_3], %2 {strides = array<i32>} : memref<456x4xf32, #tpu.memory_space<vmem>>, vector<456x4xf32>,
    %c0_4 = arith.constant 0 : index
    %c0_5 = arith.constant 0 : index
    %4 = vector.load %arg3[%c0_4, %c0_5] : memref<16x8xf32, #tpu.memory_space<vmem>>, vector<16x8xf32>
    %c0_6 = arith.constant 0 : index
    %c0_7 = arith.constant 0 : index
    %c0_8 = arith.constant 0 : index
    %5 = vector.load %arg1[%c0_6, %c0_7, %c0_8] : memref<1x8x32xf32, #tpu.memory_space<vmem>>, vector<1x8x32xf32>
    %6 = vector.shape_cast %5 : vector<1x8x32xf32> to vector<8x32xf32>
    %cst_9 = arith.constant dense<0.000000e+00> : vector<16x32xf32>
    %7 = tpu.matmul %4, %6, %cst_9 {dimension_numbers = #tpu.dot_dimension_numbers<[1], [0], [0], [1], [0, 0, 1, 1], [], []>} : vector<16x8xf32>, vector<8x32xf32>, vector<16x32xf32> -> vector<16x32xf32>
    %8 = vector.extract_strided_slice %7 {offsets = [0, 0], sizes = [16, 4], strides = [1, 1]} : vector<16x32xf32> to vector<16x4xf32>
    %cst_10 = arith.constant 1.000000e+00 : f32
    %9 = vector.broadcast %cst_10 : f32 to vector<16x4xf32>
    %10 = arith.mulf %9, %8 : vector<16x4xf32>
    %c25 = arith.constant 25 : index
    %c4 = arith.constant 4 : index
    %11 = vector.load %arg11[%c25, %c4] : memref<456x8xf32, #tpu.memory_space<vmem>>, vector<16x4xf32>
    tpu.vector_store %arg11[%c25, %c4], %10 {strides = array<i32>} : memref<456x8xf32, #tpu.memory_space<vmem>>, vector<16x4xf32>,
    %12 = vector.extract_strided_slice %7 {offsets = [0, 0], sizes = [16, 4], strides = [1, 1]} : vector<16x32xf32> to vector<16x4xf32>
    %cst_11 = arith.constant 0.533333361 : f32
    %13 = vector.broadcast %cst_11 : f32 to vector<16x4xf32>
    %14 = arith.mulf %13, %12 : vector<16x4xf32>
    %15 = vector.extract_strided_slice %7 {offsets = [0, 4], sizes = [16, 4], strides = [1, 1]} : vector<16x32xf32> to vector<16x4xf32>
    %cst_12 = arith.constant 0.466666669 : f32
    %16 = vector.broadcast %cst_12 : f32 to vector<16x4xf32>
    %17 = arith.mulf %16, %15 : vector<16x4xf32>
    %18 = arith.addf %14, %17 : vector<16x4xf32>
    %c49 = arith.constant 49 : index
    %c4_13 = arith.constant 4 : index
    %19 = vector.load %arg11[%c49, %c4_13] : memref<456x8xf32, #tpu.memory_space<vmem>>, vector<16x4xf32>
    tpu.vector_store %arg11[%c49, %c4_13], %18 {strides = array<i32>} : memref<456x8xf32, #tpu.memory_space<vmem>>, vector<16x4xf32>,
    %20 = vector.extract_strided_slice %7 {offsets = [0, 0], sizes = [16, 4], strides = [1, 1]} : vector<16x32xf32> to vector<16x4xf32>
    %cst_14 = arith.constant 0.0666666701 : f32
    %21 = vector.broadcast %cst_14 : f32 to vector<16x4xf32>
    %22 = arith.mulf %21, %20 : vector<16x4xf32>
    %23 = vector.extract_strided_slice %7 {offsets = [0, 4], sizes = [16, 4], strides = [1, 1]} : vector<16x32xf32> to vector<16x4xf32>
    %cst_15 = arith.constant 0.933333337 : f32
    %24 = vector.broadcast %cst_15 : f32 to vector<16x4xf32>
    %25 = arith.mulf %24, %23 : vector<16x4xf32>
    %26 = arith.addf %22, %25 : vector<16x4xf32>
    %c73 = arith.constant 73 : index
    %c4_16 = arith.constant 4 : index
    %27 = vector.load %arg11[%c73, %c4_16] : memref<456x8xf32, #tpu.memory_space<vmem>>, vector<16x4xf32>
    tpu.vector_store %arg11[%c73, %c4_16], %26 {strides = array<i32>} : memref<456x8xf32, #tpu.memory_space<vmem>>, vector<16x4xf32>,
    %28 = vector.extract_strided_slice %7 {offsets = [0, 4], sizes = [16, 4], strides = [1, 1]} : vector<16x32xf32> to vector<16x4xf32>
    %cst_17 = arith.constant 6.000000e-01 : f32
    %29 = vector.broadcast %cst_17 : f32 to vector<16x4xf32>
    %30 = arith.mulf %29, %28 : vector<16x4xf32>
    %31 = vector.extract_strided_slice %7 {offsets = [0, 8], sizes = [16, 4], strides = [1, 1]} : vector<16x32xf32> to vector<16x4xf32>
    %cst_18 = arith.constant 4.000000e-01 : f32
    %32 = vector.broadcast %cst_18 : f32 to vector<16x4xf32>
    %33 = arith.mulf %32, %31 : vector<16x4xf32>
    %34 = arith.addf %30, %33 : vector<16x4xf32>
    %c97 = arith.constant 97 : index
    %c4_19 = arith.constant 4 : index
    %35 = vector.load %arg11[%c97, %c4_19] : memref<456x8xf32, #tpu.memory_space<vmem>>, vector<16x4xf32>
    tpu.vector_store %arg11[%c97, %c4_19], %34 {strides = array<i32>} : memref<456x8xf32, #tpu.memory_space<vmem>>, vector<16x4xf32>,
    %36 = vector.extract_strided_slice %7 {offsets = [0, 4], sizes = [16, 4], strides = [1, 1]} : vector<16x32xf32> to vector<16x4xf32>
    %cst_20 = arith.constant 0.13333334 : f32
    %37 = vector.broadcast %cst_20 : f32 to vector<16x4xf32>
    %38 = arith.mulf %37, %36 : vector<16x4xf32>
    %39 = vector.extract_strided_slice %7 {offsets = [0, 8], sizes = [16, 4], strides = [1, 1]} : vector<16x32xf32> to vector<16x4xf32>
    %cst_21 = arith.constant 0.866666674 : f32
    %40 = vector.broadcast %cst_21 : f32 to vector<16x4xf32>
    %41 = arith.mulf %40, %39 : vector<16x4xf32>
    %42 = arith.addf %38, %41 : vector<16x4xf32>
    %c121 = arith.constant 121 : index
    %c4_22 = arith.constant 4 : index
    %43 = vector.load %arg11[%c121, %c4_22] : memref<456x8xf32, #tpu.memory_space<vmem>>, vector<16x4xf32>
    tpu.vector_store %arg11[%c121, %c4_22], %42 {strides = array<i32>} : memref<456x8xf32, #tpu.memory_space<vmem>>, vector<16x4xf32>,
    %44 = vector.extract_strided_slice %7 {offsets = [0, 8], sizes = [16, 4], strides = [1, 1]} : vector<16x32xf32> to vector<16x4xf32>
    %cst_23 = arith.constant 0.666666686 : f32
    %45 = vector.broadcast %cst_23 : f32 to vector<16x4xf32>
    %46 = arith.mulf %45, %44 : vector<16x4xf32>
    %47 = vector.extract_strided_slice %7 {offsets = [0, 12], sizes = [16, 4], strides = [1, 1]} : vector<16x32xf32> to vector<16x4xf32>
    %cst_24 = arith.constant 0.333333343 : f32
    %48 = vector.broadcast %cst_24 : f32 to vector<16x4xf32>
    %49 = arith.mulf %48, %47 : vector<16x4xf32>
    %50 = arith.addf %46, %49 : vector<16x4xf32>
    %c145 = arith.constant 145 : index
    %c4_25 = arith.constant 4 : index
    %51 = vector.load %arg11[%c145, %c4_25] : memref<456x8xf32, #tpu.memory_space<vmem>>, vector<16x4xf32>
    tpu.vector_store %arg11[%c145, %c4_25], %50 {strides = array<i32>} : memref<456x8xf32, #tpu.memory_space<vmem>>, vector<16x4xf32>,
    %52 = vector.extract_strided_slice %7 {offsets = [0, 8], sizes = [16, 4], strides = [1, 1]} : vector<16x32xf32> to vector<16x4xf32>
    %cst_26 = arith.constant 2.000000e-01 : f32
    %53 = vector.broadcast %cst_26 : f32 to vector<16x4xf32>
    %54 = arith.mulf %53, %52 : vector<16x4xf32>
    %55 = vector.extract_strided_slice %7 {offsets = [0, 12], sizes = [16, 4], strides = [1, 1]} : vector<16x32xf32> to vector<16x4xf32>
    %cst_27 = arith.constant 8.000000e-01 : f32
    %56 = vector.broadcast %cst_27 : f32 to vector<16x4xf32>
    %57 = arith.mulf %56, %55 : vector<16x4xf32>
    %58 = arith.addf %54, %57 : vector<16x4xf32>
    %c169 = arith.constant 169 : index
    %c4_28 = arith.constant 4 : index
    %59 = vector.load %arg11[%c169, %c4_28] : memref<456x8xf32, #tpu.memory_space<vmem>>, vector<16x4xf32>
    tpu.vector_store %arg11[%c169, %c4_28], %58 {strides = array<i32>} : memref<456x8xf32, #tpu.memory_space<vmem>>, vector<16x4xf32>,
    %60 = vector.extract_strided_slice %7 {offsets = [0, 12], sizes = [16, 4], strides = [1, 1]} : vector<16x32xf32> to vector<16x4xf32>
    %cst_29 = arith.constant 0.733333349 : f32
    %61 = vector.broadcast %cst_29 : f32 to vector<16x4xf32>
    %62 = arith.mulf %61, %60 : vector<16x4xf32>
    %63 = vector.extract_strided_slice %7 {offsets = [0, 16], sizes = [16, 4], strides = [1, 1]} : vector<16x32xf32> to vector<16x4xf32>
    %cst_30 = arith.constant 0.266666681 : f32
    %64 = vector.broadcast %cst_30 : f32 to vector<16x4xf32>
    %65 = arith.mulf %64, %63 : vector<16x4xf32>
    %66 = arith.addf %62, %65 : vector<16x4xf32>
    %c193 = arith.constant 193 : index
    %c4_31 = arith.constant 4 : index
    %67 = vector.load %arg11[%c193, %c4_31] : memref<456x8xf32, #tpu.memory_space<vmem>>, vector<16x4xf32>
    tpu.vector_store %arg11[%c193, %c4_31], %66 {strides = array<i32>} : memref<456x8xf32, #tpu.memory_space<vmem>>, vector<16x4xf32>,
    %68 = vector.extract_strided_slice %7 {offsets = [0, 12], sizes = [16, 4], strides = [1, 1]} : vector<16x32xf32> to vector<16x4xf32>
    %cst_32 = arith.constant 0.266666681 : f32
    %69 = vector.broadcast %cst_32 : f32 to vector<16x4xf32>
    %70 = arith.mulf %69, %68 : vector<16x4xf32>
    %71 = vector.extract_strided_slice %7 {offsets = [0, 16], sizes = [16, 4], strides = [1, 1]} : vector<16x32xf32> to vector<16x4xf32>
    %cst_33 = arith.constant 0.733333349 : f32
    %72 = vector.broadcast %cst_33 : f32 to vector<16x4xf32>
    %73 = arith.mulf %72, %71 : vector<16x4xf32>
    %74 = arith.addf %70, %73 : vector<16x4xf32>
    %c217 = arith.constant 217 : index
    %c4_34 = arith.constant 4 : index
    %75 = vector.load %arg11[%c217, %c4_34] : memref<456x8xf32, #tpu.memory_space<vmem>>, vector<16x4xf32>
    tpu.vector_store %arg11[%c217, %c4_34], %74 {strides = array<i32>} : memref<456x8xf32, #tpu.memory_space<vmem>>, vector<16x4xf32>,
    %76 = vector.extract_strided_slice %7 {offsets = [0, 16], sizes = [16, 4], strides = [1, 1]} : vector<16x32xf32> to vector<16x4xf32>
    %cst_35 = arith.constant 8.000000e-01 : f32
    %77 = vector.broadcast %cst_35 : f32 to vector<16x4xf32>
    %78 = arith.mulf %77, %76 : vector<16x4xf32>
    %79 = vector.extract_strided_slice %7 {offsets = [0, 20], sizes = [16, 4], strides = [1, 1]} : vector<16x32xf32> to vector<16x4xf32>
    %cst_36 = arith.constant 2.000000e-01 : f32
    %80 = vector.broadcast %cst_36 : f32 to vector<16x4xf32>
    %81 = arith.mulf %80, %79 : vector<16x4xf32>
    %82 = arith.addf %78, %81 : vector<16x4xf32>
    %c241 = arith.constant 241 : index
    %c4_37 = arith.constant 4 : index
    %83 = vector.load %arg11[%c241, %c4_37] : memref<456x8xf32, #tpu.memory_space<vmem>>, vector<16x4xf32>
    tpu.vector_store %arg11[%c241, %c4_37], %82 {strides = array<i32>} : memref<456x8xf32, #tpu.memory_space<vmem>>, vector<16x4xf32>,
    %84 = vector.extract_strided_slice %7 {offsets = [0, 16], sizes = [16, 4], strides = [1, 1]} : vector<16x32xf32> to vector<16x4xf32>
    %cst_38 = arith.constant 0.333333343 : f32
    %85 = vector.broadcast %cst_38 : f32 to vector<16x4xf32>
    %86 = arith.mulf %85, %84 : vector<16x4xf32>
    %87 = vector.extract_strided_slice %7 {offsets = [0, 20], sizes = [16, 4], strides = [1, 1]} : vector<16x32xf32> to vector<16x4xf32>
    %cst_39 = arith.constant 0.666666686 : f32
    %88 = vector.broadcast %cst_39 : f32 to vector<16x4xf32>
    %89 = arith.mulf %88, %87 : vector<16x4xf32>
    %90 = arith.addf %86, %89 : vector<16x4xf32>
    %c265 = arith.constant 265 : index
    %c4_40 = arith.constant 4 : index
    %91 = vector.load %arg11[%c265, %c4_40] : memref<456x8xf32, #tpu.memory_space<vmem>>, vector<16x4xf32>
    tpu.vector_store %arg11[%c265, %c4_40], %90 {strides = array<i32>} : memref<456x8xf32, #tpu.memory_space<vmem>>, vector<16x4xf32>,
    %92 = vector.extract_strided_slice %7 {offsets = [0, 20], sizes = [16, 4], strides = [1, 1]} : vector<16x32xf32> to vector<16x4xf32>
    %cst_41 = arith.constant 0.866666674 : f32
    %93 = vector.broadcast %cst_41 : f32 to vector<16x4xf32>
    %94 = arith.mulf %93, %92 : vector<16x4xf32>
    %95 = vector.extract_strided_slice %7 {offsets = [0, 24], sizes = [16, 4], strides = [1, 1]} : vector<16x32xf32> to vector<16x4xf32>
    %cst_42 = arith.constant 0.13333334 : f32
    %96 = vector.broadcast %cst_42 : f32 to vector<16x4xf32>
    %97 = arith.mulf %96, %95 : vector<16x4xf32>
    %98 = arith.addf %94, %97 : vector<16x4xf32>
    %c289 = arith.constant 289 : index
    %c4_43 = arith.constant 4 : index
    %99 = vector.load %arg11[%c289, %c4_43] : memref<456x8xf32, #tpu.memory_space<vmem>>, vector<16x4xf32>
    tpu.vector_store %arg11[%c289, %c4_43], %98 {strides = array<i32>} : memref<456x8xf32, #tpu.memory_space<vmem>>, vector<16x4xf32>,
    %100 = vector.extract_strided_slice %7 {offsets = [0, 20], sizes = [16, 4], strides = [1, 1]} : vector<16x32xf32> to vector<16x4xf32>
    %cst_44 = arith.constant 4.000000e-01 : f32
    %101 = vector.broadcast %cst_44 : f32 to vector<16x4xf32>
    %102 = arith.mulf %101, %100 : vector<16x4xf32>
    %103 = vector.extract_strided_slice %7 {offsets = [0, 24], sizes = [16, 4], strides = [1, 1]} : vector<16x32xf32> to vector<16x4xf32>
    %cst_45 = arith.constant 6.000000e-01 : f32
    %104 = vector.broadcast %cst_45 : f32 to vector<16x4xf32>
    %105 = arith.mulf %104, %103 : vector<16x4xf32>
    %106 = arith.addf %102, %105 : vector<16x4xf32>
    %c313 = arith.constant 313 : index
    %c4_46 = arith.constant 4 : index
    %107 = vector.load %arg11[%c313, %c4_46] : memref<456x8xf32, #tpu.memory_space<vmem>>, vector<16x4xf32>
    tpu.vector_store %arg11[%c313, %c4_46], %106 {strides = array<i32>} : memref<456x8xf32, #tpu.memory_space<vmem>>, vector<16x4xf32>,
    %108 = vector.extract_strided_slice %7 {offsets = [0, 24], sizes = [16, 4], strides = [1, 1]} : vector<16x32xf32> to vector<16x4xf32>
    %cst_47 = arith.constant 0.933333337 : f32
    %109 = vector.broadcast %cst_47 : f32 to vector<16x4xf32>
    %110 = arith.mulf %109, %108 : vector<16x4xf32>
    %111 = vector.extract_strided_slice %7 {offsets = [0, 28], sizes = [16, 4], strides = [1, 1]} : vector<16x32xf32> to vector<16x4xf32>
    %cst_48 = arith.constant 0.0666666701 : f32
    %112 = vector.broadcast %cst_48 : f32 to vector<16x4xf32>
    %113 = arith.mulf %112, %111 : vector<16x4xf32>
    %114 = arith.addf %110, %113 : vector<16x4xf32>
    %c337 = arith.constant 337 : index
    %c4_49 = arith.constant 4 : index
    %115 = vector.load %arg11[%c337, %c4_49] : memref<456x8xf32, #tpu.memory_space<vmem>>, vector<16x4xf32>
    tpu.vector_store %arg11[%c337, %c4_49], %114 {strides = array<i32>} : memref<456x8xf32, #tpu.memory_space<vmem>>, vector<16x4xf32>,
    %116 = vector.extract_strided_slice %7 {offsets = [0, 24], sizes = [16, 4], strides = [1, 1]} : vector<16x32xf32> to vector<16x4xf32>
    %cst_50 = arith.constant 0.466666669 : f32
    %117 = vector.broadcast %cst_50 : f32 to vector<16x4xf32>
    %118 = arith.mulf %117, %116 : vector<16x4xf32>
    %119 = vector.extract_strided_slice %7 {offsets = [0, 28], sizes = [16, 4], strides = [1, 1]} : vector<16x32xf32> to vector<16x4xf32>
    %cst_51 = arith.constant 0.533333361 : f32
    %120 = vector.broadcast %cst_51 : f32 to vector<16x4xf32>
    %121 = arith.mulf %120, %119 : vector<16x4xf32>
    %122 = arith.addf %118, %121 : vector<16x4xf32>
    %c361 = arith.constant 361 : index
    %c4_52 = arith.constant 4 : index
    %123 = vector.load %arg11[%c361, %c4_52] : memref<456x8xf32, #tpu.memory_space<vmem>>, vector<16x4xf32>
    tpu.vector_store %arg11[%c361, %c4_52], %122 {strides = array<i32>} : memref<456x8xf32, #tpu.memory_space<vmem>>, vector<16x4xf32>,
    %124 = vector.extract_strided_slice %7 {offsets = [0, 24], sizes = [16, 4], strides = [1, 1]} : vector<16x32xf32> to vector<16x4xf32>
    %cst_53 = arith.constant 0.000000e+00 : f32
    %125 = vector.broadcast %cst_53 : f32 to vector<16x4xf32>
    %126 = arith.mulf %125, %124 : vector<16x4xf32>
    %127 = vector.extract_strided_slice %7 {offsets = [0, 28], sizes = [16, 4], strides = [1, 1]} : vector<16x32xf32> to vector<16x4xf32>
    %cst_54 = arith.constant 1.000000e+00 : f32
    %128 = vector.broadcast %cst_54 : f32 to vector<16x4xf32>
    %129 = arith.mulf %128, %127 : vector<16x4xf32>
    %130 = arith.addf %126, %129 : vector<16x4xf32>
    %c385 = arith.constant 385 : index
    %c4_55 = arith.constant 4 : index
    %131 = vector.load %arg11[%c385, %c4_55] : memref<456x8xf32, #tpu.memory_space<vmem>>, vector<16x4xf32>
    tpu.vector_store %arg11[%c385, %c4_55], %130 {strides = array<i32>} : memref<456x8xf32, #tpu.memory_space<vmem>>, vector<16x4xf32>,
    %c0_56 = arith.constant 0 : index
    %c0_57 = arith.constant 0 : index
    %c0_58 = arith.constant 0 : index
    %c0_59 = arith.constant 0 : index
    %132 = vector.load %arg2[%c0_56, %c0_57, %c0_58, %c0_59] : memref<1x16x16x4xf32, #tpu.memory_space<vmem>>, vector<1x1x16x4xf32>
    %133 = vector.shape_cast %132 : vector<1x1x16x4xf32> to vector<16x4xf32>
    %c25_60 = arith.constant 25 : index
    %c0_61 = arith.constant 0 : index
    %134 = vector.load %arg11[%c25_60, %c0_61] : memref<456x8xf32, #tpu.memory_space<vmem>>, vector<16x4xf32>
    tpu.vector_store %arg11[%c25_60, %c0_61], %133 {strides = array<i32>} : memref<456x8xf32, #tpu.memory_space<vmem>>, vector<16x4xf32>,
    %c0_62 = arith.constant 0 : index
    %c1 = arith.constant 1 : index
    %c0_63 = arith.constant 0 : index
    %c0_64 = arith.constant 0 : index
    %135 = vector.load %arg2[%c0_62, %c1, %c0_63, %c0_64] : memref<1x16x16x4xf32, #tpu.memory_space<vmem>>, vector<1x1x16x4xf32>
    %136 = vector.shape_cast %135 : vector<1x1x16x4xf32> to vector<16x4xf32>
    %c49_65 = arith.constant 49 : index
    %c0_66 = arith.constant 0 : index
    %137 = vector.load %arg11[%c49_65, %c0_66] : memref<456x8xf32, #tpu.memory_space<vmem>>, vector<16x4xf32>
    tpu.vector_store %arg11[%c49_65, %c0_66], %136 {strides = array<i32>} : memref<456x8xf32, #tpu.memory_space<vmem>>, vector<16x4xf32>,
    %c0_67 = arith.constant 0 : index
    %c2 = arith.constant 2 : index
    %c0_68 = arith.constant 0 : index
    %c0_69 = arith.constant 0 : index
    %138 = vector.load %arg2[%c0_67, %c2, %c0_68, %c0_69] : memref<1x16x16x4xf32, #tpu.memory_space<vmem>>, vector<1x1x16x4xf32>
    %139 = vector.shape_cast %138 : vector<1x1x16x4xf32> to vector<16x4xf32>
    %c73_70 = arith.constant 73 : index
    %c0_71 = arith.constant 0 : index
    %140 = vector.load %arg11[%c73_70, %c0_71] : memref<456x8xf32, #tpu.memory_space<vmem>>, vector<16x4xf32>
    tpu.vector_store %arg11[%c73_70, %c0_71], %139 {strides = array<i32>} : memref<456x8xf32, #tpu.memory_space<vmem>>, vector<16x4xf32>,
    %c0_72 = arith.constant 0 : index
    %c3 = arith.constant 3 : index
    %c0_73 = arith.constant 0 : index
    %c0_74 = arith.constant 0 : index
    %141 = vector.load %arg2[%c0_72, %c3, %c0_73, %c0_74] : memref<1x16x16x4xf32, #tpu.memory_space<vmem>>, vector<1x1x16x4xf32>
    %142 = vector.shape_cast %141 : vector<1x1x16x4xf32> to vector<16x4xf32>
    %c97_75 = arith.constant 97 : index
    %c0_76 = arith.constant 0 : index
    %143 = vector.load %arg11[%c97_75, %c0_76] : memref<456x8xf32, #tpu.memory_space<vmem>>, vector<16x4xf32>
    tpu.vector_store %arg11[%c97_75, %c0_76], %142 {strides = array<i32>} : memref<456x8xf32, #tpu.memory_space<vmem>>, vector<16x4xf32>,
    %c0_77 = arith.constant 0 : index
    %c4_78 = arith.constant 4 : index
    %c0_79 = arith.constant 0 : index
    %c0_80 = arith.constant 0 : index
    %144 = vector.load %arg2[%c0_77, %c4_78, %c0_79, %c0_80] : memref<1x16x16x4xf32, #tpu.memory_space<vmem>>, vector<1x1x16x4xf32>
    %145 = vector.shape_cast %144 : vector<1x1x16x4xf32> to vector<16x4xf32>
    %c121_81 = arith.constant 121 : index
    %c0_82 = arith.constant 0 : index
    %146 = vector.load %arg11[%c121_81, %c0_82] : memref<456x8xf32, #tpu.memory_space<vmem>>, vector<16x4xf32>
    tpu.vector_store %arg11[%c121_81, %c0_82], %145 {strides = array<i32>} : memref<456x8xf32, #tpu.memory_space<vmem>>, vector<16x4xf32>,
    %c0_83 = arith.constant 0 : index
    %c5 = arith.constant 5 : index
    %c0_84 = arith.constant 0 : index
    %c0_85 = arith.constant 0 : index
    %147 = vector.load %arg2[%c0_83, %c5, %c0_84, %c0_85] : memref<1x16x16x4xf32, #tpu.memory_space<vmem>>, vector<1x1x16x4xf32>
    %148 = vector.shape_cast %147 : vector<1x1x16x4xf32> to vector<16x4xf32>
    %c145_86 = arith.constant 145 : index
    %c0_87 = arith.constant 0 : index
    %149 = vector.load %arg11[%c145_86, %c0_87] : memref<456x8xf32, #tpu.memory_space<vmem>>, vector<16x4xf32>
    tpu.vector_store %arg11[%c145_86, %c0_87], %148 {strides = array<i32>} : memref<456x8xf32, #tpu.memory_space<vmem>>, vector<16x4xf32>,
    %c0_88 = arith.constant 0 : index
    %c6 = arith.constant 6 : index
    %c0_89 = arith.constant 0 : index
    %c0_90 = arith.constant 0 : index
    %150 = vector.load %arg2[%c0_88, %c6, %c0_89, %c0_90] : memref<1x16x16x4xf32, #tpu.memory_space<vmem>>, vector<1x1x16x4xf32>
    %151 = vector.shape_cast %150 : vector<1x1x16x4xf32> to vector<16x4xf32>
    %c169_91 = arith.constant 169 : index
    %c0_92 = arith.constant 0 : index
    %152 = vector.load %arg11[%c169_91, %c0_92] : memref<456x8xf32, #tpu.memory_space<vmem>>, vector<16x4xf32>
    tpu.vector_store %arg11[%c169_91, %c0_92], %151 {strides = array<i32>} : memref<456x8xf32, #tpu.memory_space<vmem>>, vector<16x4xf32>,
    %c0_93 = arith.constant 0 : index
    %c7 = arith.constant 7 : index
    %c0_94 = arith.constant 0 : index
    %c0_95 = arith.constant 0 : index
    %153 = vector.load %arg2[%c0_93, %c7, %c0_94, %c0_95] : memref<1x16x16x4xf32, #tpu.memory_space<vmem>>, vector<1x1x16x4xf32>
    %154 = vector.shape_cast %153 : vector<1x1x16x4xf32> to vector<16x4xf32>
    %c193_96 = arith.constant 193 : index
    %c0_97 = arith.constant 0 : index
    %155 = vector.load %arg11[%c193_96, %c0_97] : memref<456x8xf32, #tpu.memory_space<vmem>>, vector<16x4xf32>
    tpu.vector_store %arg11[%c193_96, %c0_97], %154 {strides = array<i32>} : memref<456x8xf32, #tpu.memory_space<vmem>>, vector<16x4xf32>,
    %c0_98 = arith.constant 0 : index
    %c8 = arith.constant 8 : index
    %c0_99 = arith.constant 0 : index
    %c0_100 = arith.constant 0 : index
    %156 = vector.load %arg2[%c0_98, %c8, %c0_99, %c0_100] : memref<1x16x16x4xf32, #tpu.memory_space<vmem>>, vector<1x1x16x4xf32>
    %157 = vector.shape_cast %156 : vector<1x1x16x4xf32> to vector<16x4xf32>
    %c217_101 = arith.constant 217 : index
    %c0_102 = arith.constant 0 : index
    %158 = vector.load %arg11[%c217_101, %c0_102] : memref<456x8xf32, #tpu.memory_space<vmem>>, vector<16x4xf32>
    tpu.vector_store %arg11[%c217_101, %c0_102], %157 {strides = array<i32>} : memref<456x8xf32, #tpu.memory_space<vmem>>, vector<16x4xf32>,
    %c0_103 = arith.constant 0 : index
    %c9 = arith.constant 9 : index
    %c0_104 = arith.constant 0 : index
    %c0_105 = arith.constant 0 : index
    %159 = vector.load %arg2[%c0_103, %c9, %c0_104, %c0_105] : memref<1x16x16x4xf32, #tpu.memory_space<vmem>>, vector<1x1x16x4xf32>
    %160 = vector.shape_cast %159 : vector<1x1x16x4xf32> to vector<16x4xf32>
    %c241_106 = arith.constant 241 : index
    %c0_107 = arith.constant 0 : index
    %161 = vector.load %arg11[%c241_106, %c0_107] : memref<456x8xf32, #tpu.memory_space<vmem>>, vector<16x4xf32>
    tpu.vector_store %arg11[%c241_106, %c0_107], %160 {strides = array<i32>} : memref<456x8xf32, #tpu.memory_space<vmem>>, vector<16x4xf32>,
    %c0_108 = arith.constant 0 : index
    %c10 = arith.constant 10 : index
    %c0_109 = arith.constant 0 : index
    %c0_110 = arith.constant 0 : index
    %162 = vector.load %arg2[%c0_108, %c10, %c0_109, %c0_110] : memref<1x16x16x4xf32, #tpu.memory_space<vmem>>, vector<1x1x16x4xf32>
    %163 = vector.shape_cast %162 : vector<1x1x16x4xf32> to vector<16x4xf32>
    %c265_111 = arith.constant 265 : index
    %c0_112 = arith.constant 0 : index
    %164 = vector.load %arg11[%c265_111, %c0_112] : memref<456x8xf32, #tpu.memory_space<vmem>>, vector<16x4xf32>
    tpu.vector_store %arg11[%c265_111, %c0_112], %163 {strides = array<i32>} : memref<456x8xf32, #tpu.memory_space<vmem>>, vector<16x4xf32>,
    %c0_113 = arith.constant 0 : index
    %c11 = arith.constant 11 : index
    %c0_114 = arith.constant 0 : index
    %c0_115 = arith.constant 0 : index
    %165 = vector.load %arg2[%c0_113, %c11, %c0_114, %c0_115] : memref<1x16x16x4xf32, #tpu.memory_space<vmem>>, vector<1x1x16x4xf32>
    %166 = vector.shape_cast %165 : vector<1x1x16x4xf32> to vector<16x4xf32>
    %c289_116 = arith.constant 289 : index
    %c0_117 = arith.constant 0 : index
    %167 = vector.load %arg11[%c289_116, %c0_117] : memref<456x8xf32, #tpu.memory_space<vmem>>, vector<16x4xf32>
    tpu.vector_store %arg11[%c289_116, %c0_117], %166 {strides = array<i32>} : memref<456x8xf32, #tpu.memory_space<vmem>>, vector<16x4xf32>,
    %c0_118 = arith.constant 0 : index
    %c12 = arith.constant 12 : index
    %c0_119 = arith.constant 0 : index
    %c0_120 = arith.constant 0 : index
    %168 = vector.load %arg2[%c0_118, %c12, %c0_119, %c0_120] : memref<1x16x16x4xf32, #tpu.memory_space<vmem>>, vector<1x1x16x4xf32>
    %169 = vector.shape_cast %168 : vector<1x1x16x4xf32> to vector<16x4xf32>
    %c313_121 = arith.constant 313 : index
    %c0_122 = arith.constant 0 : index
    %170 = vector.load %arg11[%c313_121, %c0_122] : memref<456x8xf32, #tpu.memory_space<vmem>>, vector<16x4xf32>
    tpu.vector_store %arg11[%c313_121, %c0_122], %169 {strides = array<i32>} : memref<456x8xf32, #tpu.memory_space<vmem>>, vector<16x4xf32>,
    %c0_123 = arith.constant 0 : index
    %c13 = arith.constant 13 : index
    %c0_124 = arith.constant 0 : index
    %c0_125 = arith.constant 0 : index
    %171 = vector.load %arg2[%c0_123, %c13, %c0_124, %c0_125] : memref<1x16x16x4xf32, #tpu.memory_space<vmem>>, vector<1x1x16x4xf32>
    %172 = vector.shape_cast %171 : vector<1x1x16x4xf32> to vector<16x4xf32>
    %c337_126 = arith.constant 337 : index
    %c0_127 = arith.constant 0 : index
    %173 = vector.load %arg11[%c337_126, %c0_127] : memref<456x8xf32, #tpu.memory_space<vmem>>, vector<16x4xf32>
    tpu.vector_store %arg11[%c337_126, %c0_127], %172 {strides = array<i32>} : memref<456x8xf32, #tpu.memory_space<vmem>>, vector<16x4xf32>,
    %c0_128 = arith.constant 0 : index
    %c14 = arith.constant 14 : index
    %c0_129 = arith.constant 0 : index
    %c0_130 = arith.constant 0 : index
    %174 = vector.load %arg2[%c0_128, %c14, %c0_129, %c0_130] : memref<1x16x16x4xf32, #tpu.memory_space<vmem>>, vector<1x1x16x4xf32>
    %175 = vector.shape_cast %174 : vector<1x1x16x4xf32> to vector<16x4xf32>
    %c361_131 = arith.constant 361 : index
    %c0_132 = arith.constant 0 : index
    %176 = vector.load %arg11[%c361_131, %c0_132] : memref<456x8xf32, #tpu.memory_space<vmem>>, vector<16x4xf32>
    tpu.vector_store %arg11[%c361_131, %c0_132], %175 {strides = array<i32>} : memref<456x8xf32, #tpu.memory_space<vmem>>, vector<16x4xf32>,
    %c0_133 = arith.constant 0 : index
    %c15 = arith.constant 15 : index
    %c0_134 = arith.constant 0 : index
    %c0_135 = arith.constant 0 : index
    %177 = vector.load %arg2[%c0_133, %c15, %c0_134, %c0_135] : memref<1x16x16x4xf32, #tpu.memory_space<vmem>>, vector<1x1x16x4xf32>
    %178 = vector.shape_cast %177 : vector<1x1x16x4xf32> to vector<16x4xf32>
    %c385_136 = arith.constant 385 : index
    %c0_137 = arith.constant 0 : index
    %179 = vector.load %arg11[%c385_136, %c0_137] : memref<456x8xf32, #tpu.memory_space<vmem>>, vector<16x4xf32>
    tpu.vector_store %arg11[%c385_136, %c0_137], %178 {strides = array<i32>} : memref<456x8xf32, #tpu.memory_space<vmem>>, vector<16x4xf32>,
    %c0_138 = arith.constant 0 : index
    %c0_139 = arith.constant 0 : index
    %180 = vector.load %arg11[%c0_138, %c0_139] : memref<456x8xf32, #tpu.memory_space<vmem>>, vector<384x8xf32>
    %c0_140 = arith.constant 0 : index
    %c0_141 = arith.constant 0 : index
    %c0_142 = arith.constant 0 : index
    %181 = vector.load %arg4[%c0_140, %c0_141, %c0_142] : memref<9x8x4xf32, #tpu.memory_space<vmem>>, vector<1x8x4xf32>
    %182 = vector.shape_cast %181 : vector<1x8x4xf32> to vector<8x4xf32>
    %cst_143 = arith.constant dense<0.000000e+00> : vector<384x4xf32>
    %183 = tpu.matmul %180, %182, %cst_143 {dimension_numbers = #tpu.dot_dimension_numbers<[1], [0], [0], [1], [0, 0, 1, 1], [], []>} : vector<384x8xf32>, vector<8x4xf32>, vector<384x4xf32> -> vector<384x4xf32>
    %c1_144 = arith.constant 1 : index
    %c0_145 = arith.constant 0 : index
    %184 = vector.load %arg11[%c1_144, %c0_145] : memref<456x8xf32, #tpu.memory_space<vmem>>, vector<384x8xf32>
    %c1_146 = arith.constant 1 : index
    %c0_147 = arith.constant 0 : index
    %c0_148 = arith.constant 0 : index
    %185 = vector.load %arg4[%c1_146, %c0_147, %c0_148] : memref<9x8x4xf32, #tpu.memory_space<vmem>>, vector<1x8x4xf32>
    %186 = vector.shape_cast %185 : vector<1x8x4xf32> to vector<8x4xf32>
    %cst_149 = arith.constant dense<0.000000e+00> : vector<384x4xf32>
    %187 = tpu.matmul %184, %186, %cst_149 {dimension_numbers = #tpu.dot_dimension_numbers<[1], [0], [0], [1], [0, 0, 1, 1], [], []>} : vector<384x8xf32>, vector<8x4xf32>, vector<384x4xf32> -> vector<384x4xf32>
    %c2_150 = arith.constant 2 : index
    %c0_151 = arith.constant 0 : index
    %188 = vector.load %arg11[%c2_150, %c0_151] : memref<456x8xf32, #tpu.memory_space<vmem>>, vector<384x8xf32>
    %c2_152 = arith.constant 2 : index
    %c0_153 = arith.constant 0 : index
    %c0_154 = arith.constant 0 : index
    %189 = vector.load %arg4[%c2_152, %c0_153, %c0_154] : memref<9x8x4xf32, #tpu.memory_space<vmem>>, vector<1x8x4xf32>
    %190 = vector.shape_cast %189 : vector<1x8x4xf32> to vector<8x4xf32>
    %cst_155 = arith.constant dense<0.000000e+00> : vector<384x4xf32>
    %191 = tpu.matmul %188, %190, %cst_155 {dimension_numbers = #tpu.dot_dimension_numbers<[1], [0], [0], [1], [0, 0, 1, 1], [], []>} : vector<384x8xf32>, vector<8x4xf32>, vector<384x4xf32> -> vector<384x4xf32>
    %192 = arith.addf %183, %191 : vector<384x4xf32>
    %c24 = arith.constant 24 : index
    %c0_156 = arith.constant 0 : index
    %193 = vector.load %arg11[%c24, %c0_156] : memref<456x8xf32, #tpu.memory_space<vmem>>, vector<384x8xf32>
    %c3_157 = arith.constant 3 : index
    %c0_158 = arith.constant 0 : index
    %c0_159 = arith.constant 0 : index
    %194 = vector.load %arg4[%c3_157, %c0_158, %c0_159] : memref<9x8x4xf32, #tpu.memory_space<vmem>>, vector<1x8x4xf32>
    %195 = vector.shape_cast %194 : vector<1x8x4xf32> to vector<8x4xf32>
    %cst_160 = arith.constant dense<0.000000e+00> : vector<384x4xf32>
    %196 = tpu.matmul %193, %195, %cst_160 {dimension_numbers = #tpu.dot_dimension_numbers<[1], [0], [0], [1], [0, 0, 1, 1], [], []>} : vector<384x8xf32>, vector<8x4xf32>, vector<384x4xf32> -> vector<384x4xf32>
    %197 = arith.addf %187, %196 : vector<384x4xf32>
    %c25_161 = arith.constant 25 : index
    %c0_162 = arith.constant 0 : index
    %198 = vector.load %arg11[%c25_161, %c0_162] : memref<456x8xf32, #tpu.memory_space<vmem>>, vector<384x8xf32>
    %c4_163 = arith.constant 4 : index
    %c0_164 = arith.constant 0 : index
    %c0_165 = arith.constant 0 : index
    %199 = vector.load %arg4[%c4_163, %c0_164, %c0_165] : memref<9x8x4xf32, #tpu.memory_space<vmem>>, vector<1x8x4xf32>
    %200 = vector.shape_cast %199 : vector<1x8x4xf32> to vector<8x4xf32>
    %cst_166 = arith.constant dense<0.000000e+00> : vector<384x4xf32>
    %201 = tpu.matmul %198, %200, %cst_166 {dimension_numbers = #tpu.dot_dimension_numbers<[1], [0], [0], [1], [0, 0, 1, 1], [], []>} : vector<384x8xf32>, vector<8x4xf32>, vector<384x4xf32> -> vector<384x4xf32>
    %202 = arith.addf %192, %201 : vector<384x4xf32>
    %c26 = arith.constant 26 : index
    %c0_167 = arith.constant 0 : index
    %203 = vector.load %arg11[%c26, %c0_167] : memref<456x8xf32, #tpu.memory_space<vmem>>, vector<384x8xf32>
    %c5_168 = arith.constant 5 : index
    %c0_169 = arith.constant 0 : index
    %c0_170 = arith.constant 0 : index
    %204 = vector.load %arg4[%c5_168, %c0_169, %c0_170] : memref<9x8x4xf32, #tpu.memory_space<vmem>>, vector<1x8x4xf32>
    %205 = vector.shape_cast %204 : vector<1x8x4xf32> to vector<8x4xf32>
    %cst_171 = arith.constant dense<0.000000e+00> : vector<384x4xf32>
    %206 = tpu.matmul %203, %205, %cst_171 {dimension_numbers = #tpu.dot_dimension_numbers<[1], [0], [0], [1], [0, 0, 1, 1], [], []>} : vector<384x8xf32>, vector<8x4xf32>, vector<384x4xf32> -> vector<384x4xf32>
    %207 = arith.addf %197, %206 : vector<384x4xf32>
    %c48 = arith.constant 48 : index
    %c0_172 = arith.constant 0 : index
    %208 = vector.load %arg11[%c48, %c0_172] : memref<456x8xf32, #tpu.memory_space<vmem>>, vector<384x8xf32>
    %c6_173 = arith.constant 6 : index
    %c0_174 = arith.constant 0 : index
    %c0_175 = arith.constant 0 : index
    %209 = vector.load %arg4[%c6_173, %c0_174, %c0_175] : memref<9x8x4xf32, #tpu.memory_space<vmem>>, vector<1x8x4xf32>
    %210 = vector.shape_cast %209 : vector<1x8x4xf32> to vector<8x4xf32>
    %cst_176 = arith.constant dense<0.000000e+00> : vector<384x4xf32>
    %211 = tpu.matmul %208, %210, %cst_176 {dimension_numbers = #tpu.dot_dimension_numbers<[1], [0], [0], [1], [0, 0, 1, 1], [], []>} : vector<384x8xf32>, vector<8x4xf32>, vector<384x4xf32> -> vector<384x4xf32>
    %212 = arith.addf %202, %211 : vector<384x4xf32>
    %c49_177 = arith.constant 49 : index
    %c0_178 = arith.constant 0 : index
    %213 = vector.load %arg11[%c49_177, %c0_178] : memref<456x8xf32, #tpu.memory_space<vmem>>, vector<384x8xf32>
    %c7_179 = arith.constant 7 : index
    %c0_180 = arith.constant 0 : index
    %c0_181 = arith.constant 0 : index
    %214 = vector.load %arg4[%c7_179, %c0_180, %c0_181] : memref<9x8x4xf32, #tpu.memory_space<vmem>>, vector<1x8x4xf32>
    %215 = vector.shape_cast %214 : vector<1x8x4xf32> to vector<8x4xf32>
    %cst_182 = arith.constant dense<0.000000e+00> : vector<384x4xf32>
    %216 = tpu.matmul %213, %215, %cst_182 {dimension_numbers = #tpu.dot_dimension_numbers<[1], [0], [0], [1], [0, 0, 1, 1], [], []>} : vector<384x8xf32>, vector<8x4xf32>, vector<384x4xf32> -> vector<384x4xf32>
    %217 = arith.addf %207, %216 : vector<384x4xf32>
    %c50 = arith.constant 50 : index
    %c0_183 = arith.constant 0 : index
    %218 = vector.load %arg11[%c50, %c0_183] : memref<456x8xf32, #tpu.memory_space<vmem>>, vector<384x8xf32>
    %c8_184 = arith.constant 8 : index
    %c0_185 = arith.constant 0 : index
    %c0_186 = arith.constant 0 : index
    %219 = vector.load %arg4[%c8_184, %c0_185, %c0_186] : memref<9x8x4xf32, #tpu.memory_space<vmem>>, vector<1x8x4xf32>
    %220 = vector.shape_cast %219 : vector<1x8x4xf32> to vector<8x4xf32>
    %cst_187 = arith.constant dense<0.000000e+00> : vector<384x4xf32>
    %221 = tpu.matmul %218, %220, %cst_187 {dimension_numbers = #tpu.dot_dimension_numbers<[1], [0], [0], [1], [0, 0, 1, 1], [], []>} : vector<384x8xf32>, vector<8x4xf32>, vector<384x4xf32> -> vector<384x4xf32>
    %222 = arith.addf %212, %221 : vector<384x4xf32>
    %223 = arith.addf %222, %217 : vector<384x4xf32>
    %c0_188 = arith.constant 0 : index
    %c0_189 = arith.constant 0 : index
    %224 = vector.load %arg6[%c0_188, %c0_189] : memref<1x4xf32, #tpu.memory_space<vmem>>, vector<1x4xf32>
    %225 = vector.broadcast %224 : vector<1x4xf32> to vector<384x4xf32>
    %226 = arith.mulf %223, %225 : vector<384x4xf32>
    %c0_190 = arith.constant 0 : index
    %c0_191 = arith.constant 0 : index
    %227 = vector.load %arg7[%c0_190, %c0_191] : memref<1x4xf32, #tpu.memory_space<vmem>>, vector<1x4xf32>
    %228 = vector.broadcast %227 : vector<1x4xf32> to vector<384x4xf32>
    %229 = arith.addf %226, %228 : vector<384x4xf32>
    %cst_192 = arith.constant 0.000000e+00 : f32
    %230 = vector.broadcast %cst_192 : f32 to vector<384x4xf32>
    %231 = arith.maximumf %229, %230 : vector<384x4xf32>
    %232 = vector.extract_strided_slice %231 {offsets = [0, 0], sizes = [16, 4], strides = [1, 1]} : vector<384x4xf32> to vector<16x4xf32>
    %c25_193 = arith.constant 25 : index
    %c0_194 = arith.constant 0 : index
    %233 = vector.load %arg12[%c25_193, %c0_194] : memref<456x4xf32, #tpu.memory_space<vmem>>, vector<16x4xf32>
    tpu.vector_store %arg12[%c25_193, %c0_194], %232 {strides = array<i32>} : memref<456x4xf32, #tpu.memory_space<vmem>>, vector<16x4xf32>,
    %234 = vector.extract_strided_slice %231 {offsets = [24, 0], sizes = [16, 4], strides = [1, 1]} : vector<384x4xf32> to vector<16x4xf32>
    %c49_195 = arith.constant 49 : index
    %c0_196 = arith.constant 0 : index
    %235 = vector.load %arg12[%c49_195, %c0_196] : memref<456x4xf32, #tpu.memory_space<vmem>>, vector<16x4xf32>
    tpu.vector_store %arg12[%c49_195, %c0_196], %234 {strides = array<i32>} : memref<456x4xf32, #tpu.memory_space<vmem>>, vector<16x4xf32>,
    %236 = vector.extract_strided_slice %231 {offsets = [48, 0], sizes = [16, 4], strides = [1, 1]} : vector<384x4xf32> to vector<16x4xf32>
    %c73_197 = arith.constant 73 : index
    %c0_198 = arith.constant 0 : index
    %237 = vector.load %arg12[%c73_197, %c0_198] : memref<456x4xf32, #tpu.memory_space<vmem>>, vector<16x4xf32>
    tpu.vector_store %arg12[%c73_197, %c0_198], %236 {strides = array<i32>} : memref<456x4xf32, #tpu.memory_space<vmem>>, vector<16x4xf32>,
    %238 = vector.extract_strided_slice %231 {offsets = [72, 0], sizes = [16, 4], strides = [1, 1]} : vector<384x4xf32> to vector<16x4xf32>
    %c97_199 = arith.constant 97 : index
    %c0_200 = arith.constant 0 : index
    %239 = vector.load %arg12[%c97_199, %c0_200] : memref<456x4xf32, #tpu.memory_space<vmem>>, vector<16x4xf32>
    tpu.vector_store %arg12[%c97_199, %c0_200], %238 {strides = array<i32>} : memref<456x4xf32, #tpu.memory_space<vmem>>, vector<16x4xf32>,
    %240 = vector.extract_strided_slice %231 {offsets = [96, 0], sizes = [16, 4], strides = [1, 1]} : vector<384x4xf32> to vector<16x4xf32>
    %c121_201 = arith.constant 121 : index
    %c0_202 = arith.constant 0 : index
    %241 = vector.load %arg12[%c121_201, %c0_202] : memref<456x4xf32, #tpu.memory_space<vmem>>, vector<16x4xf32>
    tpu.vector_store %arg12[%c121_201, %c0_202], %240 {strides = array<i32>} : memref<456x4xf32, #tpu.memory_space<vmem>>, vector<16x4xf32>,
    %242 = vector.extract_strided_slice %231 {offsets = [120, 0], sizes = [16, 4], strides = [1, 1]} : vector<384x4xf32> to vector<16x4xf32>
    %c145_203 = arith.constant 145 : index
    %c0_204 = arith.constant 0 : index
    %243 = vector.load %arg12[%c145_203, %c0_204] : memref<456x4xf32, #tpu.memory_space<vmem>>, vector<16x4xf32>
    tpu.vector_store %arg12[%c145_203, %c0_204], %242 {strides = array<i32>} : memref<456x4xf32, #tpu.memory_space<vmem>>, vector<16x4xf32>,
    %244 = vector.extract_strided_slice %231 {offsets = [144, 0], sizes = [16, 4], strides = [1, 1]} : vector<384x4xf32> to vector<16x4xf32>
    %c169_205 = arith.constant 169 : index
    %c0_206 = arith.constant 0 : index
    %245 = vector.load %arg12[%c169_205, %c0_206] : memref<456x4xf32, #tpu.memory_space<vmem>>, vector<16x4xf32>
    tpu.vector_store %arg12[%c169_205, %c0_206], %244 {strides = array<i32>} : memref<456x4xf32, #tpu.memory_space<vmem>>, vector<16x4xf32>,
    %246 = vector.extract_strided_slice %231 {offsets = [168, 0], sizes = [16, 4], strides = [1, 1]} : vector<384x4xf32> to vector<16x4xf32>
    %c193_207 = arith.constant 193 : index
    %c0_208 = arith.constant 0 : index
    %247 = vector.load %arg12[%c193_207, %c0_208] : memref<456x4xf32, #tpu.memory_space<vmem>>, vector<16x4xf32>
    tpu.vector_store %arg12[%c193_207, %c0_208], %246 {strides = array<i32>} : memref<456x4xf32, #tpu.memory_space<vmem>>, vector<16x4xf32>,
    %248 = vector.extract_strided_slice %231 {offsets = [192, 0], sizes = [16, 4], strides = [1, 1]} : vector<384x4xf32> to vector<16x4xf32>
    %c217_209 = arith.constant 217 : index
    %c0_210 = arith.constant 0 : index
    %249 = vector.load %arg12[%c217_209, %c0_210] : memref<456x4xf32, #tpu.memory_space<vmem>>, vector<16x4xf32>
    tpu.vector_store %arg12[%c217_209, %c0_210], %248 {strides = array<i32>} : memref<456x4xf32, #tpu.memory_space<vmem>>, vector<16x4xf32>,
    %250 = vector.extract_strided_slice %231 {offsets = [216, 0], sizes = [16, 4], strides = [1, 1]} : vector<384x4xf32> to vector<16x4xf32>
    %c241_211 = arith.constant 241 : index
    %c0_212 = arith.constant 0 : index
    %251 = vector.load %arg12[%c241_211, %c0_212] : memref<456x4xf32, #tpu.memory_space<vmem>>, vector<16x4xf32>
    tpu.vector_store %arg12[%c241_211, %c0_212], %250 {strides = array<i32>} : memref<456x4xf32, #tpu.memory_space<vmem>>, vector<16x4xf32>,
    %252 = vector.extract_strided_slice %231 {offsets = [240, 0], sizes = [16, 4], strides = [1, 1]} : vector<384x4xf32> to vector<16x4xf32>
    %c265_213 = arith.constant 265 : index
    %c0_214 = arith.constant 0 : index
    %253 = vector.load %arg12[%c265_213, %c0_214] : memref<456x4xf32, #tpu.memory_space<vmem>>, vector<16x4xf32>
    tpu.vector_store %arg12[%c265_213, %c0_214], %252 {strides = array<i32>} : memref<456x4xf32, #tpu.memory_space<vmem>>, vector<16x4xf32>,
    %254 = vector.extract_strided_slice %231 {offsets = [264, 0], sizes = [16, 4], strides = [1, 1]} : vector<384x4xf32> to vector<16x4xf32>
    %c289_215 = arith.constant 289 : index
    %c0_216 = arith.constant 0 : index
    %255 = vector.load %arg12[%c289_215, %c0_216] : memref<456x4xf32, #tpu.memory_space<vmem>>, vector<16x4xf32>
    tpu.vector_store %arg12[%c289_215, %c0_216], %254 {strides = array<i32>} : memref<456x4xf32, #tpu.memory_space<vmem>>, vector<16x4xf32>,
    %256 = vector.extract_strided_slice %231 {offsets = [288, 0], sizes = [16, 4], strides = [1, 1]} : vector<384x4xf32> to vector<16x4xf32>
    %c313_217 = arith.constant 313 : index
    %c0_218 = arith.constant 0 : index
    %257 = vector.load %arg12[%c313_217, %c0_218] : memref<456x4xf32, #tpu.memory_space<vmem>>, vector<16x4xf32>
    tpu.vector_store %arg12[%c313_217, %c0_218], %256 {strides = array<i32>} : memref<456x4xf32, #tpu.memory_space<vmem>>, vector<16x4xf32>,
    %258 = vector.extract_strided_slice %231 {offsets = [312, 0], sizes = [16, 4], strides = [1, 1]} : vector<384x4xf32> to vector<16x4xf32>
    %c337_219 = arith.constant 337 : index
    %c0_220 = arith.constant 0 : index
    %259 = vector.load %arg12[%c337_219, %c0_220] : memref<456x4xf32, #tpu.memory_space<vmem>>, vector<16x4xf32>
    tpu.vector_store %arg12[%c337_219, %c0_220], %258 {strides = array<i32>} : memref<456x4xf32, #tpu.memory_space<vmem>>, vector<16x4xf32>,
    %260 = vector.extract_strided_slice %231 {offsets = [336, 0], sizes = [16, 4], strides = [1, 1]} : vector<384x4xf32> to vector<16x4xf32>
    %c361_221 = arith.constant 361 : index
    %c0_222 = arith.constant 0 : index
    %261 = vector.load %arg12[%c361_221, %c0_222] : memref<456x4xf32, #tpu.memory_space<vmem>>, vector<16x4xf32>
    tpu.vector_store %arg12[%c361_221, %c0_222], %260 {strides = array<i32>} : memref<456x4xf32, #tpu.memory_space<vmem>>, vector<16x4xf32>,
    %262 = vector.extract_strided_slice %231 {offsets = [360, 0], sizes = [16, 4], strides = [1, 1]} : vector<384x4xf32> to vector<16x4xf32>
    %c385_223 = arith.constant 385 : index
    %c0_224 = arith.constant 0 : index
    %263 = vector.load %arg12[%c385_223, %c0_224] : memref<456x4xf32, #tpu.memory_space<vmem>>, vector<16x4xf32>
    tpu.vector_store %arg12[%c385_223, %c0_224], %262 {strides = array<i32>} : memref<456x4xf32, #tpu.memory_space<vmem>>, vector<16x4xf32>,
    %c0_225 = arith.constant 0 : index
    %c0_226 = arith.constant 0 : index
    %264 = vector.load %arg12[%c0_225, %c0_226] : memref<456x4xf32, #tpu.memory_space<vmem>>, vector<384x4xf32>
    %c0_227 = arith.constant 0 : index
    %c0_228 = arith.constant 0 : index
    %c0_229 = arith.constant 0 : index
    %265 = vector.load %arg5[%c0_227, %c0_228, %c0_229] : memref<9x4x4xf32, #tpu.memory_space<vmem>>, vector<1x4x4xf32>
    %266 = vector.shape_cast %265 : vector<1x4x4xf32> to vector<4x4xf32>
    %cst_230 = arith.constant dense<0.000000e+00> : vector<384x4xf32>
    %267 = tpu.matmul %264, %266, %cst_230 {dimension_numbers = #tpu.dot_dimension_numbers<[1], [0], [0], [1], [0, 0, 1, 1], [], []>} : vector<384x4xf32>, vector<4x4xf32>, vector<384x4xf32> -> vector<384x4xf32>
    %c1_231 = arith.constant 1 : index
    %c0_232 = arith.constant 0 : index
    %268 = vector.load %arg12[%c1_231, %c0_232] : memref<456x4xf32, #tpu.memory_space<vmem>>, vector<384x4xf32>
    %c1_233 = arith.constant 1 : index
    %c0_234 = arith.constant 0 : index
    %c0_235 = arith.constant 0 : index
    %269 = vector.load %arg5[%c1_233, %c0_234, %c0_235] : memref<9x4x4xf32, #tpu.memory_space<vmem>>, vector<1x4x4xf32>
    %270 = vector.shape_cast %269 : vector<1x4x4xf32> to vector<4x4xf32>
    %cst_236 = arith.constant dense<0.000000e+00> : vector<384x4xf32>
    %271 = tpu.matmul %268, %270, %cst_236 {dimension_numbers = #tpu.dot_dimension_numbers<[1], [0], [0], [1], [0, 0, 1, 1], [], []>} : vector<384x4xf32>, vector<4x4xf32>, vector<384x4xf32> -> vector<384x4xf32>
    %c2_237 = arith.constant 2 : index
    %c0_238 = arith.constant 0 : index
    %272 = vector.load %arg12[%c2_237, %c0_238] : memref<456x4xf32, #tpu.memory_space<vmem>>, vector<384x4xf32>
    %c2_239 = arith.constant 2 : index
    %c0_240 = arith.constant 0 : index
    %c0_241 = arith.constant 0 : index
    %273 = vector.load %arg5[%c2_239, %c0_240, %c0_241] : memref<9x4x4xf32, #tpu.memory_space<vmem>>, vector<1x4x4xf32>
    %274 = vector.shape_cast %273 : vector<1x4x4xf32> to vector<4x4xf32>
    %cst_242 = arith.constant dense<0.000000e+00> : vector<384x4xf32>
    %275 = tpu.matmul %272, %274, %cst_242 {dimension_numbers = #tpu.dot_dimension_numbers<[1], [0], [0], [1], [0, 0, 1, 1], [], []>} : vector<384x4xf32>, vector<4x4xf32>, vector<384x4xf32> -> vector<384x4xf32>
    %276 = arith.addf %267, %275 : vector<384x4xf32>
    %c24_243 = arith.constant 24 : index
    %c0_244 = arith.constant 0 : index
    %277 = vector.load %arg12[%c24_243, %c0_244] : memref<456x4xf32, #tpu.memory_space<vmem>>, vector<384x4xf32>
    %c3_245 = arith.constant 3 : index
    %c0_246 = arith.constant 0 : index
    %c0_247 = arith.constant 0 : index
    %278 = vector.load %arg5[%c3_245, %c0_246, %c0_247] : memref<9x4x4xf32, #tpu.memory_space<vmem>>, vector<1x4x4xf32>
    %279 = vector.shape_cast %278 : vector<1x4x4xf32> to vector<4x4xf32>
    %cst_248 = arith.constant dense<0.000000e+00> : vector<384x4xf32>
    %280 = tpu.matmul %277, %279, %cst_248 {dimension_numbers = #tpu.dot_dimension_numbers<[1], [0], [0], [1], [0, 0, 1, 1], [], []>} : vector<384x4xf32>, vector<4x4xf32>, vector<384x4xf32> -> vector<384x4xf32>
    %281 = arith.addf %271, %280 : vector<384x4xf32>
    %c25_249 = arith.constant 25 : index
    %c0_250 = arith.constant 0 : index
    %282 = vector.load %arg12[%c25_249, %c0_250] : memref<456x4xf32, #tpu.memory_space<vmem>>, vector<384x4xf32>
    %c4_251 = arith.constant 4 : index
    %c0_252 = arith.constant 0 : index
    %c0_253 = arith.constant 0 : index
    %283 = vector.load %arg5[%c4_251, %c0_252, %c0_253] : memref<9x4x4xf32, #tpu.memory_space<vmem>>, vector<1x4x4xf32>
    %284 = vector.shape_cast %283 : vector<1x4x4xf32> to vector<4x4xf32>
    %cst_254 = arith.constant dense<0.000000e+00> : vector<384x4xf32>
    %285 = tpu.matmul %282, %284, %cst_254 {dimension_numbers = #tpu.dot_dimension_numbers<[1], [0], [0], [1], [0, 0, 1, 1], [], []>} : vector<384x4xf32>, vector<4x4xf32>, vector<384x4xf32> -> vector<384x4xf32>
    %286 = arith.addf %276, %285 : vector<384x4xf32>
    %c26_255 = arith.constant 26 : index
    %c0_256 = arith.constant 0 : index
    %287 = vector.load %arg12[%c26_255, %c0_256] : memref<456x4xf32, #tpu.memory_space<vmem>>, vector<384x4xf32>
    %c5_257 = arith.constant 5 : index
    %c0_258 = arith.constant 0 : index
    %c0_259 = arith.constant 0 : index
    %288 = vector.load %arg5[%c5_257, %c0_258, %c0_259] : memref<9x4x4xf32, #tpu.memory_space<vmem>>, vector<1x4x4xf32>
    %289 = vector.shape_cast %288 : vector<1x4x4xf32> to vector<4x4xf32>
    %cst_260 = arith.constant dense<0.000000e+00> : vector<384x4xf32>
    %290 = tpu.matmul %287, %289, %cst_260 {dimension_numbers = #tpu.dot_dimension_numbers<[1], [0], [0], [1], [0, 0, 1, 1], [], []>} : vector<384x4xf32>, vector<4x4xf32>, vector<384x4xf32> -> vector<384x4xf32>
    %291 = arith.addf %281, %290 : vector<384x4xf32>
    %c48_261 = arith.constant 48 : index
    %c0_262 = arith.constant 0 : index
    %292 = vector.load %arg12[%c48_261, %c0_262] : memref<456x4xf32, #tpu.memory_space<vmem>>, vector<384x4xf32>
    %c6_263 = arith.constant 6 : index
    %c0_264 = arith.constant 0 : index
    %c0_265 = arith.constant 0 : index
    %293 = vector.load %arg5[%c6_263, %c0_264, %c0_265] : memref<9x4x4xf32, #tpu.memory_space<vmem>>, vector<1x4x4xf32>
    %294 = vector.shape_cast %293 : vector<1x4x4xf32> to vector<4x4xf32>
    %cst_266 = arith.constant dense<0.000000e+00> : vector<384x4xf32>
    %295 = tpu.matmul %292, %294, %cst_266 {dimension_numbers = #tpu.dot_dimension_numbers<[1], [0], [0], [1], [0, 0, 1, 1], [], []>} : vector<384x4xf32>, vector<4x4xf32>, vector<384x4xf32> -> vector<384x4xf32>
    %296 = arith.addf %286, %295 : vector<384x4xf32>
    %c49_267 = arith.constant 49 : index
    %c0_268 = arith.constant 0 : index
    %297 = vector.load %arg12[%c49_267, %c0_268] : memref<456x4xf32, #tpu.memory_space<vmem>>, vector<384x4xf32>
    %c7_269 = arith.constant 7 : index
    %c0_270 = arith.constant 0 : index
    %c0_271 = arith.constant 0 : index
    %298 = vector.load %arg5[%c7_269, %c0_270, %c0_271] : memref<9x4x4xf32, #tpu.memory_space<vmem>>, vector<1x4x4xf32>
    %299 = vector.shape_cast %298 : vector<1x4x4xf32> to vector<4x4xf32>
    %cst_272 = arith.constant dense<0.000000e+00> : vector<384x4xf32>
    %300 = tpu.matmul %297, %299, %cst_272 {dimension_numbers = #tpu.dot_dimension_numbers<[1], [0], [0], [1], [0, 0, 1, 1], [], []>} : vector<384x4xf32>, vector<4x4xf32>, vector<384x4xf32> -> vector<384x4xf32>
    %301 = arith.addf %291, %300 : vector<384x4xf32>
    %c50_273 = arith.constant 50 : index
    %c0_274 = arith.constant 0 : index
    %302 = vector.load %arg12[%c50_273, %c0_274] : memref<456x4xf32, #tpu.memory_space<vmem>>, vector<384x4xf32>
    %c8_275 = arith.constant 8 : index
    %c0_276 = arith.constant 0 : index
    %c0_277 = arith.constant 0 : index
    %303 = vector.load %arg5[%c8_275, %c0_276, %c0_277] : memref<9x4x4xf32, #tpu.memory_space<vmem>>, vector<1x4x4xf32>
    %304 = vector.shape_cast %303 : vector<1x4x4xf32> to vector<4x4xf32>
    %cst_278 = arith.constant dense<0.000000e+00> : vector<384x4xf32>
    %305 = tpu.matmul %302, %304, %cst_278 {dimension_numbers = #tpu.dot_dimension_numbers<[1], [0], [0], [1], [0, 0, 1, 1], [], []>} : vector<384x4xf32>, vector<4x4xf32>, vector<384x4xf32> -> vector<384x4xf32>
    %306 = arith.addf %296, %305 : vector<384x4xf32>
    %307 = arith.addf %306, %301 : vector<384x4xf32>
    %c0_279 = arith.constant 0 : index
    %c0_280 = arith.constant 0 : index
    %308 = vector.load %arg8[%c0_279, %c0_280] : memref<1x4xf32, #tpu.memory_space<vmem>>, vector<1x4xf32>
    %309 = vector.broadcast %308 : vector<1x4xf32> to vector<384x4xf32>
    %310 = arith.mulf %307, %309 : vector<384x4xf32>
    %c0_281 = arith.constant 0 : index
    %c0_282 = arith.constant 0 : index
    %311 = vector.load %arg9[%c0_281, %c0_282] : memref<1x4xf32, #tpu.memory_space<vmem>>, vector<1x4xf32>
    %312 = vector.broadcast %311 : vector<1x4xf32> to vector<384x4xf32>
    %313 = arith.addf %310, %312 : vector<384x4xf32>
    %cst_283 = arith.constant 0.000000e+00 : f32
    %314 = vector.broadcast %cst_283 : f32 to vector<384x4xf32>
    %315 = arith.maximumf %313, %314 : vector<384x4xf32>
    %316 = vector.extract_strided_slice %315 {offsets = [0, 0], sizes = [16, 4], strides = [1, 1]} : vector<384x4xf32> to vector<16x4xf32>
    %c0_284 = arith.constant 0 : index
    %c0_285 = arith.constant 0 : index
    %c0_286 = arith.constant 0 : index
    %c0_287 = arith.constant 0 : index
    %317 = vector.load %arg10[%c0_284, %c0_285, %c0_286, %c0_287] : memref<1x16x16x4xf32, #tpu.memory_space<vmem>>, vector<1x1x16x4xf32>
    %318 = vector.shape_cast %317 : vector<1x1x16x4xf32> to vector<16x4xf32>
    %319 = vector.shape_cast %316 : vector<16x4xf32> to vector<1x1x16x4xf32>
    tpu.vector_store %arg10[%c0_284, %c0_285, %c0_286, %c0_287], %319 {strides = array<i32>} : memref<1x16x16x4xf32, #tpu.memory_space<vmem>>, vector<1x1x16x4xf32>,
    %320 = vector.extract_strided_slice %315 {offsets = [24, 0], sizes = [16, 4], strides = [1, 1]} : vector<384x4xf32> to vector<16x4xf32>
    %c0_288 = arith.constant 0 : index
    %c1_289 = arith.constant 1 : index
    %c0_290 = arith.constant 0 : index
    %c0_291 = arith.constant 0 : index
    %321 = vector.load %arg10[%c0_288, %c1_289, %c0_290, %c0_291] : memref<1x16x16x4xf32, #tpu.memory_space<vmem>>, vector<1x1x16x4xf32>
    %322 = vector.shape_cast %321 : vector<1x1x16x4xf32> to vector<16x4xf32>
    %323 = vector.shape_cast %320 : vector<16x4xf32> to vector<1x1x16x4xf32>
    tpu.vector_store %arg10[%c0_288, %c1_289, %c0_290, %c0_291], %323 {strides = array<i32>} : memref<1x16x16x4xf32, #tpu.memory_space<vmem>>, vector<1x1x16x4xf32>,
    %324 = vector.extract_strided_slice %315 {offsets = [48, 0], sizes = [16, 4], strides = [1, 1]} : vector<384x4xf32> to vector<16x4xf32>
    %c0_292 = arith.constant 0 : index
    %c2_293 = arith.constant 2 : index
    %c0_294 = arith.constant 0 : index
    %c0_295 = arith.constant 0 : index
    %325 = vector.load %arg10[%c0_292, %c2_293, %c0_294, %c0_295] : memref<1x16x16x4xf32, #tpu.memory_space<vmem>>, vector<1x1x16x4xf32>
    %326 = vector.shape_cast %325 : vector<1x1x16x4xf32> to vector<16x4xf32>
    %327 = vector.shape_cast %324 : vector<16x4xf32> to vector<1x1x16x4xf32>
    tpu.vector_store %arg10[%c0_292, %c2_293, %c0_294, %c0_295], %327 {strides = array<i32>} : memref<1x16x16x4xf32, #tpu.memory_space<vmem>>, vector<1x1x16x4xf32>,
    %328 = vector.extract_strided_slice %315 {offsets = [72, 0], sizes = [16, 4], strides = [1, 1]} : vector<384x4xf32> to vector<16x4xf32>
    %c0_296 = arith.constant 0 : index
    %c3_297 = arith.constant 3 : index
    %c0_298 = arith.constant 0 : index
    %c0_299 = arith.constant 0 : index
    %329 = vector.load %arg10[%c0_296, %c3_297, %c0_298, %c0_299] : memref<1x16x16x4xf32, #tpu.memory_space<vmem>>, vector<1x1x16x4xf32>
    %330 = vector.shape_cast %329 : vector<1x1x16x4xf32> to vector<16x4xf32>
    %331 = vector.shape_cast %328 : vector<16x4xf32> to vector<1x1x16x4xf32>
    tpu.vector_store %arg10[%c0_296, %c3_297, %c0_298, %c0_299], %331 {strides = array<i32>} : memref<1x16x16x4xf32, #tpu.memory_space<vmem>>, vector<1x1x16x4xf32>,
    %332 = vector.extract_strided_slice %315 {offsets = [96, 0], sizes = [16, 4], strides = [1, 1]} : vector<384x4xf32> to vector<16x4xf32>
    %c0_300 = arith.constant 0 : index
    %c4_301 = arith.constant 4 : index
    %c0_302 = arith.constant 0 : index
    %c0_303 = arith.constant 0 : index
    %333 = vector.load %arg10[%c0_300, %c4_301, %c0_302, %c0_303] : memref<1x16x16x4xf32, #tpu.memory_space<vmem>>, vector<1x1x16x4xf32>
    %334 = vector.shape_cast %333 : vector<1x1x16x4xf32> to vector<16x4xf32>
    %335 = vector.shape_cast %332 : vector<16x4xf32> to vector<1x1x16x4xf32>
    tpu.vector_store %arg10[%c0_300, %c4_301, %c0_302, %c0_303], %335 {strides = array<i32>} : memref<1x16x16x4xf32, #tpu.memory_space<vmem>>, vector<1x1x16x4xf32>,
    %336 = vector.extract_strided_slice %315 {offsets = [120, 0], sizes = [16, 4], strides = [1, 1]} : vector<384x4xf32> to vector<16x4xf32>
    %c0_304 = arith.constant 0 : index
    %c5_305 = arith.constant 5 : index
    %c0_306 = arith.constant 0 : index
    %c0_307 = arith.constant 0 : index
    %337 = vector.load %arg10[%c0_304, %c5_305, %c0_306, %c0_307] : memref<1x16x16x4xf32, #tpu.memory_space<vmem>>, vector<1x1x16x4xf32>
    %338 = vector.shape_cast %337 : vector<1x1x16x4xf32> to vector<16x4xf32>
    %339 = vector.shape_cast %336 : vector<16x4xf32> to vector<1x1x16x4xf32>
    tpu.vector_store %arg10[%c0_304, %c5_305, %c0_306, %c0_307], %339 {strides = array<i32>} : memref<1x16x16x4xf32, #tpu.memory_space<vmem>>, vector<1x1x16x4xf32>,
    %340 = vector.extract_strided_slice %315 {offsets = [144, 0], sizes = [16, 4], strides = [1, 1]} : vector<384x4xf32> to vector<16x4xf32>
    %c0_308 = arith.constant 0 : index
    %c6_309 = arith.constant 6 : index
    %c0_310 = arith.constant 0 : index
    %c0_311 = arith.constant 0 : index
    %341 = vector.load %arg10[%c0_308, %c6_309, %c0_310, %c0_311] : memref<1x16x16x4xf32, #tpu.memory_space<vmem>>, vector<1x1x16x4xf32>
    %342 = vector.shape_cast %341 : vector<1x1x16x4xf32> to vector<16x4xf32>
    %343 = vector.shape_cast %340 : vector<16x4xf32> to vector<1x1x16x4xf32>
    tpu.vector_store %arg10[%c0_308, %c6_309, %c0_310, %c0_311], %343 {strides = array<i32>} : memref<1x16x16x4xf32, #tpu.memory_space<vmem>>, vector<1x1x16x4xf32>,
    %344 = vector.extract_strided_slice %315 {offsets = [168, 0], sizes = [16, 4], strides = [1, 1]} : vector<384x4xf32> to vector<16x4xf32>
    %c0_312 = arith.constant 0 : index
    %c7_313 = arith.constant 7 : index
    %c0_314 = arith.constant 0 : index
    %c0_315 = arith.constant 0 : index
    %345 = vector.load %arg10[%c0_312, %c7_313, %c0_314, %c0_315] : memref<1x16x16x4xf32, #tpu.memory_space<vmem>>, vector<1x1x16x4xf32>
    %346 = vector.shape_cast %345 : vector<1x1x16x4xf32> to vector<16x4xf32>
    %347 = vector.shape_cast %344 : vector<16x4xf32> to vector<1x1x16x4xf32>
    tpu.vector_store %arg10[%c0_312, %c7_313, %c0_314, %c0_315], %347 {strides = array<i32>} : memref<1x16x16x4xf32, #tpu.memory_space<vmem>>, vector<1x1x16x4xf32>,
    %348 = vector.extract_strided_slice %315 {offsets = [192, 0], sizes = [16, 4], strides = [1, 1]} : vector<384x4xf32> to vector<16x4xf32>
    %c0_316 = arith.constant 0 : index
    %c8_317 = arith.constant 8 : index
    %c0_318 = arith.constant 0 : index
    %c0_319 = arith.constant 0 : index
    %349 = vector.load %arg10[%c0_316, %c8_317, %c0_318, %c0_319] : memref<1x16x16x4xf32, #tpu.memory_space<vmem>>, vector<1x1x16x4xf32>
    %350 = vector.shape_cast %349 : vector<1x1x16x4xf32> to vector<16x4xf32>
    %351 = vector.shape_cast %348 : vector<16x4xf32> to vector<1x1x16x4xf32>
    tpu.vector_store %arg10[%c0_316, %c8_317, %c0_318, %c0_319], %351 {strides = array<i32>} : memref<1x16x16x4xf32, #tpu.memory_space<vmem>>, vector<1x1x16x4xf32>,
    %352 = vector.extract_strided_slice %315 {offsets = [216, 0], sizes = [16, 4], strides = [1, 1]} : vector<384x4xf32> to vector<16x4xf32>
    %c0_320 = arith.constant 0 : index
    %c9_321 = arith.constant 9 : index
    %c0_322 = arith.constant 0 : index
    %c0_323 = arith.constant 0 : index
    %353 = vector.load %arg10[%c0_320, %c9_321, %c0_322, %c0_323] : memref<1x16x16x4xf32, #tpu.memory_space<vmem>>, vector<1x1x16x4xf32>
    %354 = vector.shape_cast %353 : vector<1x1x16x4xf32> to vector<16x4xf32>
    %355 = vector.shape_cast %352 : vector<16x4xf32> to vector<1x1x16x4xf32>
    tpu.vector_store %arg10[%c0_320, %c9_321, %c0_322, %c0_323], %355 {strides = array<i32>} : memref<1x16x16x4xf32, #tpu.memory_space<vmem>>, vector<1x1x16x4xf32>,
    %356 = vector.extract_strided_slice %315 {offsets = [240, 0], sizes = [16, 4], strides = [1, 1]} : vector<384x4xf32> to vector<16x4xf32>
    %c0_324 = arith.constant 0 : index
    %c10_325 = arith.constant 10 : index
    %c0_326 = arith.constant 0 : index
    %c0_327 = arith.constant 0 : index
    %357 = vector.load %arg10[%c0_324, %c10_325, %c0_326, %c0_327] : memref<1x16x16x4xf32, #tpu.memory_space<vmem>>, vector<1x1x16x4xf32>
    %358 = vector.shape_cast %357 : vector<1x1x16x4xf32> to vector<16x4xf32>
    %359 = vector.shape_cast %356 : vector<16x4xf32> to vector<1x1x16x4xf32>
    tpu.vector_store %arg10[%c0_324, %c10_325, %c0_326, %c0_327], %359 {strides = array<i32>} : memref<1x16x16x4xf32, #tpu.memory_space<vmem>>, vector<1x1x16x4xf32>,
    %360 = vector.extract_strided_slice %315 {offsets = [264, 0], sizes = [16, 4], strides = [1, 1]} : vector<384x4xf32> to vector<16x4xf32>
    %c0_328 = arith.constant 0 : index
    %c11_329 = arith.constant 11 : index
    %c0_330 = arith.constant 0 : index
    %c0_331 = arith.constant 0 : index
    %361 = vector.load %arg10[%c0_328, %c11_329, %c0_330, %c0_331] : memref<1x16x16x4xf32, #tpu.memory_space<vmem>>, vector<1x1x16x4xf32>
    %362 = vector.shape_cast %361 : vector<1x1x16x4xf32> to vector<16x4xf32>
    %363 = vector.shape_cast %360 : vector<16x4xf32> to vector<1x1x16x4xf32>
    tpu.vector_store %arg10[%c0_328, %c11_329, %c0_330, %c0_331], %363 {strides = array<i32>} : memref<1x16x16x4xf32, #tpu.memory_space<vmem>>, vector<1x1x16x4xf32>,
    %364 = vector.extract_strided_slice %315 {offsets = [288, 0], sizes = [16, 4], strides = [1, 1]} : vector<384x4xf32> to vector<16x4xf32>
    %c0_332 = arith.constant 0 : index
    %c12_333 = arith.constant 12 : index
    %c0_334 = arith.constant 0 : index
    %c0_335 = arith.constant 0 : index
    %365 = vector.load %arg10[%c0_332, %c12_333, %c0_334, %c0_335] : memref<1x16x16x4xf32, #tpu.memory_space<vmem>>, vector<1x1x16x4xf32>
    %366 = vector.shape_cast %365 : vector<1x1x16x4xf32> to vector<16x4xf32>
    %367 = vector.shape_cast %364 : vector<16x4xf32> to vector<1x1x16x4xf32>
    tpu.vector_store %arg10[%c0_332, %c12_333, %c0_334, %c0_335], %367 {strides = array<i32>} : memref<1x16x16x4xf32, #tpu.memory_space<vmem>>, vector<1x1x16x4xf32>,
    %368 = vector.extract_strided_slice %315 {offsets = [312, 0], sizes = [16, 4], strides = [1, 1]} : vector<384x4xf32> to vector<16x4xf32>
    %c0_336 = arith.constant 0 : index
    %c13_337 = arith.constant 13 : index
    %c0_338 = arith.constant 0 : index
    %c0_339 = arith.constant 0 : index
    %369 = vector.load %arg10[%c0_336, %c13_337, %c0_338, %c0_339] : memref<1x16x16x4xf32, #tpu.memory_space<vmem>>, vector<1x1x16x4xf32>
    %370 = vector.shape_cast %369 : vector<1x1x16x4xf32> to vector<16x4xf32>
    %371 = vector.shape_cast %368 : vector<16x4xf32> to vector<1x1x16x4xf32>
    tpu.vector_store %arg10[%c0_336, %c13_337, %c0_338, %c0_339], %371 {strides = array<i32>} : memref<1x16x16x4xf32, #tpu.memory_space<vmem>>, vector<1x1x16x4xf32>,
    %372 = vector.extract_strided_slice %315 {offsets = [336, 0], sizes = [16, 4], strides = [1, 1]} : vector<384x4xf32> to vector<16x4xf32>
    %c0_340 = arith.constant 0 : index
    %c14_341 = arith.constant 14 : index
    %c0_342 = arith.constant 0 : index
    %c0_343 = arith.constant 0 : index
    %373 = vector.load %arg10[%c0_340, %c14_341, %c0_342, %c0_343] : memref<1x16x16x4xf32, #tpu.memory_space<vmem>>, vector<1x1x16x4xf32>
    %374 = vector.shape_cast %373 : vector<1x1x16x4xf32> to vector<16x4xf32>
    %375 = vector.shape_cast %372 : vector<16x4xf32> to vector<1x1x16x4xf32>
    tpu.vector_store %arg10[%c0_340, %c14_341, %c0_342, %c0_343], %375 {strides = array<i32>} : memref<1x16x16x4xf32, #tpu.memory_space<vmem>>, vector<1x1x16x4xf32>,
    %376 = vector.extract_strided_slice %315 {offsets = [360, 0], sizes = [16, 4], strides = [1, 1]} : vector<384x4xf32> to vector<16x4xf32>
    %c0_344 = arith.constant 0 : index
    %c15_345 = arith.constant 15 : index
    %c0_346 = arith.constant 0 : index
    %c0_347 = arith.constant 0 : index
    %377 = vector.load %arg10[%c0_344, %c15_345, %c0_346, %c0_347] : memref<1x16x16x4xf32, #tpu.memory_space<vmem>>, vector<1x1x16x4xf32>
    %378 = vector.shape_cast %377 : vector<1x1x16x4xf32> to vector<16x4xf32>
    %379 = vector.shape_cast %376 : vector<16x4xf32> to vector<1x1x16x4xf32>
    tpu.vector_store %arg10[%c0_344, %c15_345, %c0_346, %c0_347], %379 {strides = array<i32>} : memref<1x16x16x4xf32, #tpu.memory_space<vmem>>, vector<1x1x16x4xf32>,
    return
  }
  func.func @transform_0(%arg0: i32) -> (i32, i32, i32) {
    %c0_i32 = arith.constant 0 : i32
    %c0_i32_0 = arith.constant 0 : i32
    %c0_i32_1 = arith.constant 0 : i32
    return %arg0, %c0_i32, %c0_i32_0 : i32, i32, i32
  }
  func.func @transform_1(%arg0: i32) -> (i32, i32, i32, i32) {
    %c0_i32 = arith.constant 0 : i32
    %c0_i32_0 = arith.constant 0 : i32
    %c0_i32_1 = arith.constant 0 : i32
    %c0_i32_2 = arith.constant 0 : i32
    return %arg0, %c0_i32, %c0_i32_0, %c0_i32_1 : i32, i32, i32, i32
  }
  func.func @transform_2(%arg0: i32) -> (i32, i32) {
    %c0_i32 = arith.constant 0 : i32
    %c0_i32_0 = arith.constant 0 : i32
    %c0_i32_1 = arith.constant 0 : i32
    return %c0_i32, %c0_i32_0 : i32, i32
  }
  func.func @transform_3(%arg0: i32) -> (i32, i32, i32) {
    %c0_i32 = arith.constant 0 : i32
    %c0_i32_0 = arith.constant 0 : i32
    %c0_i32_1 = arith.constant 0 : i32
    %c0_i32_2 = arith.constant 0 : i32
    return %c0_i32, %c0_i32_0, %c0_i32_1 : i32, i32, i32
  }
  func.func @transform_4(%arg0: i32) -> (i32, i32, i32) {
    %c0_i32 = arith.constant 0 : i32
    %c0_i32_0 = arith.constant 0 : i32
    %c0_i32_1 = arith.constant 0 : i32
    %c0_i32_2 = arith.constant 0 : i32
    return %c0_i32, %c0_i32_0, %c0_i32_1 : i32, i32, i32
  }
  func.func @transform_5(%arg0: i32) -> (i32, i32) {
    %c0_i32 = arith.constant 0 : i32
    %c0_i32_0 = arith.constant 0 : i32
    %c0_i32_1 = arith.constant 0 : i32
    return %c0_i32, %c0_i32_0 : i32, i32
  }
  func.func @transform_6(%arg0: i32) -> (i32, i32) {
    %c0_i32 = arith.constant 0 : i32
    %c0_i32_0 = arith.constant 0 : i32
    %c0_i32_1 = arith.constant 0 : i32
    return %c0_i32, %c0_i32_0 : i32, i32
  }
  func.func @transform_7(%arg0: i32) -> (i32, i32) {
    %c0_i32 = arith.constant 0 : i32
    %c0_i32_0 = arith.constant 0 : i32
    %c0_i32_1 = arith.constant 0 : i32
    return %c0_i32, %c0_i32_0 : i32, i32
  }
  func.func @transform_8(%arg0: i32) -> (i32, i32) {
    %c0_i32 = arith.constant 0 : i32
    %c0_i32_0 = arith.constant 0 : i32
    %c0_i32_1 = arith.constant 0 : i32
    return %c0_i32, %c0_i32_0 : i32, i32
  }
  func.func @transform_9(%arg0: i32) -> (i32, i32, i32, i32) {
    %c0_i32 = arith.constant 0 : i32
    %c0_i32_0 = arith.constant 0 : i32
    %c0_i32_1 = arith.constant 0 : i32
    %c0_i32_2 = arith.constant 0 : i32
    return %arg0, %c0_i32, %c0_i32_0, %c0_i32_1 : i32, i32, i32, i32
  }
}

</mosaic_0001>

<bundles_post_ra>
// kernel: tpu_custom_call.1
= control target key start
LH: loop header
LB: loop body
LE: loop exit
PB: predicated region body
PF: predicated region fallthrough
CT: control target
= control target key end

     0   :  { %s14463_s30 = smov 0   ;;  %s17506_s0 = inlined_call_operand.vmem [shape: f32[2,8,32], index: 0, kind: input, shape index: {}]   ;;  %s17507_s1 = inlined_call_operand.vmem [shape: f32[2,16,16,4], index: 1, kind: input, shape index: {}]   ;;  %s17508_s2 = inlined_call_operand.vmem [shape: f32[16,8], index: 2, kind: input, shape index: {}]   ;;  %s17509_s3 = inlined_call_operand.vmem [shape: f32[9,8,4], index: 3, kind: input, shape index: {}]   ;;  %s17510_s4 = inlined_call_operand.vmem [shape: f32[9,4,4], index: 4, kind: input, shape index: {}]   ;;  %s17511_s5 = inlined_call_operand.vmem [shape: f32[1,4], index: 5, kind: input, shape index: {}]   ;;  %s17512_s6 = inlined_call_operand.vmem [shape: f32[1,4], index: 6, kind: input, shape index: {}]   ;;  %s17513_s7 = inlined_call_operand.vmem [shape: f32[1,4], index: 7, kind: input, shape index: {}]   ;;  %s17514_s8 = inlined_call_operand.vmem [shape: f32[1,4], index: 8, kind: input, shape index: {}]   ;;  %s17515_s9 = inlined_call_operand.vmem [shape: f32[2,16,16,4], index: 9, kind: output, shape index: {}]  }
   0x1 LB: > { %s10422_s10 = sadd.s32 4294967295, %s14404_s30   ;;  %p10426_p0 = scmp.ge.s32.totalorder %s14404_s30, 1  ;;  %s14404_s30 = sphi %s14463_s30, %s19_s30  }
   0x2   : > { %p296_p1 = scmp.lt.s32.totalorder %s14404_s30, 3 }
   0x4   : > { %p297_p2 = pnand %p10426_p0, %p296_p1 }
   0x6   : > { %300 = sbr.rel (%p297_p2) target bundleno = 2611 (0xa33), region = 56 }
   0xd   : > { %p336_p3 = scmp.lt.s32.totalorder %s10422_s10, 1  ;;  %vm350_vm0 = vcmask 64512   ;;  %v466_v0 = vld [vmem:[%s17508_s2] sm:$0xff]  ;;  %v467_v2 = vld [vmem:[%s17508_s2 + $0x8] sm:$0xff]  ;;  %s14406_s19 = smov 124   ;;  %vm408_vm1 = vcmask 31744  }
   0xe   : > { %12278 = vmatprep.mubr.msk.f32.mxu0 %vm350_vm0, %v466_v0  ;;  %v14407_v11 = vmov 0.0   ;;  %s14408_s20 = smov 4   ;;  %vm558_vm2 = vcmask 64544   ;;  %s14409_s25 = smov 120   ;;  %vm5925_vm3 = vcmask 1043456  }
   0xf   : > { %s17943_s10 = smov (!%p336_p3, %s10422_s10), 1  ;;  %354 = vst.msk [vmem:[#allocation2 + $0x18] sm:$0xff] %vm350_vm0, %v14407_v11  ;;  %355 = vst.msk [vmem:[#allocation2 + $0x20] sm:$0xff] %vm350_vm0, %v14407_v11  ;;  %s14410_s26 = smov 116  }
  0x10   : > { %s10427_s13 = sshll.u32 %s17943_s10, 3  ;;  %351 = vst.msk [vmem:[#allocation2] sm:$0xff] %vm350_vm0, %v14407_v11  ;;  %352 = vst.msk [vmem:[#allocation2 + $0x8] sm:$0xff] %vm350_vm0, %v14407_v11  ;;  %s11389_s21 = sshll.u32 %s17943_s10, 8 }
  0x11   : > { %s339_s16 = scalar_lea.vmem %s17506_s0, %s10427_s13  ;;  %353 = vst.msk [vmem:[#allocation2 + $0x10] sm:$0xff] %vm350_vm0, %v14407_v11  ;;  %356 = vst.msk [vmem:[#allocation2 + $0x28] sm:$0xff] %vm350_vm0, %v14407_v11  ;;  %s14827_s24 = scalar_lea.vmem %s17507_s1, %s11389_s21 }
  0x12   : > { %v468_v1 = vld [vmem:[%s339_s16] sm:$0xff]  ;;  %357 = vst.msk [vmem:[#allocation2 + $0x30] sm:$0xff] %vm350_vm0, %v14407_v11  ;;  %358 = vst.msk [vmem:[#allocation2 + $0x38] sm:$0xff] %vm350_vm0, %v14407_v11  ;;  %v874_v51 = vld [vmem:[%s14827_s24 + $0x8] sm:$0xff]  ;;  %s14411_s27 = smov 112   ;;  %s14412_s28 = smov 108  }
  0x13   : > { %12276 = vmatprep.subr.mxu0 %v468_v1  ;;  %359 = vst.msk [vmem:[#allocation2 + $0x40] sm:$0xff] %vm350_vm0, %v14407_v11  ;;  %360 = vst.msk [vmem:[#allocation2 + $0x48] sm:$0xff] %vm350_vm0, %v14407_v11  ;;  %v873_v39 = vld [vmem:[%s14827_s24] sm:$0xff] }
  0x14   : > { %12277 = vmatpush3.msra.mxu0 %v468_v1  ;;  %361 = vst.msk [vmem:[#allocation2 + $0x50] sm:$0xff] %vm350_vm0, %v14407_v11  ;;  %362 = vst.msk [vmem:[#allocation2 + $0x58] sm:$0xff] %vm350_vm0, %v14407_v11 }
  0x15   : > { %12279 = vmatmul.mubr.msk.f32.vlgmr.msra.gmra.mrb[0].mxu0 %vm350_vm0, %v467_v2  ;;  %363 = vst.msk [vmem:[#allocation2 + $0x60] sm:$0xff] %vm350_vm0, %v14407_v11  ;;  %364 = vst.msk [vmem:[#allocation2 + $0x68] sm:$0xff] %vm350_vm0, %v14407_v11 }
  0x16   : > { %365 = vst.msk [vmem:[#allocation2 + $0x70] sm:$0xff] %vm350_vm0, %v14407_v11  ;;  %366 = vst.msk [vmem:[#allocation2 + $0x78] sm:$0xff] %vm350_vm0, %v14407_v11 }
  0x17   : > { %367 = vst.msk [vmem:[#allocation2 + $0x80] sm:$0xff] %vm350_vm0, %v14407_v11  ;;  %368 = vst.msk [vmem:[#allocation2 + $0x88] sm:$0xff] %vm350_vm0, %v14407_v11 }
  0x18   : > { %369 = vst.msk [vmem:[#allocation2 + $0x90] sm:$0xff] %vm350_vm0, %v14407_v11  ;;  %370 = vst.msk [vmem:[#allocation2 + $0x98] sm:$0xff] %vm350_vm0, %v14407_v11 }
  0x19   : > { %371 = vst.msk [vmem:[#allocation2 + $0xa0] sm:$0xff] %vm350_vm0, %v14407_v11  ;;  %372 = vst.msk [vmem:[#allocation2 + $0xa8] sm:$0xff] %vm350_vm0, %v14407_v11 }
  0x1a   : > { %373 = vst.msk [vmem:[#allocation2 + $0xb0] sm:$0xff] %vm350_vm0, %v14407_v11  ;;  %374 = vst.msk [vmem:[#allocation2 + $0xb8] sm:$0xff] %vm350_vm0, %v14407_v11 }
  0x1b   : > { %375 = vst.msk [vmem:[#allocation2 + $0xc0] sm:$0xff] %vm350_vm0, %v14407_v11  ;;  %376 = vst.msk [vmem:[#allocation2 + $0xc8] sm:$0xff] %vm350_vm0, %v14407_v11 }
  0x1c   : > { %377 = vst.msk [vmem:[#allocation2 + $0xd0] sm:$0xff] %vm350_vm0, %v14407_v11  ;;  %378 = vst.msk [vmem:[#allocation2 + $0xd8] sm:$0xff] %vm350_vm0, %v14407_v11 }
  0x1d   : > { %379 = vst.msk [vmem:[#allocation2 + $0xe0] sm:$0xff] %vm350_vm0, %v14407_v11  ;;  %380 = vst.msk [vmem:[#allocation2 + $0xe8] sm:$0xff] %vm350_vm0, %v14407_v11 }
  0x1e   : > { %381 = vst.msk [vmem:[#allocation2 + $0xf0] sm:$0xff] %vm350_vm0, %v14407_v11  ;;  %382 = vst.msk [vmem:[#allocation2 + $0xf8] sm:$0xff] %vm350_vm0, %v14407_v11 }
  0x1f   : > { %383 = vst.msk [vmem:[#allocation2 + $0x100] sm:$0xff] %vm350_vm0, %v14407_v11  ;;  %384 = vst.msk [vmem:[#allocation2 + $0x108] sm:$0xff] %vm350_vm0, %v14407_v11 }
  0x20   : > { %385 = vst.msk [vmem:[#allocation2 + $0x110] sm:$0xff] %vm350_vm0, %v14407_v11  ;;  %386 = vst.msk [vmem:[#allocation2 + $0x118] sm:$0xff] %vm350_vm0, %v14407_v11 }
  0x21   : > { %387 = vst.msk [vmem:[#allocation2 + $0x120] sm:$0xff] %vm350_vm0, %v14407_v11  ;;  %388 = vst.msk [vmem:[#allocation2 + $0x128] sm:$0xff] %vm350_vm0, %v14407_v11 }
  0x22   : > { %389 = vst.msk [vmem:[#allocation2 + $0x130] sm:$0xff] %vm350_vm0, %v14407_v11  ;;  %390 = vst.msk [vmem:[#allocation2 + $0x138] sm:$0xff] %vm350_vm0, %v14407_v11 }
  0x23   : > { %391 = vst.msk [vmem:[#allocation2 + $0x140] sm:$0xff] %vm350_vm0, %v14407_v11  ;;  %392 = vst.msk [vmem:[#allocation2 + $0x148] sm:$0xff] %vm350_vm0, %v14407_v11 }
  0x24   : > { %393 = vst.msk [vmem:[#allocation2 + $0x150] sm:$0xff] %vm350_vm0, %v14407_v11  ;;  %394 = vst.msk [vmem:[#allocation2 + $0x158] sm:$0xff] %vm350_vm0, %v14407_v11 }
  0x25   : > { %395 = vst.msk [vmem:[#allocation2 + $0x160] sm:$0xff] %vm350_vm0, %v14407_v11  ;;  %396 = vst.msk [vmem:[#allocation2 + $0x168] sm:$0xff] %vm350_vm0, %v14407_v11 }
  0x26   : > { %397 = vst.msk [vmem:[#allocation2 + $0x170] sm:$0xff] %vm350_vm0, %v14407_v11  ;;  %398 = vst.msk [vmem:[#allocation2 + $0x178] sm:$0xff] %vm350_vm0, %v14407_v11 }
  0x27   : > { %399 = vst.msk [vmem:[#allocation2 + $0x180] sm:$0xff] %vm350_vm0, %v14407_v11  ;;  %400 = vst.msk [vmem:[#allocation2 + $0x188] sm:$0xff] %vm350_vm0, %v14407_v11 }
  0x28   : > { %401 = vst.msk [vmem:[#allocation2 + $0x190] sm:$0xff] %vm350_vm0, %v14407_v11  ;;  %402 = vst.msk [vmem:[#allocation2 + $0x198] sm:$0xff] %vm350_vm0, %v14407_v11 }
  0x29   : > { %403 = vst.msk [vmem:[#allocation2 + $0x1a0] sm:$0xff] %vm350_vm0, %v14407_v11  ;;  %404 = vst.msk [vmem:[#allocation2 + $0x1a8] sm:$0xff] %vm350_vm0, %v14407_v11 }
  0x2a   : > { %405 = vst.msk [vmem:[#allocation2 + $0x1b0] sm:$0xff] %vm350_vm0, %v14407_v11 }
  0x2b   : > { %409 = vst.msk [vmem:[#allocation3] sm:$0xff] %vm408_vm1, %v14407_v11  ;;  %410 = vst.msk [vmem:[#allocation3 + $0x8] sm:$0xff] %vm408_vm1, %v14407_v11 }
  0x2c   : > { %411 = vst.msk [vmem:[#allocation3 + $0x10] sm:$0xff] %vm408_vm1, %v14407_v11  ;;  %412 = vst.msk [vmem:[#allocation3 + $0x18] sm:$0xff] %vm408_vm1, %v14407_v11 }
  0x2d   : > { %413 = vst.msk [vmem:[#allocation3 + $0x20] sm:$0xff] %vm408_vm1, %v14407_v11  ;;  %414 = vst.msk [vmem:[#allocation3 + $0x28] sm:$0xff] %vm408_vm1, %v14407_v11 }
  0x2e   : > { %415 = vst.msk [vmem:[#allocation3 + $0x30] sm:$0xff] %vm408_vm1, %v14407_v11  ;;  %416 = vst.msk [vmem:[#allocation3 + $0x38] sm:$0xff] %vm408_vm1, %v14407_v11 }
  0x2f   : > { %417 = vst.msk [vmem:[#allocation3 + $0x40] sm:$0xff] %vm408_vm1, %v14407_v11  ;;  %418 = vst.msk [vmem:[#allocation3 + $0x48] sm:$0xff] %vm408_vm1, %v14407_v11 }
  0x30   : > { %419 = vst.msk [vmem:[#allocation3 + $0x50] sm:$0xff] %vm408_vm1, %v14407_v11  ;;  %420 = vst.msk [vmem:[#allocation3 + $0x58] sm:$0xff] %vm408_vm1, %v14407_v11 }
  0x31   : > { %421 = vst.msk [vmem:[#allocation3 + $0x60] sm:$0xff] %vm408_vm1, %v14407_v11  ;;  %422 = vst.msk [vmem:[#allocation3 + $0x68] sm:$0xff] %vm408_vm1, %v14407_v11 }
  0x32   : > { %423 = vst.msk [vmem:[#allocation3 + $0x70] sm:$0xff] %vm408_vm1, %v14407_v11  ;;  %424 = vst.msk [vmem:[#allocation3 + $0x78] sm:$0xff] %vm408_vm1, %v14407_v11 }
  0x33   : > { %425 = vst.msk [vmem:[#allocation3 + $0x80] sm:$0xff] %vm408_vm1, %v14407_v11  ;;  %426 = vst.msk [vmem:[#allocation3 + $0x88] sm:$0xff] %vm408_vm1, %v14407_v11 }
  0x34   : > { %427 = vst.msk [vmem:[#allocation3 + $0x90] sm:$0xff] %vm408_vm1, %v14407_v11  ;;  %428 = vst.msk [vmem:[#allocation3 + $0x98] sm:$0xff] %vm408_vm1, %v14407_v11 }
  0x35   : > { %429 = vst.msk [vmem:[#allocation3 + $0xa0] sm:$0xff] %vm408_vm1, %v14407_v11  ;;  %430 = vst.msk [vmem:[#allocation3 + $0xa8] sm:$0xff] %vm408_vm1, %v14407_v11 }
  0x36   : > { %431 = vst.msk [vmem:[#allocation3 + $0xb0] sm:$0xff] %vm408_vm1, %v14407_v11  ;;  %432 = vst.msk [vmem:[#allocation3 + $0xb8] sm:$0xff] %vm408_vm1, %v14407_v11 }
  0x37   : > { %433 = vst.msk [vmem:[#allocation3 + $0xc0] sm:$0xff] %vm408_vm1, %v14407_v11  ;;  %434 = vst.msk [vmem:[#allocation3 + $0xc8] sm:$0xff] %vm408_vm1, %v14407_v11 }
  0x38   : > { %435 = vst.msk [vmem:[#allocation3 + $0xd0] sm:$0xff] %vm408_vm1, %v14407_v11  ;;  %436 = vst.msk [vmem:[#allocation3 + $0xd8] sm:$0xff] %vm408_vm1, %v14407_v11 }
  0x39   : > { %437 = vst.msk [vmem:[#allocation3 + $0xe0] sm:$0xff] %vm408_vm1, %v14407_v11  ;;  %438 = vst.msk [vmem:[#allocation3 + $0xe8] sm:$0xff] %vm408_vm1, %v14407_v11 }
  0x3a   : > { %439 = vst.msk [vmem:[#allocation3 + $0xf0] sm:$0xff] %vm408_vm1, %v14407_v11  ;;  %440 = vst.msk [vmem:[#allocation3 + $0xf8] sm:$0xff] %vm408_vm1, %v14407_v11 }
  0x3b   : > { %441 = vst.msk [vmem:[#allocation3 + $0x100] sm:$0xff] %vm408_vm1, %v14407_v11  ;;  %442 = vst.msk [vmem:[#allocation3 + $0x108] sm:$0xff] %vm408_vm1, %v14407_v11 }
  0x3c   : > { %443 = vst.msk [vmem:[#allocation3 + $0x110] sm:$0xff] %vm408_vm1, %v14407_v11  ;;  %444 = vst.msk [vmem:[#allocation3 + $0x118] sm:$0xff] %vm408_vm1, %v14407_v11 }
  0x3d   : > { %445 = vst.msk [vmem:[#allocation3 + $0x120] sm:$0xff] %vm408_vm1, %v14407_v11  ;;  %446 = vst.msk [vmem:[#allocation3 + $0x128] sm:$0xff] %vm408_vm1, %v14407_v11 }
  0x3e   : > { %447 = vst.msk [vmem:[#allocation3 + $0x130] sm:$0xff] %vm408_vm1, %v14407_v11  ;;  %448 = vst.msk [vmem:[#allocation3 + $0x138] sm:$0xff] %vm408_vm1, %v14407_v11 }
  0x3f   : > { %449 = vst.msk [vmem:[#allocation3 + $0x140] sm:$0xff] %vm408_vm1, %v14407_v11  ;;  %450 = vst.msk [vmem:[#allocation3 + $0x148] sm:$0xff] %vm408_vm1, %v14407_v11 }
  0x40   : > { %451 = vst.msk [vmem:[#allocation3 + $0x150] sm:$0xff] %vm408_vm1, %v14407_v11  ;;  %452 = vst.msk [vmem:[#allocation3 + $0x158] sm:$0xff] %vm408_vm1, %v14407_v11 }
  0x41   : > { %453 = vst.msk [vmem:[#allocation3 + $0x160] sm:$0xff] %vm408_vm1, %v14407_v11  ;;  %454 = vst.msk [vmem:[#allocation3 + $0x168] sm:$0xff] %vm408_vm1, %v14407_v11 }
  0x42   : > { %455 = vst.msk [vmem:[#allocation3 + $0x170] sm:$0xff] %vm408_vm1, %v14407_v11  ;;  %456 = vst.msk [vmem:[#allocation3 + $0x178] sm:$0xff] %vm408_vm1, %v14407_v11 }
  0x43   : > { %457 = vst.msk [vmem:[#allocation3 + $0x180] sm:$0xff] %vm408_vm1, %v14407_v11  ;;  %458 = vst.msk [vmem:[#allocation3 + $0x188] sm:$0xff] %vm408_vm1, %v14407_v11 }
  0x44   : > { %459 = vst.msk [vmem:[#allocation3 + $0x190] sm:$0xff] %vm408_vm1, %v14407_v11  ;;  %460 = vst.msk [vmem:[#allocation3 + $0x198] sm:$0xff] %vm408_vm1, %v14407_v11 }
  0x45   : > { %461 = vst.msk [vmem:[#allocation3 + $0x1a0] sm:$0xff] %vm408_vm1, %v14407_v11  ;;  %462 = vst.msk [vmem:[#allocation3 + $0x1a8] sm:$0xff] %vm408_vm1, %v14407_v11 }
  0x46   : > { %463 = vst.msk [vmem:[#allocation3 + $0x1b0] sm:$0xff] %vm408_vm1, %v14407_v11 }
  0xe8   : > { %v14485_v3 = vpop.f32.mrb[0].mxu0 }
  0xe9   : > { %v14487_v4 = vpop.f32.mrb[1].mxu0  ;;  %v14500_v7 = vmul.f32 0.93333334, %v14485_v3  ;;  %v14503_v8 = vmul.f32 0.46666667, %v14485_v3 }
  0xea   : > { %v14490_v5 = vmul.f32 0.93333334, %v14487_v4  ;;  %v14493_v6 = vmul.f32 0.46666667, %v14487_v4  ;;  %v14510_v9 = vmul.f32 0.33333334, %v14485_v3 }
  0xeb   : > { %v14513_v10 = vmul.f32 0.33333334, %v14487_v4  ;;  %v14740_v12 = vmul.f32 0.8, %v14485_v3  ;;  %v14747_v13 = vmul.f32 0.26666668, %v14485_v3 }
  0xec   : > { %591 = vrot.lane.b32.xlu1 %v14490_v5, %s14406_s19  ;;  %567 = vrot.lane.b32.xlu0 %v14493_v6, %s14406_s19  ;;  %v14750_v14 = vmul.f32 0.8, %v14487_v4  ;;  %v14757_v15 = vmul.f32 0.73333335, %v14485_v3  ;;  %v14760_v16 = vmul.f32 0.26666668, %v14487_v4 }
  0xed   : > { %v14767_v17 = vmul.f32 0.2, %v14485_v3  ;;  %v14774_v18 = vmul.f32 0.6666667, %v14485_v3  ;;  %v689_v19 = vmul.f32 0.73333335, %v14487_v4 }
  0xee   : > { %v14781_v20 = vmul.f32 0.13333334, %v14485_v3  ;;  %v665_v21 = vmul.f32 0.2, %v14487_v4  ;;  %v14788_v22 = vmul.f32 0.6666667, %v14487_v4 }
  0xef   : > { %v14793_v23 = vmul.f32 0.6, %v14485_v3  ;;  %v14798_v24 = vmul.f32 0.13333334, %v14487_v4  ;;  %v14803_v25 = vmul.f32 0.6, %v14487_v4 }
  0xf0   : > { %593 = vrot.lane.b32.xlu1 %v14500_v7, %s14406_s19  ;;  %569 = vrot.lane.b32.xlu0 %v14503_v8, %s14406_s19  ;;  %v585_v26 = vmul.f32 0.06666667, %v14487_v4  ;;  %v586_v27 = vmul.f32 0.06666667, %v14485_v3  ;;  %v14812_v28 = vmul.f32 0.8666667, %v14485_v3 }
  0xf1   : > { %v562_v29 = vmul.f32 0.53333336, %v14485_v3  ;;  %v561_v38 = vmul.f32 0.53333336, %v14487_v4  ;;  %v611_v46 = vmul.f32 0.4, %v14487_v4 }
  0xf2   : > { %v14843_v54 = vmul.f32 0.4, %v14485_v3  ;;  %v627_v58 = vmul.f32 0.8666667, %v14487_v4 }
  0xf4   : > { %649 = vrot.lane.b32.xlu1 %v14510_v9, %s14406_s19  ;;  %647 = vrot.lane.b32.xlu0 %v14513_v10, %s14406_s19 }
  0xf8   : > { %673 = vrot.lane.b32.xlu1 %v14740_v12, %s14406_s19  ;;  %552 = vrot.lane.b32.xlu0 %v14487_v4, %s14408_s20 }
  0xfc   : > { %697 = vrot.lane.b32.xlu1 %v14747_v13, %s14406_s19  ;;  %671 = vrot.lane.b32.xlu0 %v14750_v14, %s14406_s19 }
 0x100   : > { %717 = vrot.lane.b32.xlu1 %v14757_v15, %s14406_s19  ;;  %695 = vrot.lane.b32.xlu0 %v14760_v16, %s14406_s19 }
 0x104   : > { %737 = vrot.lane.b32.xlu1 %v14767_v17, %s14406_s19  ;;  %554 = vrot.lane.b32.xlu0 %v14485_v3, %s14408_s20 }
 0x108   : > { %757 = vrot.lane.b32.xlu1 %v14774_v18, %s14406_s19  ;;  %715 = vrot.lane.b32.xlu0 %v689_v19, %s14406_s19 }
 0x10c   : > { %777 = vrot.lane.b32.xlu1 %v14781_v20, %s14406_s19  ;;  %735 = vrot.lane.b32.xlu0 %v665_v21, %s14406_s19 }
 0x110   : > { %755 = vrot.lane.b32.xlu1 %v14788_v22, %s14406_s19 }
 0x114   : > { %797 = vrot.lane.b32.xlu1 %v14793_v23, %s14406_s19 }
 0x118   : > { %775 = vrot.lane.b32.xlu1 %v14798_v24, %s14406_s19 }
 0x11c   : > { %795 = vrot.lane.b32.xlu1 %v14803_v25, %s14406_s19 }
 0x120   : > { %815 = vrot.lane.b32.xlu1 %v585_v26, %s14406_s19 }
 0x124   : > { %817 = vrot.lane.b32.xlu1 %v586_v27, %s14406_s19 }
 0x128   : > { %633 = vrot.lane.b32.xlu1 %v14812_v28, %s14406_s19 }
 0x12c   : > { %837 = vrot.lane.b32.xlu1 %v562_v29, %s14406_s19 }
 0x130   : > { %855 = vrot.lane.b32.xlu1 %v14487_v4, %s14406_s19 }
 0x15e   : > { %v592_v30 = vpop.permute.xlu1 %591  ;;  %v568_v31 = vpop.permute.xlu0 %567 }
 0x15f   : > { %v573_v42 = vadd.f32 %v568_v31, %v561_v38  ;;  %v597_v49 = vadd.f32 %v592_v30, %v585_v26  ;;  %v1052_v30 = vld [vmem:[#allocation2 + $0xa] sm:$0xff] }
 0x162   : > { %v594_v32 = vpop.permute.xlu1 %593  ;;  %v570_v33 = vpop.permute.xlu0 %569 }
 0x163   : > { %v574_v34 = vadd.f32 %v570_v33, %v562_v29  ;;  %v598_v37 = vadd.f32 %v594_v32, %v586_v27  ;;  %v1051_v29 = vld [vmem:[#allocation2 + $0x2] sm:$0xff] }
 0x164   : > { %12283 = vmatprep.mubr.msk.f32.mxu1 %vm350_vm0, %v1051_v29  ;;  %v10441_v32 = vld [vmem:[%s14827_s24 + $0x48] sm:$0xff] }
 0x165   : > { %579 = vrot.lane.b32.xlu0 %v574_v34, %s14408_s20 }
 0x166   : > { %v650_v35 = vpop.permute.xlu1 %649  ;;  %v648_v36 = vpop.permute.xlu0 %647 }
 0x167   : > { %v653_v63 = vadd.f32 %v648_v36, %v14788_v22  ;;  %v654_v2 = vadd.f32 %v650_v35, %v14774_v18 }
 0x169   : > { %603 = vrot.lane.b32.xlu0 %v598_v37, %s14408_s20 }
 0x16a   : > { %v674_v40 = vpop.permute.xlu1 %673  ;;  %v553_v41 = vpop.permute.xlu0 %552 }
 0x16b   : > { %559 = vst.msk [vmem:[#allocation2 + $0x19] sm:$0xff] %vm558_vm2, %v553_v41 }
 0x16c   : > { %875 = vst.msk [vmem:[#allocation2 + $0x19] sm:$0xff] %vm408_vm1, %v873_v39 }
 0x16d   : > { %577 = vrot.lane.b32.xlu0 %v573_v42, %s14408_s20 }
 0x16e   : > { %v698_v43 = vpop.permute.xlu1 %697  ;;  %v672_v44 = vpop.permute.xlu0 %671 }
 0x16f   : > { %v677_v45 = vadd.f32 %v672_v44, %v665_v21 }
 0x171   : > { %681 = vrot.lane.b32.xlu1 %v677_v45, %s14406_s19  ;;  %615 = vrot.lane.b32.xlu0 %v611_v46, %s14406_s19 }
 0x172   : > { %v718_v47 = vpop.permute.xlu1 %717  ;;  %v696_v48 = vpop.permute.xlu0 %695 }
 0x173   : > { %v701_v50 = vadd.f32 %v696_v48, %v689_v19  ;;  %v722_v22 = vadd.f32 %v718_v47, %v14747_v13  ;;  %v1000_v13 = vld [vmem:[%s17509_s3] sm:$0xff]  ;;  %v1053_v33 = vld [vmem:[#allocation2 + $0x12] sm:$0xff] }
 0x174   : > { %v10446_v48 = vld [vmem:[%s14827_s24 + $0x70] sm:$0xff] }
 0x175   : > { %705 = vrot.lane.b32.xlu1 %v701_v50, %s14409_s25  ;;  %601 = vrot.lane.b32.xlu0 %v597_v49, %s14408_s20  ;;  %v10436_v49 = vld [vmem:[%s14827_s24 + $0x20] sm:$0xff]  ;;  %s17376_s20 = scalar_lea.vmem %s17515_s9, %s11389_s21 }
 0x176   : > { %v738_v52 = vpop.permute.xlu1 %737  ;;  %v555_v53 = vpop.permute.xlu0 %554 }
 0x177   : > { %560 = vst.msk [vmem:[#allocation2 + $0x21] sm:$0xff] %vm558_vm2, %v555_v53  ;;  %v742_v27 = vadd.f32 %v738_v52, %v14740_v12 }
 0x178   : > { %876 = vst.msk [vmem:[#allocation2 + $0x21] sm:$0xff] %vm408_vm1, %v874_v51 }
 0x179   : > { %617 = vrot.lane.b32.xlu0 %v14843_v54, %s14406_s19 }
 0x17a   : > { %v758_v55 = vpop.permute.xlu1 %757  ;;  %v716_v56 = vpop.permute.xlu0 %715 }
 0x17b   : > { %v721_v57 = vadd.f32 %v716_v56, %v14760_v16  ;;  %v762_v31 = vadd.f32 %v758_v55, %v14510_v9  ;;  %v10439_v55 = vld [vmem:[%s14827_s24 + $0x38] sm:$0xff] }
 0x17d   : > { %725 = vrot.lane.b32.xlu1 %v721_v57, %s14409_s25  ;;  %631 = vrot.lane.b32.xlu0 %v627_v58, %s14406_s19  ;;  %v10448_v57 = vld [vmem:[%s14827_s24 + $0x80] sm:$0xff] }
 0x17e   : > { %v778_v59 = vpop.permute.xlu1 %777  ;;  %v736_v60 = vpop.permute.xlu0 %735 }
 0x17f   : > { %v741_v61 = vadd.f32 %v736_v60, %v14750_v14  ;;  %v678_v14 = vadd.f32 %v674_v40, %v14767_v17  ;;  %v1054_v34 = vld [vmem:[#allocation2 + $0x1a] sm:$0xff]  ;;  %v782_v9 = vadd.f32 %v778_v59, %v14812_v28  ;;  %v10437_v40 = vld [vmem:[%s14827_s24 + $0x28] sm:$0xff] }
 0x180   : > { %v10440_v59 = vld [vmem:[%s14827_s24 + $0x40] sm:$0xff] }
 0x181   : > { %745 = vrot.lane.b32.xlu1 %v741_v61, %s14410_s26  ;;  %835 = vrot.lane.b32.xlu0 %v561_v38, %s14406_s19  ;;  %v10435_v38 = vld [vmem:[%s14827_s24 + $0x18] sm:$0xff] }
 0x182   : > { %v756_v62 = vpop.permute.xlu1 %755 }
 0x183   : > { %v761_v0 = vadd.f32 %v756_v62, %v14513_v10  ;;  %v702_v10 = vadd.f32 %v698_v43, %v14757_v15  ;;  %v10465_v15 = vld [vmem:[%s17509_s3 + $0x10] sm:$0xff]  ;;  %v10444_v43 = vld [vmem:[%s14827_s24 + $0x60] sm:$0xff] }
 0x184   : > { %12281 = vmatprep.subr.mxu1 %v10465_v15 }
 0x185   : > { %765 = vrot.lane.b32.xlu1 %v761_v0, %s14410_s26  ;;  %657 = vrot.lane.b32.xlu0 %v653_v63, %s14406_s19  ;;  %v10450_v0 = vld [vmem:[%s14827_s24 + $0x90] sm:$0xff] }
 0x186   : > { %v798_v1 = vpop.permute.xlu1 %797  ;;  %12282 = vmatpush3.msra.mxu1 %v10465_v15 }
 0x187   : > { %12355 = vmatprep.subr.mxu1 %v1000_v13  ;;  %12284 = vmatmul.mubr.msk.f32.vlgmr.msra.gmra.mrb[0].mxu1 %vm350_vm0, %v1052_v30  ;;  %v802_v35 = vadd.f32 %v798_v1, %v14843_v54 }
 0x188   : > { %12356 = vmatpush3.msra.mxu1 %v1000_v13  ;;  %12286 = vmatprep.mubr.msk.f32.mxu1 %vm350_vm0, %v1053_v33  ;;  %v10454_v13 = vld [vmem:[%s14827_s24 + $0xb0] sm:$0xff]  ;;  %v10447_v33 = vld [vmem:[%s14827_s24 + $0x78] sm:$0xff] }
 0x189   : > { %659 = vrot.lane.b32.xlu0 %v654_v2, %s14406_s19 }
 0x18a   : > { %v776_v11 = vpop.permute.xlu1 %775 }
 0x18b   : > { %v781_v16 = vadd.f32 %v776_v11, %v627_v58  ;;  %12287 = vmatmul.mubr.msk.f32.gmra.mrb[2].mxu1 %vm350_vm0, %v1054_v34 }
 0x18d   : > { %785 = vrot.lane.b32.xlu1 %v781_v16, %s14411_s27  ;;  %683 = vrot.lane.b32.xlu0 %v678_v14, %s14406_s19  ;;  %v853_v14 = vmul.f32 0.0, %v14487_v4  ;;  %v10452_v16 = vld [vmem:[%s14827_s24 + $0xa0] sm:$0xff]  ;;  %v14983_v4 = vld [vmem:[%s17509_s3 + $0x18] sm:$0xff] }
 0x18e   : > { %v796_v19 = vpop.permute.xlu1 %795  ;;  %12429 = vmatprep.subr.mxu1 %v14983_v4 }
 0x18f   : > { %v801_v21 = vadd.f32 %v796_v19, %v611_v46  ;;  %v10438_v46 = vld [vmem:[%s14827_s24 + $0x30] sm:$0xff] }
 0x190   : > { %v10442_v19 = vld [vmem:[%s14827_s24 + $0x50] sm:$0xff] }
 0x191   : > { %805 = vrot.lane.b32.xlu1 %v801_v21, %s14411_s27  ;;  %707 = vrot.lane.b32.xlu0 %v702_v10, %s14409_s25 }
 0x192   : > { %v816_v18 = vpop.permute.xlu1 %815 }
 0x193   : > { %v821_v17 = vadd.f32 %v816_v18, %v14490_v5 }
 0x195   : > { %825 = vrot.lane.b32.xlu1 %v821_v17, %s14412_s28  ;;  %727 = vrot.lane.b32.xlu0 %v722_v22, %s14409_s25  ;;  %v10443_v17 = vld [vmem:[%s14827_s24 + $0x58] sm:$0xff] }
 0x196   : > { %v818_v26 = vpop.permute.xlu1 %817 }
 0x197   : > { %v822_v36 = vadd.f32 %v818_v26, %v14500_v7 }
 0x199   : > { %747 = vrot.lane.b32.xlu0 %v742_v27, %s14410_s26 }
 0x19a   : > { %v634_v5 = vpop.permute.xlu1 %633 }
 0x19b   : > { %v638_v12 = vadd.f32 %v634_v5, %v14781_v20  ;;  %v1055_v20 = vld [vmem:[#allocation2 + $0x22] sm:$0xff] }
 0x19c   : > { %12289 = vmatprep.mubr.msk.f32.mxu1 %vm350_vm0, %v1055_v20  ;;  %v10445_v5 = vld [vmem:[%s14827_s24 + $0x68] sm:$0xff] }
 0x19d   : > { %640 = vst.msk [vmem:[#allocation2 + $0x81] sm:$0xff] %vm558_vm2, %v638_v12  ;;  %767 = vrot.lane.b32.xlu0 %v762_v31, %s14410_s26  ;;  %v10456_v12 = vld [vmem:[%s14827_s24 + $0xc0] sm:$0xff] }
 0x19e   : > { %896 = vst.msk [vmem:[#allocation2 + $0x81] sm:$0xff] %vm408_vm1, %v10441_v32  ;;  %v838_v37 = vpop.permute.xlu1 %837 }
 0x19f   : > { %v842_v28 = vadd.f32 %v838_v37, %v14503_v8  ;;  %v10434_v8 = vld [vmem:[%s14827_s24 + $0x10] sm:$0xff] }
 0x1a0   : > { %v10458_v37 = vld [vmem:[%s14827_s24 + $0xd0] sm:$0xff] }
 0x1a1   : > { %787 = vrot.lane.b32.xlu0 %v782_v9, %s14411_s27 }
 0x1a2   : > { %v14907_v41 = vpop.permute.xlu1 %855 }
 0x1a3   : > { %v861_v22 = vadd.f32 %v14907_v41, %v853_v14  ;;  %v854_v14 = vmul.f32 0.0, %v14485_v3 }
 0x1a5   : > { %807 = vrot.lane.b32.xlu0 %v802_v35, %s14411_s27  ;;  %v14999_v29 = vld [vmem:[#allocation2 + $0x82] sm:$0xff] }
 0x1a9   : > { %827 = vrot.lane.b32.xlu0 %v822_v36, %s14412_s28 }
 0x1ad   : > { %847 = vrot.lane.b32.xlu0 %v842_v28, %s14412_s28  ;;  %v10449_v28 = vld [vmem:[%s14827_s24 + $0x88] sm:$0xff] }
 0x1b1   : > { %857 = vrot.lane.b32.xlu0 %v14485_v3, %s14406_s19 }
 0x1d7   : > { %v580_v39 = vpop.permute.xlu0 %579 }
 0x1d8   : > { %584 = vst.msk [vmem:[#allocation2 + $0x39] sm:$0xff] %vm558_vm2, %v580_v39 }
 0x1d9   : > { %881 = vst.msk [vmem:[#allocation2 + $0x39] sm:$0xff] %vm408_vm1, %v10435_v38 }
 0x1db   : > { %v604_v7 = vpop.permute.xlu0 %603 }
 0x1dc   : > { %608 = vst.msk [vmem:[#allocation2 + $0x51] sm:$0xff] %vm558_vm2, %v604_v7 }
 0x1dd   : > { %886 = vst.msk [vmem:[#allocation2 + $0x51] sm:$0xff] %vm408_vm1, %v10437_v40 }
 0x1df   : > { %v578_v42 = vpop.permute.xlu0 %577 }
 0x1e0   : > { %583 = vst.msk [vmem:[#allocation2 + $0x31] sm:$0xff] %vm558_vm2, %v578_v42  ;;  %v14932_v53 = vld [vmem:[#allocation2 + $0x3a] sm:$0xff] }
 0x1e1   : > { %880 = vst.msk [vmem:[#allocation2 + $0x31] sm:$0xff] %vm408_vm1, %v10434_v8  ;;  %v10451_v8 = vld [vmem:[%s14827_s24 + $0x98] sm:$0xff] }
 0x1e3   : > { %v682_v44 = vpop.permute.xlu1 %681  ;;  %v616_v45 = vpop.permute.xlu0 %615 }
 0x1e4   : > { %687 = vst.msk [vmem:[#allocation2 + $0xa9] sm:$0xff] %vm558_vm2, %v682_v44  ;;  %v621_v47 = vadd.f32 %v616_v45, %v14803_v25  ;;  %v10453_v44 = vld [vmem:[%s14827_s24 + $0xa8] sm:$0xff] }
 0x1e5   : > { %905 = vst.msk [vmem:[#allocation2 + $0xa9] sm:$0xff] %vm408_vm1, %v10444_v43 }
 0x1e6   : > { %623 = vst.msk [vmem:[#allocation2 + $0x61] sm:$0xff] %vm558_vm2, %v621_v47 }
 0x1e7   : > { %890 = vst.msk [vmem:[#allocation2 + $0x61] sm:$0xff] %vm408_vm1, %v10438_v46  ;;  %v706_v50 = vpop.permute.xlu1 %705  ;;  %v602_v51 = vpop.permute.xlu0 %601 }
 0x1e8   : > { %711 = vst.msk [vmem:[#allocation2 + $0xc1] sm:$0xff] %vm558_vm2, %v706_v50  ;;  %607 = vst.msk [vmem:[#allocation2 + $0x49] sm:$0xff] %vm558_vm2, %v602_v51  ;;  %v14922_v52 = vld [vmem:[#allocation2 + $0x2a] sm:$0xff]  ;;  %v14924_v25 = vld [vmem:[#allocation2 + $0x32] sm:$0xff] }
 0x1e9   : > { %910 = vst.msk [vmem:[#allocation2 + $0xc1] sm:$0xff] %vm408_vm1, %v10446_v48  ;;  %885 = vst.msk [vmem:[#allocation2 + $0x49] sm:$0xff] %vm408_vm1, %v10436_v49  ;;  %12290 = vmatmul.mubr.msk.f32.gmra.mrb[4].mxu1 %vm350_vm0, %v14922_v52  ;;  %v10455_v48 = vld [vmem:[%s14827_s24 + $0xb8] sm:$0xff] }
 0x1ea   : > { %12292 = vmatprep.mubr.msk.f32.mxu1 %vm350_vm0, %v14924_v25 }
 0x1eb   : > { %v618_v54 = vpop.permute.xlu0 %617 }
 0x1ec   : > { %v622_v56 = vadd.f32 %v618_v54, %v14793_v23  ;;  %v14948_v23 = vld [vmem:[#allocation2 + $0x52] sm:$0xff]  ;;  %v15024_v36 = vld [vmem:[#allocation2 + $0xa2] sm:$0xff] }
 0x1ed   : > { %12293 = vmatmul.mubr.msk.f32.gmra.mrb[6].mxu1 %vm350_vm0, %v14932_v53  ;;  %v10457_v54 = vld [vmem:[%s14827_s24 + $0xc8] sm:$0xff] }
 0x1ee   : > { %624 = vst.msk [vmem:[#allocation2 + $0x69] sm:$0xff] %vm558_vm2, %v622_v56  ;;  %v14960_v2 = vld [vmem:[#allocation2 + $0x5a] sm:$0xff] }
 0x1ef   : > { %891 = vst.msk [vmem:[#allocation2 + $0x69] sm:$0xff] %vm408_vm1, %v10439_v55  ;;  %v726_v58 = vpop.permute.xlu1 %725  ;;  %v632_v60 = vpop.permute.xlu0 %631 }
 0x1f0   : > { %731 = vst.msk [vmem:[#allocation2 + $0xd9] sm:$0xff] %vm558_vm2, %v726_v58  ;;  %v637_v61 = vadd.f32 %v632_v60, %v14798_v24  ;;  %v14944_v62 = vld [vmem:[#allocation2 + $0x42] sm:$0xff]  ;;  %v14946_v63 = vld [vmem:[#allocation2 + $0x4a] sm:$0xff]  ;;  %v15049_v42 = vld [vmem:[#allocation2 + $0xba] sm:$0xff] }
 0x1f1   : > { %915 = vst.msk [vmem:[#allocation2 + $0xd9] sm:$0xff] %vm408_vm1, %v10448_v57  ;;  %12295 = vmatprep.mubr.msk.f32.mxu1 %vm350_vm0, %v14944_v62  ;;  %17659 = vst [vmem:[#allocation5_spill] sm:$0xff] %v15049_v42  ;;  %v10459_v58 = vld [vmem:[%s14827_s24 + $0xd8] sm:$0xff] }
 0x1f2   : > { %639 = vst.msk [vmem:[#allocation2 + $0x79] sm:$0xff] %vm558_vm2, %v637_v61  ;;  %12296 = vmatmul.mubr.msk.f32.gmra.mrb[8].mxu1 %vm350_vm0, %v14946_v63 }
 0x1f3   : > { %895 = vst.msk [vmem:[#allocation2 + $0x79] sm:$0xff] %vm408_vm1, %v10440_v59  ;;  %v746_v24 = vpop.permute.xlu1 %745  ;;  %v836_v1 = vpop.permute.xlu0 %835  ;;  %12298 = vmatprep.mubr.msk.f32.mxu1 %vm350_vm0, %v14948_v23 }
 0x1f4   : > { %751 = vst.msk [vmem:[#allocation2 + $0xf1] sm:$0xff] %vm558_vm2, %v746_v24  ;;  %v841_v11 = vadd.f32 %v836_v1, %v14493_v6 }
 0x1f5   : > { %920 = vst.msk [vmem:[#allocation2 + $0xf1] sm:$0xff] %vm408_vm1, %v10450_v0  ;;  %v10461_v0 = vld [vmem:[%s14827_s24 + $0xe8] sm:$0xff] }
 0x1f6   : > { %845 = vrot.lane.b32.xlu1 %v841_v11, %s14412_s28  ;;  %12299 = vmatmul.mubr.msk.f32.gmra.mrb[10].mxu1 %vm350_vm0, %v14960_v2  ;;  %v14971_v10 = vld [vmem:[#allocation2 + $0x62] sm:$0xff]  ;;  %v14975_v6 = vld [vmem:[#allocation2 + $0x6a] sm:$0xff] }
 0x1f7   : > { %v766_v21 = vpop.permute.xlu1 %765  ;;  %v658_v18 = vpop.permute.xlu0 %657  ;;  %12301 = vmatprep.mubr.msk.f32.mxu1 %vm350_vm0, %v14971_v10 }
 0x1f8   : > { %771 = vst.msk [vmem:[#allocation2 + $0x109] sm:$0xff] %vm558_vm2, %v766_v21  ;;  %663 = vst.msk [vmem:[#allocation2 + $0x91] sm:$0xff] %vm558_vm2, %v658_v18  ;;  %v15063_v47 = vld [vmem:[#allocation2 + $0xd2] sm:$0xff] }
 0x1f9   : > { %925 = vst.msk [vmem:[#allocation2 + $0x109] sm:$0xff] %vm408_vm1, %v10452_v16  ;;  %900 = vst.msk [vmem:[#allocation2 + $0x91] sm:$0xff] %vm408_vm1, %v10442_v19 }
 0x1fa   : > { %865 = vrot.lane.b32.xlu1 %v861_v22, %s14412_s28  ;;  %12302 = vmatmul.mubr.msk.f32.gmra.mrb[12].mxu1 %vm350_vm0, %v14975_v6  ;;  %v14992_v26 = vld [vmem:[#allocation2 + $0x72] sm:$0xff]  ;;  %v14996_v15 = vld [vmem:[#allocation2 + $0x7a] sm:$0xff]  ;;  %17662 = vst [vmem:[#allocation8_spill] sm:$0xff] %v15063_v47 }
 0x1fb   : > { %v660_v27 = vpop.permute.xlu0 %659  ;;  %12304 = vmatprep.mubr.msk.f32.mxu1 %vm350_vm0, %v14992_v26 }
 0x1fc   : > { %664 = vst.msk [vmem:[#allocation2 + $0x99] sm:$0xff] %vm558_vm2, %v660_v27  ;;  %v15082_v56 = vld [vmem:[#allocation2 + $0xea] sm:$0xff] }
 0x1fd   : > { %901 = vst.msk [vmem:[#allocation2 + $0x99] sm:$0xff] %vm408_vm1, %v10443_v17  ;;  %17665 = vst [vmem:[#allocation11_spill] sm:$0xff] %v15082_v56 }
 0x1fe   : > { %12305 = vmatmul.mubr.msk.f32.gmra.mrb[14].mxu1 %vm350_vm0, %v14996_v15 }
 0x1ff   : > { %v786_v30 = vpop.permute.xlu1 %785  ;;  %v684_v31 = vpop.permute.xlu0 %683  ;;  %12307 = vmatprep.mubr.msk.f32.mxu1 %vm350_vm0, %v14999_v29 }
 0x200   : > { %791 = vst.msk [vmem:[#allocation2 + $0x121] sm:$0xff] %vm558_vm2, %v786_v30  ;;  %688 = vst.msk [vmem:[#allocation2 + $0xb1] sm:$0xff] %vm558_vm2, %v684_v31  ;;  %v15010_v32 = vld [vmem:[#allocation2 + $0x8a] sm:$0xff]  ;;  %v15096_v61 = vld [vmem:[#allocation2 + $0x102] sm:$0xff] }
 0x201   : > { %930 = vst.msk [vmem:[#allocation2 + $0x121] sm:$0xff] %vm408_vm1, %v10454_v13  ;;  %906 = vst.msk [vmem:[#allocation2 + $0xb1] sm:$0xff] %vm408_vm1, %v10445_v5  ;;  %v10460_v31 = vld [vmem:[%s14827_s24 + $0xe0] sm:$0xff] }
 0x202   : > { %12308 = vmatmul.mubr.msk.f32.gmra.mrb[16].mxu1 %vm350_vm0, %v15010_v32  ;;  %17668 = vst [vmem:[#allocation14_spill] sm:$0xff] %v15096_v61 }
 0x203   : > { %v806_v34 = vpop.permute.xlu1 %805  ;;  %v708_v9 = vpop.permute.xlu0 %707 }
 0x204   : > { %811 = vst.msk [vmem:[#allocation2 + $0x139] sm:$0xff] %vm558_vm2, %v806_v34  ;;  %712 = vst.msk [vmem:[#allocation2 + $0xc9] sm:$0xff] %vm558_vm2, %v708_v9  ;;  %v15020_v20 = vld [vmem:[#allocation2 + $0x92] sm:$0xff]  ;;  %v15022_v35 = vld [vmem:[#allocation2 + $0x9a] sm:$0xff] }
 0x205   : > { %935 = vst.msk [vmem:[#allocation2 + $0x139] sm:$0xff] %vm408_vm1, %v10456_v12  ;;  %911 = vst.msk [vmem:[#allocation2 + $0xc9] sm:$0xff] %vm408_vm1, %v10447_v33  ;;  %12310 = vmatprep.mubr.msk.f32.mxu1 %vm350_vm0, %v15020_v20  ;;  %v10462_v33 = vld [vmem:[%s14827_s24 + $0xf0] sm:$0xff] }
 0x206   : > { %12311 = vmatmul.mubr.msk.f32.gmra.mrb[18].mxu1 %vm350_vm0, %v15022_v35 }
 0x207   : > { %v826_v38 = vpop.permute.xlu1 %825  ;;  %v728_v39 = vpop.permute.xlu0 %727  ;;  %12313 = vmatprep.mubr.msk.f32.mxu1 %vm350_vm0, %v15024_v36 }
 0x208   : > { %831 = vst.msk [vmem:[#allocation2 + $0x151] sm:$0xff] %vm558_vm2, %v826_v38  ;;  %732 = vst.msk [vmem:[#allocation2 + $0xe1] sm:$0xff] %vm558_vm2, %v728_v39  ;;  %v15038_v40 = vld [vmem:[#allocation2 + $0xaa] sm:$0xff]  ;;  %v15040_v7 = vld [vmem:[#allocation2 + $0xb2] sm:$0xff] }
 0x209   : > { %17658 = vst [vmem:[#allocation4_spill] sm:$0xff] %v15040_v7  ;;  %940 = vst.msk [vmem:[#allocation2 + $0x151] sm:$0xff] %vm408_vm1, %v10458_v37  ;;  %v15115_v19 = vld [vmem:[#allocation2 + $0x11a] sm:$0xff] }
 0x20a   : > { %916 = vst.msk [vmem:[#allocation2 + $0xe1] sm:$0xff] %vm408_vm1, %v10449_v28  ;;  %12314 = vmatmul.mubr.msk.f32.gmra.mrb[20].mxu1 %vm350_vm0, %v15038_v40  ;;  %17671 = vst [vmem:[#allocation17_spill] sm:$0xff] %v15115_v19  ;;  %v952_v39 = vld [vmem:[#allocation2] sm:$0xff] }
 0x20b   : > { %v748_v41 = vpop.permute.xlu0 %747  ;;  %12316 = vmatprep.mubr.msk.f32.mxu1 %vm350_vm0, %v15040_v7  ;;  %v10659_v7 = vld [vmem:[%s17509_s3 + $0x20] sm:$0xff] }
 0x20c   : > { %752 = vst.msk [vmem:[#allocation2 + $0xf9] sm:$0xff] %vm558_vm2, %v748_v41  ;;  %v15052_v43 = vld [vmem:[#allocation2 + $0xc2] sm:$0xff]  ;;  %v15060_v46 = vld [vmem:[#allocation2 + $0xca] sm:$0xff]  ;;  %v15126_v22 = vld [vmem:[#allocation2 + $0x132] sm:$0xff] }
 0x20d   : > { %17660 = vst [vmem:[#allocation6_spill] sm:$0xff] %v15052_v43  ;;  %921 = vst.msk [vmem:[#allocation2 + $0xf9] sm:$0xff] %vm408_vm1, %v10451_v8  ;;  %v953_v8 = vld [vmem:[#allocation2 + $0x8] sm:$0xff]  ;;  %v954_v41 = vld [vmem:[#allocation2 + $0x10] sm:$0xff] }
 0x20e   : > { %12317 = vmatmul.mubr.msk.f32.gmra.mrb[22].mxu1 %vm350_vm0, %v15049_v42  ;;  %17661 = vst [vmem:[#allocation7_spill] sm:$0xff] %v15060_v46  ;;  %17674 = vst [vmem:[#allocation20_spill] sm:$0xff] %v15126_v22 }
 0x20f   : > { %v768_v45 = vpop.permute.xlu0 %767  ;;  %12319 = vmatprep.mubr.msk.f32.mxu1 %vm350_vm0, %v15052_v43 }
 0x210   : > { %772 = vst.msk [vmem:[#allocation2 + $0x111] sm:$0xff] %vm558_vm2, %v768_v45  ;;  %v15140_v13 = vld [vmem:[#allocation2 + $0x14a] sm:$0xff]  ;;  %v15183_v45 = vld [vmem:[#allocation2 + $0x18] sm:$0xff] }
 0x211   : > { %926 = vst.msk [vmem:[#allocation2 + $0x111] sm:$0xff] %vm408_vm1, %v10453_v44  ;;  %v15071_v50 = vld [vmem:[#allocation2 + $0xda] sm:$0xff]  ;;  %v15074_v51 = vld [vmem:[#allocation2 + $0xe2] sm:$0xff]  ;;  %17677 = vst [vmem:[#allocation23_spill] sm:$0xff] %v15140_v13 }
 0x212   : > { %12320 = vmatmul.mubr.msk.f32.gmra.mrb[24].mxu1 %vm350_vm0, %v15060_v46  ;;  %17663 = vst [vmem:[#allocation9_spill] sm:$0xff] %v15071_v50  ;;  %17664 = vst [vmem:[#allocation10_spill] sm:$0xff] %v15074_v51  ;;  %v15178_v44 = vld [vmem:[%s17509_s3 + $0x8] sm:$0xff] }
 0x213   : > { %v788_v49 = vpop.permute.xlu0 %787  ;;  %12322 = vmatprep.mubr.msk.f32.mxu1 %vm350_vm0, %v15063_v47 }
 0x214   : > { %792 = vst.msk [vmem:[#allocation2 + $0x129] sm:$0xff] %vm558_vm2, %v788_v49  ;;  %v15085_v57 = vld [vmem:[#allocation2 + $0xf2] sm:$0xff]  ;;  %v15093_v60 = vld [vmem:[#allocation2 + $0xfa] sm:$0xff]  ;;  %v15192_v49 = vld [vmem:[#allocation2 + $0x28] sm:$0xff] }
 0x215   : > { %931 = vst.msk [vmem:[#allocation2 + $0x129] sm:$0xff] %vm408_vm1, %v10455_v48  ;;  %17666 = vst [vmem:[#allocation12_spill] sm:$0xff] %v15085_v57  ;;  %v15185_v48 = vld [vmem:[#allocation2 + $0x20] sm:$0xff] }
 0x216   : > { %12323 = vmatmul.mubr.msk.f32.gmra.mrb[26].mxu1 %vm350_vm0, %v15071_v50  ;;  %17667 = vst [vmem:[#allocation13_spill] sm:$0xff] %v15093_v60 }
 0x217   : > { %v808_v55 = vpop.permute.xlu0 %807  ;;  %12325 = vmatprep.mubr.msk.f32.mxu1 %vm350_vm0, %v15074_v51  ;;  %v15341_v51 = vld [vmem:[#allocation2 + $0x150] sm:$0xff] }
 0x218   : > { %812 = vst.msk [vmem:[#allocation2 + $0x141] sm:$0xff] %vm558_vm2, %v808_v55  ;;  %v15104_v1 = vld [vmem:[#allocation2 + $0x10a] sm:$0xff]  ;;  %v15107_v11 = vld [vmem:[#allocation2 + $0x112] sm:$0xff]  ;;  %v15202_v55 = vld [vmem:[#allocation2 + $0x40] sm:$0xff] }
 0x219   : > { %936 = vst.msk [vmem:[#allocation2 + $0x141] sm:$0xff] %vm408_vm1, %v10457_v54  ;;  %17669 = vst [vmem:[#allocation15_spill] sm:$0xff] %v15104_v1  ;;  %v15194_v54 = vld [vmem:[#allocation2 + $0x30] sm:$0xff] }
 0x21a   : > { %12326 = vmatmul.mubr.msk.f32.gmra.mrb[28].mxu1 %vm350_vm0, %v15082_v56  ;;  %17670 = vst [vmem:[#allocation16_spill] sm:$0xff] %v15107_v11  ;;  %17684 = vst [vmem:[#allocation30_spill] sm:$0xff] %v15194_v54 }
 0x21b   : > { %v828_v59 = vpop.permute.xlu0 %827  ;;  %12328 = vmatprep.mubr.msk.f32.mxu1 %vm350_vm0, %v15085_v57  ;;  %17686 = vst [vmem:[#allocation32_spill] sm:$0xff] %v15202_v55  ;;  %17720 = vst [vmem:[#allocation66_spill] sm:$0xff] %v15341_v51 }
 0x21c   : > { %832 = vst.msk [vmem:[#allocation2 + $0x159] sm:$0xff] %vm558_vm2, %v828_v59  ;;  %v15117_v18 = vld [vmem:[#allocation2 + $0x122] sm:$0xff]  ;;  %v15124_v3 = vld [vmem:[#allocation2 + $0x12a] sm:$0xff] }
 0x21d   : > { %941 = vst.msk [vmem:[#allocation2 + $0x159] sm:$0xff] %vm408_vm1, %v10459_v58  ;;  %17672 = vst [vmem:[#allocation18_spill] sm:$0xff] %v15117_v18  ;;  %v15208_v58 = vld [vmem:[#allocation2 + $0x48] sm:$0xff]  ;;  %v15210_v59 = vld [vmem:[#allocation2 + $0x50] sm:$0xff] }
 0x21e   : > { %12329 = vmatmul.mubr.msk.f32.gmra.mrb[30].mxu1 %vm350_vm0, %v15093_v60  ;;  %17673 = vst [vmem:[#allocation19_spill] sm:$0xff] %v15124_v3  ;;  %17687 = vst [vmem:[#allocation33_spill] sm:$0xff] %v15208_v58  ;;  %v15331_v60 = vld [vmem:[#allocation2 + $0x138] sm:$0xff] }
 0x21f   : > { %v848_v24 = vpop.permute.xlu0 %847  ;;  %12331 = vmatprep.mubr.msk.f32.mxu1 %vm350_vm0, %v15096_v61  ;;  %17688 = vst [vmem:[#allocation34_spill] sm:$0xff] %v15210_v59  ;;  %v15325_v61 = vld [vmem:[#allocation2 + $0x130] sm:$0xff]  ;;  %17717 = vst [vmem:[#allocation63_spill] sm:$0xff] %v15331_v60 }
 0x220   : > { %852 = vst.msk [vmem:[#allocation2 + $0x171] sm:$0xff] %vm558_vm2, %v848_v24  ;;  %v15132_v17 = vld [vmem:[#allocation2 + $0x13a] sm:$0xff]  ;;  %v15134_v27 = vld [vmem:[#allocation2 + $0x142] sm:$0xff]  ;;  %17716 = vst [vmem:[#allocation62_spill] sm:$0xff] %v15325_v61 }
 0x221   : > { %946 = vst.msk [vmem:[#allocation2 + $0x171] sm:$0xff] %vm408_vm1, %v10461_v0  ;;  %17675 = vst [vmem:[#allocation21_spill] sm:$0xff] %v15132_v17  ;;  %v15216_v0 = vld [vmem:[#allocation2 + $0x58] sm:$0xff]  ;;  %v15218_v24 = vld [vmem:[#allocation2 + $0x60] sm:$0xff] }
 0x222   : > { %12332 = vmatmul.mubr.msk.f32.gmra.mrb[32].mxu1 %vm350_vm0, %v15104_v1  ;;  %17676 = vst [vmem:[#allocation22_spill] sm:$0xff] %v15134_v27  ;;  %17689 = vst [vmem:[#allocation35_spill] sm:$0xff] %v15216_v0  ;;  %v15323_v1 = vld [vmem:[#allocation2 + $0x128] sm:$0xff]  ;;  %v15333_v57 = vld [vmem:[#allocation2 + $0x140] sm:$0xff] }
 0x223   : > { %v858_v16 = vpop.permute.xlu0 %857  ;;  %12334 = vmatprep.mubr.msk.f32.mxu1 %vm350_vm0, %v15107_v11  ;;  %17690 = vst [vmem:[#allocation36_spill] sm:$0xff] %v15218_v24  ;;  %v15317_v11 = vld [vmem:[#allocation2 + $0x120] sm:$0xff]  ;;  %17715 = vst [vmem:[#allocation61_spill] sm:$0xff] %v15323_v1  ;;  %v15339_v56 = vld [vmem:[#allocation2 + $0x148] sm:$0xff] }
 0x224   : > { %v862_v21 = vadd.f32 %v858_v16, %v854_v14  ;;  %v15142_v5 = vld [vmem:[#allocation2 + $0x152] sm:$0xff]  ;;  %v15148_v30 = vld [vmem:[#allocation2 + $0x15a] sm:$0xff]  ;;  %v15224_v14 = vld [vmem:[#allocation2 + $0x68] sm:$0xff]  ;;  %17714 = vst [vmem:[#allocation60_spill] sm:$0xff] %v15317_v11 }
 0x225   : > { %17678 = vst [vmem:[#allocation24_spill] sm:$0xff] %v15142_v5  ;;  %17679 = vst [vmem:[#allocation25_spill] sm:$0xff] %v15148_v30  ;;  %v15226_v16 = vld [vmem:[#allocation2 + $0x70] sm:$0xff]  ;;  %v15347_v50 = vld [vmem:[#allocation2 + $0x158] sm:$0xff] }
 0x226   : > { %867 = vrot.lane.b32.xlu1 %v862_v21, %s14412_s28  ;;  %12335 = vmatmul.mubr.msk.f32.gmra.mrb[34].mxu1 %vm350_vm0, %v15115_v19  ;;  %17691 = vst [vmem:[#allocation37_spill] sm:$0xff] %v15224_v14  ;;  %17692 = vst [vmem:[#allocation38_spill] sm:$0xff] %v15226_v16  ;;  %v15232_v21 = vld [vmem:[#allocation2 + $0x78] sm:$0xff]  ;;  %v15349_v47 = vld [vmem:[#allocation2 + $0x160] sm:$0xff] }
 0x227   : > { %12337 = vmatprep.mubr.msk.f32.mxu1 %vm350_vm0, %v15117_v18  ;;  %17693 = vst [vmem:[#allocation39_spill] sm:$0xff] %v15232_v21  ;;  %v15309_v18 = vld [vmem:[#allocation2 + $0x110] sm:$0xff]  ;;  %v15315_v19 = vld [vmem:[#allocation2 + $0x118] sm:$0xff]  ;;  %17718 = vst [vmem:[#allocation64_spill] sm:$0xff] %v15333_v57 }
 0x228   : > { %v15162_v28 = vld [vmem:[#allocation2 + $0x172] sm:$0xff]  ;;  %17712 = vst [vmem:[#allocation58_spill] sm:$0xff] %v15309_v18  ;;  %17713 = vst [vmem:[#allocation59_spill] sm:$0xff] %v15315_v19 }
 0x229   : > { %17682 = vst [vmem:[#allocation28_spill] sm:$0xff] %v15162_v28  ;;  %17719 = vst [vmem:[#allocation65_spill] sm:$0xff] %v15339_v56  ;;  %v15363_v42 = vld [vmem:[#allocation2 + $0x178] sm:$0xff] }
 0x22a   : > { %12338 = vmatmul.mubr.msk.f32.gmra.mrb[36].mxu1 %vm350_vm0, %v15124_v3  ;;  %v15307_v3 = vld [vmem:[#allocation2 + $0x108] sm:$0xff]  ;;  %17721 = vst [vmem:[#allocation67_spill] sm:$0xff] %v15347_v50  ;;  %17722 = vst [vmem:[#allocation68_spill] sm:$0xff] %v15349_v47 }
 0x22b   : > { %12340 = vmatprep.mubr.msk.f32.mxu1 %vm350_vm0, %v15126_v22  ;;  %v15301_v22 = vld [vmem:[#allocation2 + $0x100] sm:$0xff]  ;;  %17711 = vst [vmem:[#allocation57_spill] sm:$0xff] %v15307_v3  ;;  %17725 = vst [vmem:[#allocation71_spill] sm:$0xff] %v15363_v42 }
 0x22c   : > { %17710 = vst [vmem:[#allocation56_spill] sm:$0xff] %v15301_v22 }
 0x22e   : > { %12341 = vmatmul.mubr.msk.f32.gmra.mrb[38].mxu1 %vm350_vm0, %v15132_v17  ;;  %v15299_v17 = vld [vmem:[#allocation2 + $0xf8] sm:$0xff] }
 0x22f   : > { %12343 = vmatprep.mubr.msk.f32.mxu1 %vm350_vm0, %v15134_v27  ;;  %v15293_v27 = vld [vmem:[#allocation2 + $0xf0] sm:$0xff]  ;;  %17709 = vst [vmem:[#allocation55_spill] sm:$0xff] %v15299_v17 }
 0x230   : > { %17708 = vst [vmem:[#allocation54_spill] sm:$0xff] %v15293_v27 }
 0x232   : > { %12344 = vmatmul.mubr.msk.f32.gmra.mrb[40].mxu1 %vm350_vm0, %v15140_v13  ;;  %v15291_v13 = vld [vmem:[#allocation2 + $0xe8] sm:$0xff] }
 0x233   : > { %12346 = vmatprep.mubr.msk.f32.mxu1 %vm350_vm0, %v15142_v5  ;;  %v15285_v5 = vld [vmem:[#allocation2 + $0xe0] sm:$0xff]  ;;  %17707 = vst [vmem:[#allocation53_spill] sm:$0xff] %v15291_v13 }
 0x234   : > { %17706 = vst [vmem:[#allocation52_spill] sm:$0xff] %v15285_v5 }
 0x236   : > { %12347 = vmatmul.mubr.msk.f32.gmra.mrb[42].mxu1 %vm350_vm0, %v15148_v30  ;;  %v15283_v30 = vld [vmem:[#allocation2 + $0xd8] sm:$0xff] }
 0x237   : > { %17705 = vst [vmem:[#allocation51_spill] sm:$0xff] %v15283_v30 }
 0x268   : > { %v846_v12 = vpop.permute.xlu1 %845 }
 0x269   : > { %851 = vst.msk [vmem:[#allocation2 + $0x169] sm:$0xff] %vm558_vm2, %v846_v12  ;;  %v10463_v12 = vld [vmem:[%s14827_s24 + $0xf8] sm:$0xff] }
 0x26a   : > { %945 = vst.msk [vmem:[#allocation2 + $0x169] sm:$0xff] %vm408_vm1, %v10460_v31  ;;  %v15234_v31 = vld [vmem:[#allocation2 + $0x80] sm:$0xff] }
 0x26b   : > { %17694 = vst [vmem:[#allocation40_spill] sm:$0xff] %v15234_v31 }
 0x26c   : > { %v866_v34 = vpop.permute.xlu1 %865 }
 0x26d   : > { %871 = vst.msk [vmem:[#allocation2 + $0x181] sm:$0xff] %vm558_vm2, %v866_v34  ;;  %v15241_v34 = vld [vmem:[#allocation2 + $0x88] sm:$0xff] }
 0x26e   : > { %950 = vst.msk [vmem:[#allocation2 + $0x181] sm:$0xff] %vm408_vm1, %v10462_v33  ;;  %17695 = vst [vmem:[#allocation41_spill] sm:$0xff] %v15241_v34 }
 0x271   : > { %v15158_v9 = vld [vmem:[#allocation2 + $0x162] sm:$0xff]  ;;  %v15160_v37 = vld [vmem:[#allocation2 + $0x16a] sm:$0xff] }
 0x272   : > { %17680 = vst [vmem:[#allocation26_spill] sm:$0xff] %v15158_v9  ;;  %17681 = vst [vmem:[#allocation27_spill] sm:$0xff] %v15160_v37  ;;  %12349 = vmatprep.mubr.msk.f32.mxu1 %vm350_vm0, %v15158_v9  ;;  %v15277_v9 = vld [vmem:[#allocation2 + $0xd0] sm:$0xff]  ;;  %v15355_v46 = vld [vmem:[#allocation2 + $0x168] sm:$0xff] }
 0x273   : > { %12350 = vmatmul.mubr.msk.f32.gmra.mrb[44].mxu1 %vm350_vm0, %v15160_v37  ;;  %v15275_v37 = vld [vmem:[#allocation2 + $0xc8] sm:$0xff]  ;;  %17704 = vst [vmem:[#allocation50_spill] sm:$0xff] %v15277_v9  ;;  %17723 = vst [vmem:[#allocation69_spill] sm:$0xff] %v15355_v46  ;;  %v15357_v43 = vld [vmem:[#allocation2 + $0x170] sm:$0xff] }
 0x274   : > { %12352 = vmatprep.mubr.msk.f32.mxu1 %vm350_vm0, %v15162_v28  ;;  %v15269_v28 = vld [vmem:[#allocation2 + $0xc0] sm:$0xff]  ;;  %17703 = vst [vmem:[#allocation49_spill] sm:$0xff] %v15275_v37  ;;  %17724 = vst [vmem:[#allocation70_spill] sm:$0xff] %v15357_v43 }
 0x275   : > { %v15170_v38 = vld [vmem:[#allocation2 + $0x17a] sm:$0xff]  ;;  %17702 = vst [vmem:[#allocation48_spill] sm:$0xff] %v15269_v28 }
 0x276   : > { %17683 = vst [vmem:[#allocation29_spill] sm:$0xff] %v15170_v38 }
 0x277   : > { %12353 = vmatmul.mubr.msk.f32.gmra.mrb[46].mxu1 %vm350_vm0, %v15170_v38  ;;  %v15261_v38 = vld [vmem:[#allocation2 + $0xb0] sm:$0xff] }
 0x278   : > { %12357 = vmatprep.mubr.msk.f32.mxu1 %vm350_vm0, %v952_v39  ;;  %v15244_v39 = vld [vmem:[#allocation2 + $0x90] sm:$0xff]  ;;  %17700 = vst [vmem:[#allocation46_spill] sm:$0xff] %v15261_v38 }
 0x279   : > { %17696 = vst [vmem:[#allocation42_spill] sm:$0xff] %v15244_v39 }
 0x27b   : > { %12358 = vmatmul.mubr.msk.f32.vlgmr.msra.gmra.mrb[0].mxu1 %vm350_vm0, %v953_v8  ;;  %v15251_v8 = vld [vmem:[#allocation2 + $0x98] sm:$0xff] }
 0x27c   : > { %12430 = vmatpush3.msra.mxu1 %v14983_v4  ;;  %12360 = vmatprep.mubr.msk.f32.mxu1 %vm350_vm0, %v954_v41  ;;  %v15200_v4 = vld [vmem:[#allocation2 + $0x38] sm:$0xff]  ;;  %17697 = vst [vmem:[#allocation43_spill] sm:$0xff] %v15251_v8  ;;  %v15253_v41 = vld [vmem:[#allocation2 + $0xa0] sm:$0xff] }
 0x27d   : > { %12503 = vmatprep.subr.mxu1 %v15178_v44  ;;  %17685 = vst [vmem:[#allocation31_spill] sm:$0xff] %v15200_v4  ;;  %17698 = vst [vmem:[#allocation44_spill] sm:$0xff] %v15253_v41 }
 0x27f   : > { %12361 = vmatmul.mubr.msk.f32.gmra.mrb[2].mxu1 %vm350_vm0, %v15183_v45 }
 0x280   : > { %12363 = vmatprep.mubr.msk.f32.mxu1 %vm350_vm0, %v15185_v48 }
 0x283   : > { %12364 = vmatmul.mubr.msk.f32.gmra.mrb[4].mxu1 %vm350_vm0, %v15192_v49 }
 0x284   : > { %12366 = vmatprep.mubr.msk.f32.mxu1 %vm350_vm0, %v15194_v54 }
 0x287   : > { %12367 = vmatmul.mubr.msk.f32.gmra.mrb[6].mxu1 %vm350_vm0, %v15200_v4 }
 0x288   : > { %12369 = vmatprep.mubr.msk.f32.mxu1 %vm350_vm0, %v15202_v55 }
 0x28b   : > { %12370 = vmatmul.mubr.msk.f32.gmra.mrb[8].mxu1 %vm350_vm0, %v15208_v58 }
 0x28c   : > { %12372 = vmatprep.mubr.msk.f32.mxu1 %vm350_vm0, %v15210_v59 }
 0x28f   : > { %12373 = vmatmul.mubr.msk.f32.gmra.mrb[10].mxu1 %vm350_vm0, %v15216_v0 }
 0x290   : > { %12375 = vmatprep.mubr.msk.f32.mxu1 %vm350_vm0, %v15218_v24 }
 0x293   : > { %12376 = vmatmul.mubr.msk.f32.gmra.mrb[12].mxu1 %vm350_vm0, %v15224_v14 }
 0x294   : > { %12378 = vmatprep.mubr.msk.f32.mxu1 %vm350_vm0, %v15226_v16 }
 0x297   : > { %12379 = vmatmul.mubr.msk.f32.gmra.mrb[14].mxu1 %vm350_vm0, %v15232_v21 }
 0x298   : > { %v868_v33 = vpop.permute.xlu1 %867  ;;  %12381 = vmatprep.mubr.msk.f32.mxu1 %vm350_vm0, %v15234_v31 }
 0x299   : > { %872 = vst.msk [vmem:[#allocation2 + $0x189] sm:$0xff] %vm558_vm2, %v868_v33  ;;  %v15259_v33 = vld [vmem:[#allocation2 + $0xa8] sm:$0xff] }
 0x29a   : > { %951 = vst.msk [vmem:[#allocation2 + $0x189] sm:$0xff] %vm408_vm1, %v10463_v12  ;;  %17699 = vst [vmem:[#allocation45_spill] sm:$0xff] %v15259_v33  ;;  %v15267_v12 = vld [vmem:[#allocation2 + $0xb8] sm:$0xff] }
 0x29b   : > { %12382 = vmatmul.mubr.msk.f32.gmra.mrb[16].mxu1 %vm350_vm0, %v15241_v34  ;;  %17701 = vst [vmem:[#allocation47_spill] sm:$0xff] %v15267_v12 }
 0x29c   : > { %12384 = vmatprep.mubr.msk.f32.mxu1 %vm350_vm0, %v15244_v39 }
 0x29f   : > { %12385 = vmatmul.mubr.msk.f32.gmra.mrb[18].mxu1 %vm350_vm0, %v15251_v8 }
 0x2a0   : > { %12387 = vmatprep.mubr.msk.f32.mxu1 %vm350_vm0, %v15253_v41 }
 0x2a3   : > { %12388 = vmatmul.mubr.msk.f32.gmra.mrb[20].mxu1 %vm350_vm0, %v15259_v33 }
 0x2a4   : > { %12390 = vmatprep.mubr.msk.f32.mxu1 %vm350_vm0, %v15261_v38 }
 0x2a7   : > { %12391 = vmatmul.mubr.msk.f32.gmra.mrb[22].mxu1 %vm350_vm0, %v15267_v12 }
 0x2a8   : > { %12393 = vmatprep.mubr.msk.f32.mxu1 %vm350_vm0, %v15269_v28 }
 0x2ab   : > { %12394 = vmatmul.mubr.msk.f32.gmra.mrb[24].mxu1 %vm350_vm0, %v15275_v37 }
 0x2ac   : > { %12396 = vmatprep.mubr.msk.f32.mxu1 %vm350_vm0, %v15277_v9 }
 0x2af   : > { %12397 = vmatmul.mubr.msk.f32.gmra.mrb[26].mxu1 %vm350_vm0, %v15283_v30 }
 0x2b0   : > { %12399 = vmatprep.mubr.msk.f32.mxu1 %vm350_vm0, %v15285_v5 }
 0x2b3   : > { %12400 = vmatmul.mubr.msk.f32.gmra.mrb[28].mxu1 %vm350_vm0, %v15291_v13 }
 0x2b4   : > { %12402 = vmatprep.mubr.msk.f32.mxu1 %vm350_vm0, %v15293_v27 }
 0x2b7   : > { %12403 = vmatmul.mubr.msk.f32.gmra.mrb[30].mxu1 %vm350_vm0, %v15299_v17 }
 0x2b8   : > { %12405 = vmatprep.mubr.msk.f32.mxu1 %vm350_vm0, %v15301_v22 }
 0x2bb   : > { %12406 = vmatmul.mubr.msk.f32.gmra.mrb[32].mxu1 %vm350_vm0, %v15307_v3 }
 0x2bc   : > { %12408 = vmatprep.mubr.msk.f32.mxu1 %vm350_vm0, %v15309_v18 }
 0x2bf   : > { %12409 = vmatmul.mubr.msk.f32.gmra.mrb[34].mxu1 %vm350_vm0, %v15315_v19 }
 0x2c0   : > { %12411 = vmatprep.mubr.msk.f32.mxu1 %vm350_vm0, %v15317_v11 }
 0x2c3   : > { %12412 = vmatmul.mubr.msk.f32.gmra.mrb[36].mxu1 %vm350_vm0, %v15323_v1 }
 0x2c4   : > { %12414 = vmatprep.mubr.msk.f32.mxu1 %vm350_vm0, %v15325_v61 }
 0x2c7   : > { %12415 = vmatmul.mubr.msk.f32.gmra.mrb[38].mxu1 %vm350_vm0, %v15331_v60 }
 0x2c8   : > { %12417 = vmatprep.mubr.msk.f32.mxu1 %vm350_vm0, %v15333_v57 }
 0x2cb   : > { %12418 = vmatmul.mubr.msk.f32.gmra.mrb[40].mxu1 %vm350_vm0, %v15339_v56 }
 0x2cc   : > { %12420 = vmatprep.mubr.msk.f32.mxu1 %vm350_vm0, %v15341_v51 }
 0x2cf   : > { %12421 = vmatmul.mubr.msk.f32.gmra.mrb[42].mxu1 %vm350_vm0, %v15347_v50 }
 0x2d0   : > { %12423 = vmatprep.mubr.msk.f32.mxu1 %vm350_vm0, %v15349_v47 }
 0x2d3   : > { %12424 = vmatmul.mubr.msk.f32.gmra.mrb[44].mxu1 %vm350_vm0, %v15355_v46 }
 0x2d4   : > { %12426 = vmatprep.mubr.msk.f32.mxu1 %vm350_vm0, %v15357_v43 }
 0x2d7   : > { %12427 = vmatmul.mubr.msk.f32.gmra.mrb[46].mxu1 %vm350_vm0, %v15363_v42 }
 0x2d8   : > { %12431 = vmatprep.mubr.msk.f32.mxu1 %vm350_vm0, %v15183_v45  ;;  %v15463_v45 = vld [vmem:[#allocation2 + $0x188] sm:$0xff] }
 0x2d9   : > { %17727 = vst [vmem:[#allocation73_spill] sm:$0xff] %v15463_v45 }
 0x2db   : > { %12432 = vmatmul.mubr.msk.f32.vlgmr.msra.gmra.mrb[0].mxu1 %vm350_vm0, %v15185_v48  ;;  %v15469_v48 = vld [vmem:[#allocation2 + $0x190] sm:$0xff] }
 0x2dc   : > { %12504 = vmatpush3.msra.mxu1 %v15178_v44  ;;  %12434 = vmatprep.mubr.msk.f32.mxu1 %vm350_vm0, %v15192_v49  ;;  %v15461_v44 = vld [vmem:[#allocation2 + $0x180] sm:$0xff]  ;;  %17728 = vst [vmem:[#allocation74_spill] sm:$0xff] %v15469_v48 }
 0x2dd   : > { %12577 = vmatprep.subr.mxu1 %v10659_v7  ;;  %17726 = vst [vmem:[#allocation72_spill] sm:$0xff] %v15461_v44  ;;  %v1001_v49 = vld [vmem:[#allocation2 + $0x1] sm:$0xff] }
 0x2df   : > { %12435 = vmatmul.mubr.msk.f32.gmra.mrb[2].mxu1 %vm350_vm0, %v15194_v54  ;;  %v10757_v54 = vld [vmem:[%s17509_s3 + $0x30] sm:$0xff] }
 0x2e0   : > { %12437 = vmatprep.mubr.msk.f32.mxu1 %vm350_vm0, %v15200_v4  ;;  %v15658_v4 = vld [vmem:[#allocation2 + $0x179] sm:$0xff] }
 0x2e1   : > { %17730 = vst [vmem:[#allocation76_spill] sm:$0xff] %v15658_v4 }
 0x2e3   : > { %12438 = vmatmul.mubr.msk.f32.gmra.mrb[4].mxu1 %vm350_vm0, %v15202_v55  ;;  %v15652_v55 = vld [vmem:[#allocation2 + $0x171] sm:$0xff] }
 0x2e4   : > { %12440 = vmatprep.mubr.msk.f32.mxu1 %vm350_vm0, %v15208_v58  ;;  %v15650_v58 = vld [vmem:[#allocation2 + $0x169] sm:$0xff]  ;;  %17729 = vst [vmem:[#allocation75_spill] sm:$0xff] %v15652_v55 }
 0x2e7   : > { %12441 = vmatmul.mubr.msk.f32.gmra.mrb[6].mxu1 %vm350_vm0, %v15210_v59  ;;  %v15644_v59 = vld [vmem:[#allocation2 + $0x161] sm:$0xff] }
 0x2e8   : > { %12443 = vmatprep.mubr.msk.f32.mxu1 %vm350_vm0, %v15216_v0  ;;  %v15642_v0 = vld [vmem:[#allocation2 + $0x159] sm:$0xff] }
 0x2eb   : > { %12444 = vmatmul.mubr.msk.f32.gmra.mrb[8].mxu1 %vm350_vm0, %v15218_v24  ;;  %v15636_v24 = vld [vmem:[#allocation2 + $0x151] sm:$0xff] }
 0x2ec   : > { %12446 = vmatprep.mubr.msk.f32.mxu1 %vm350_vm0, %v15224_v14  ;;  %v15634_v14 = vld [vmem:[#allocation2 + $0x149] sm:$0xff] }
 0x2ef   : > { %12447 = vmatmul.mubr.msk.f32.gmra.mrb[10].mxu1 %vm350_vm0, %v15226_v16  ;;  %v15628_v16 = vld [vmem:[#allocation2 + $0x141] sm:$0xff] }
 0x2f0   : > { %12449 = vmatprep.mubr.msk.f32.mxu1 %vm350_vm0, %v15232_v21  ;;  %v15626_v21 = vld [vmem:[#allocation2 + $0x139] sm:$0xff] }
 0x2f3   : > { %12450 = vmatmul.mubr.msk.f32.gmra.mrb[12].mxu1 %vm350_vm0, %v15234_v31  ;;  %v15620_v31 = vld [vmem:[#allocation2 + $0x131] sm:$0xff] }
 0x2f4   : > { %12452 = vmatprep.mubr.msk.f32.mxu1 %vm350_vm0, %v15241_v34  ;;  %v15618_v34 = vld [vmem:[#allocation2 + $0x129] sm:$0xff] }
 0x2f7   : > { %12453 = vmatmul.mubr.msk.f32.gmra.mrb[14].mxu1 %vm350_vm0, %v15244_v39  ;;  %v15612_v39 = vld [vmem:[#allocation2 + $0x121] sm:$0xff] }
 0x2f8   : > { %12455 = vmatprep.mubr.msk.f32.mxu1 %vm350_vm0, %v15251_v8  ;;  %v15610_v8 = vld [vmem:[#allocation2 + $0x119] sm:$0xff] }
 0x2fb   : > { %12456 = vmatmul.mubr.msk.f32.gmra.mrb[16].mxu1 %vm350_vm0, %v15253_v41  ;;  %v15604_v41 = vld [vmem:[#allocation2 + $0x111] sm:$0xff] }
 0x2fc   : > { %12458 = vmatprep.mubr.msk.f32.mxu1 %vm350_vm0, %v15259_v33  ;;  %v15602_v33 = vld [vmem:[#allocation2 + $0x109] sm:$0xff] }
 0x2ff   : > { %12459 = vmatmul.mubr.msk.f32.gmra.mrb[18].mxu1 %vm350_vm0, %v15261_v38  ;;  %v15596_v38 = vld [vmem:[#allocation2 + $0x101] sm:$0xff] }
 0x300   : > { %12461 = vmatprep.mubr.msk.f32.mxu1 %vm350_vm0, %v15267_v12  ;;  %v15594_v12 = vld [vmem:[#allocation2 + $0xf9] sm:$0xff] }
 0x303   : > { %12462 = vmatmul.mubr.msk.f32.gmra.mrb[20].mxu1 %vm350_vm0, %v15269_v28  ;;  %v15588_v28 = vld [vmem:[#allocation2 + $0xf1] sm:$0xff] }
 0x304   : > { %12464 = vmatprep.mubr.msk.f32.mxu1 %vm350_vm0, %v15275_v37  ;;  %v15586_v37 = vld [vmem:[#allocation2 + $0xe9] sm:$0xff] }
 0x307   : > { %12465 = vmatmul.mubr.msk.f32.gmra.mrb[22].mxu1 %vm350_vm0, %v15277_v9  ;;  %v15580_v9 = vld [vmem:[#allocation2 + $0xe1] sm:$0xff] }
 0x308   : > { %12467 = vmatprep.mubr.msk.f32.mxu1 %vm350_vm0, %v15283_v30  ;;  %v15578_v30 = vld [vmem:[#allocation2 + $0xd9] sm:$0xff] }
 0x30b   : > { %12468 = vmatmul.mubr.msk.f32.gmra.mrb[24].mxu1 %vm350_vm0, %v15285_v5  ;;  %v15572_v5 = vld [vmem:[#allocation2 + $0xd1] sm:$0xff] }
 0x30c   : > { %12470 = vmatprep.mubr.msk.f32.mxu1 %vm350_vm0, %v15291_v13  ;;  %v15570_v13 = vld [vmem:[#allocation2 + $0xc9] sm:$0xff] }
 0x30f   : > { %12471 = vmatmul.mubr.msk.f32.gmra.mrb[26].mxu1 %vm350_vm0, %v15293_v27  ;;  %v15564_v27 = vld [vmem:[#allocation2 + $0xc1] sm:$0xff] }
 0x310   : > { %12473 = vmatprep.mubr.msk.f32.mxu1 %vm350_vm0, %v15299_v17  ;;  %v15562_v17 = vld [vmem:[#allocation2 + $0xb9] sm:$0xff] }
 0x313   : > { %12474 = vmatmul.mubr.msk.f32.gmra.mrb[28].mxu1 %vm350_vm0, %v15301_v22  ;;  %v15556_v22 = vld [vmem:[#allocation2 + $0xb1] sm:$0xff] }
 0x314   : > { %12476 = vmatprep.mubr.msk.f32.mxu1 %vm350_vm0, %v15307_v3  ;;  %v15554_v3 = vld [vmem:[#allocation2 + $0xa9] sm:$0xff] }
 0x317   : > { %12477 = vmatmul.mubr.msk.f32.gmra.mrb[30].mxu1 %vm350_vm0, %v15309_v18  ;;  %v15548_v18 = vld [vmem:[#allocation2 + $0xa1] sm:$0xff] }
 0x318   : > { %12479 = vmatprep.mubr.msk.f32.mxu1 %vm350_vm0, %v15315_v19  ;;  %v15546_v19 = vld [vmem:[#allocation2 + $0x99] sm:$0xff] }
 0x31b   : > { %12480 = vmatmul.mubr.msk.f32.gmra.mrb[32].mxu1 %vm350_vm0, %v15317_v11  ;;  %v15540_v11 = vld [vmem:[#allocation2 + $0x91] sm:$0xff] }
 0x31c   : > { %12482 = vmatprep.mubr.msk.f32.mxu1 %vm350_vm0, %v15323_v1  ;;  %v15538_v1 = vld [vmem:[#allocation2 + $0x89] sm:$0xff] }
 0x31f   : > { %12483 = vmatmul.mubr.msk.f32.gmra.mrb[34].mxu1 %vm350_vm0, %v15325_v61  ;;  %v15532_v61 = vld [vmem:[#allocation2 + $0x81] sm:$0xff] }
 0x320   : > { %12485 = vmatprep.mubr.msk.f32.mxu1 %vm350_vm0, %v15331_v60  ;;  %v15530_v60 = vld [vmem:[#allocation2 + $0x79] sm:$0xff] }
 0x323   : > { %12486 = vmatmul.mubr.msk.f32.gmra.mrb[36].mxu1 %vm350_vm0, %v15333_v57  ;;  %v15524_v57 = vld [vmem:[#allocation2 + $0x71] sm:$0xff] }
 0x324   : > { %12488 = vmatprep.mubr.msk.f32.mxu1 %vm350_vm0, %v15339_v56  ;;  %v15522_v56 = vld [vmem:[#allocation2 + $0x69] sm:$0xff] }
 0x327   : > { %12489 = vmatmul.mubr.msk.f32.gmra.mrb[38].mxu1 %vm350_vm0, %v15341_v51  ;;  %v15516_v51 = vld [vmem:[#allocation2 + $0x61] sm:$0xff] }
 0x328   : > { %12491 = vmatprep.mubr.msk.f32.mxu1 %vm350_vm0, %v15347_v50  ;;  %v15514_v50 = vld [vmem:[#allocation2 + $0x59] sm:$0xff] }
 0x32b   : > { %12492 = vmatmul.mubr.msk.f32.gmra.mrb[40].mxu1 %vm350_vm0, %v15349_v47  ;;  %v15508_v47 = vld [vmem:[#allocation2 + $0x51] sm:$0xff] }
 0x32c   : > { %12494 = vmatprep.mubr.msk.f32.mxu1 %vm350_vm0, %v15355_v46  ;;  %v15477_v46 = vld [vmem:[%s17509_s3 + $0x28] sm:$0xff] }
 0x32f   : > { %12495 = vmatmul.mubr.msk.f32.gmra.mrb[42].mxu1 %vm350_vm0, %v15357_v43  ;;  %v1002_v43 = vld [vmem:[#allocation2 + $0x9] sm:$0xff] }
 0x330   : > { %12497 = vmatprep.mubr.msk.f32.mxu1 %vm350_vm0, %v15363_v42  ;;  %v1003_v42 = vld [vmem:[#allocation2 + $0x11] sm:$0xff] }
 0x333   : > { %12498 = vmatmul.mubr.msk.f32.gmra.mrb[44].mxu1 %vm350_vm0, %v15461_v44  ;;  %v15483_v44 = vld [vmem:[#allocation2 + $0x21] sm:$0xff] }
 0x334   : > { %12500 = vmatprep.mubr.msk.f32.mxu1 %vm350_vm0, %v15463_v45  ;;  %v15481_v45 = vld [vmem:[#allocation2 + $0x19] sm:$0xff] }
 0x337   : > { %12501 = vmatmul.mubr.msk.f32.gmra.mrb[46].mxu1 %vm350_vm0, %v15469_v48  ;;  %v15492_v48 = vld [vmem:[#allocation2 + $0x31] sm:$0xff] }
 0x338   : > { %12505 = vmatprep.mubr.msk.f32.mxu1 %vm350_vm0, %v1001_v49  ;;  %v15490_v49 = vld [vmem:[#allocation2 + $0x29] sm:$0xff] }
 0x33b   : > { %12506 = vmatmul.mubr.msk.f32.vlgmr.msra.gmra.mrb[0].mxu1 %vm350_vm0, %v1002_v43  ;;  %v15506_v43 = vld [vmem:[#allocation2 + $0x49] sm:$0xff] }
 0x33c   : > { %12578 = vmatpush3.msra.mxu1 %v10659_v7  ;;  %12508 = vmatprep.mubr.msk.f32.mxu1 %vm350_vm0, %v1003_v42  ;;  %v15498_v7 = vld [vmem:[#allocation2 + $0x39] sm:$0xff]  ;;  %v15500_v42 = vld [vmem:[#allocation2 + $0x41] sm:$0xff] }
 0x33d   : > { %12651 = vmatprep.subr.mxu1 %v15477_v46 }
 0x33f   : > { %12509 = vmatmul.mubr.msk.f32.gmra.mrb[2].mxu1 %vm350_vm0, %v15481_v45 }
 0x340   : > { %12511 = vmatprep.mubr.msk.f32.mxu1 %vm350_vm0, %v15483_v44 }
 0x343   : > { %12512 = vmatmul.mubr.msk.f32.gmra.mrb[4].mxu1 %vm350_vm0, %v15490_v49 }
 0x344   : > { %12514 = vmatprep.mubr.msk.f32.mxu1 %vm350_vm0, %v15492_v48 }
 0x347   : > { %12515 = vmatmul.mubr.msk.f32.gmra.mrb[6].mxu1 %vm350_vm0, %v15498_v7 }
 0x348   : > { %12517 = vmatprep.mubr.msk.f32.mxu1 %vm350_vm0, %v15500_v42 }
 0x34b   : > { %12518 = vmatmul.mubr.msk.f32.gmra.mrb[8].mxu1 %vm350_vm0, %v15506_v43 }
 0x34c   : > { %12520 = vmatprep.mubr.msk.f32.mxu1 %vm350_vm0, %v15508_v47 }
 0x34f   : > { %12521 = vmatmul.mubr.msk.f32.gmra.mrb[10].mxu1 %vm350_vm0, %v15514_v50 }
 0x350   : > { %12523 = vmatprep.mubr.msk.f32.mxu1 %vm350_vm0, %v15516_v51 }
 0x353   : > { %12524 = vmatmul.mubr.msk.f32.gmra.mrb[12].mxu1 %vm350_vm0, %v15522_v56 }
 0x354   : > { %12526 = vmatprep.mubr.msk.f32.mxu1 %vm350_vm0, %v15524_v57 }
 0x357   : > { %12527 = vmatmul.mubr.msk.f32.gmra.mrb[14].mxu1 %vm350_vm0, %v15530_v60 }
 0x358   : > { %12529 = vmatprep.mubr.msk.f32.mxu1 %vm350_vm0, %v15532_v61 }
 0x35b   : > { %12530 = vmatmul.mubr.msk.f32.gmra.mrb[16].mxu1 %vm350_vm0, %v15538_v1 }
 0x35c   : > { %12532 = vmatprep.mubr.msk.f32.mxu1 %vm350_vm0, %v15540_v11 }
 0x35f   : > { %12533 = vmatmul.mubr.msk.f32.gmra.mrb[18].mxu1 %vm350_vm0, %v15546_v19 }
 0x360   : > { %12535 = vmatprep.mubr.msk.f32.mxu1 %vm350_vm0, %v15548_v18 }
 0x363   : > { %12536 = vmatmul.mubr.msk.f32.gmra.mrb[20].mxu1 %vm350_vm0, %v15554_v3 }
 0x364   : > { %12538 = vmatprep.mubr.msk.f32.mxu1 %vm350_vm0, %v15556_v22 }
 0x367   : > { %12539 = vmatmul.mubr.msk.f32.gmra.mrb[22].mxu1 %vm350_vm0, %v15562_v17 }
 0x368   : > { %12541 = vmatprep.mubr.msk.f32.mxu1 %vm350_vm0, %v15564_v27 }
 0x36b   : > { %12542 = vmatmul.mubr.msk.f32.gmra.mrb[24].mxu1 %vm350_vm0, %v15570_v13 }
 0x36c   : > { %12544 = vmatprep.mubr.msk.f32.mxu1 %vm350_vm0, %v15572_v5 }
 0x36f   : > { %12545 = vmatmul.mubr.msk.f32.gmra.mrb[26].mxu1 %vm350_vm0, %v15578_v30 }
 0x370   : > { %12547 = vmatprep.mubr.msk.f32.mxu1 %vm350_vm0, %v15580_v9 }
 0x373   : > { %12548 = vmatmul.mubr.msk.f32.gmra.mrb[28].mxu1 %vm350_vm0, %v15586_v37 }
 0x374   : > { %12550 = vmatprep.mubr.msk.f32.mxu1 %vm350_vm0, %v15588_v28 }
 0x377   : > { %12551 = vmatmul.mubr.msk.f32.gmra.mrb[30].mxu1 %vm350_vm0, %v15594_v12 }
 0x378   : > { %12553 = vmatprep.mubr.msk.f32.mxu1 %vm350_vm0, %v15596_v38 }
 0x37b   : > { %12554 = vmatmul.mubr.msk.f32.gmra.mrb[32].mxu1 %vm350_vm0, %v15602_v33 }
 0x37c   : > { %12556 = vmatprep.mubr.msk.f32.mxu1 %vm350_vm0, %v15604_v41 }
 0x37f   : > { %12557 = vmatmul.mubr.msk.f32.gmra.mrb[34].mxu1 %vm350_vm0, %v15610_v8 }
 0x380   : > { %12559 = vmatprep.mubr.msk.f32.mxu1 %vm350_vm0, %v15612_v39 }
 0x383   : > { %12560 = vmatmul.mubr.msk.f32.gmra.mrb[36].mxu1 %vm350_vm0, %v15618_v34 }
 0x384   : > { %12562 = vmatprep.mubr.msk.f32.mxu1 %vm350_vm0, %v15620_v31 }
 0x387   : > { %12563 = vmatmul.mubr.msk.f32.gmra.mrb[38].mxu1 %vm350_vm0, %v15626_v21 }
 0x388   : > { %12565 = vmatprep.mubr.msk.f32.mxu1 %vm350_vm0, %v15628_v16 }
 0x38b   : > { %12566 = vmatmul.mubr.msk.f32.gmra.mrb[40].mxu1 %vm350_vm0, %v15634_v14 }
 0x38c   : > { %12568 = vmatprep.mubr.msk.f32.mxu1 %vm350_vm0, %v15636_v24 }
 0x38f   : > { %12569 = vmatmul.mubr.msk.f32.gmra.mrb[42].mxu1 %vm350_vm0, %v15642_v0 }
 0x390   : > { %12571 = vmatprep.mubr.msk.f32.mxu1 %vm350_vm0, %v15644_v59 }
 0x393   : > { %12572 = vmatmul.mubr.msk.f32.gmra.mrb[44].mxu1 %vm350_vm0, %v15650_v58 }
 0x394   : > { %12574 = vmatprep.mubr.msk.f32.mxu1 %vm350_vm0, %v15652_v55 }
 0x397   : > { %12575 = vmatmul.mubr.msk.f32.gmra.mrb[46].mxu1 %vm350_vm0, %v15658_v4 }
 0x398   : > { %12579 = vmatprep.mubr.msk.f32.mxu1 %vm350_vm0, %v15481_v45  ;;  %v15764_v45 = vld [vmem:[#allocation2 + $0x191] sm:$0xff] }
 0x39b   : > { %12580 = vmatmul.mubr.msk.f32.vlgmr.msra.gmra.mrb[0].mxu1 %vm350_vm0, %v15483_v44  ;;  %v15758_v44 = vld [vmem:[#allocation2 + $0x189] sm:$0xff] }
 0x39c   : > { %12652 = vmatpush3.msra.mxu1 %v15477_v46  ;;  %12582 = vmatprep.mubr.msk.f32.mxu1 %vm350_vm0, %v15490_v49  ;;  %v15756_v46 = vld [vmem:[#allocation2 + $0x181] sm:$0xff] }
 0x39d   : > { %12725 = vmatprep.subr.mxu1 %v10757_v54  ;;  %v14396_v49 = vld [vmem:[#allocation2 + $0x1a] sm:$0xff] }
 0x39f   : > { %12583 = vmatmul.mubr.msk.f32.gmra.mrb[2].mxu1 %vm350_vm0, %v15492_v48 }
 0x3a0   : > { %12585 = vmatprep.mubr.msk.f32.mxu1 %vm350_vm0, %v15498_v7 }
 0x3a3   : > { %12586 = vmatmul.mubr.msk.f32.gmra.mrb[4].mxu1 %vm350_vm0, %v15500_v42 }
 0x3a4   : > { %12588 = vmatprep.mubr.msk.f32.mxu1 %vm350_vm0, %v15506_v43 }
 0x3a7   : > { %12589 = vmatmul.mubr.msk.f32.gmra.mrb[6].mxu1 %vm350_vm0, %v15508_v47 }
 0x3a8   : > { %12591 = vmatprep.mubr.msk.f32.mxu1 %vm350_vm0, %v15514_v50 }
 0x3ab   : > { %12592 = vmatmul.mubr.msk.f32.gmra.mrb[8].mxu1 %vm350_vm0, %v15516_v51 }
 0x3ac   : > { %12594 = vmatprep.mubr.msk.f32.mxu1 %vm350_vm0, %v15522_v56 }
 0x3af   : > { %12595 = vmatmul.mubr.msk.f32.gmra.mrb[10].mxu1 %vm350_vm0, %v15524_v57 }
 0x3b0   : > { %12597 = vmatprep.mubr.msk.f32.mxu1 %vm350_vm0, %v15530_v60 }
 0x3b3   : > { %12598 = vmatmul.mubr.msk.f32.gmra.mrb[12].mxu1 %vm350_vm0, %v15532_v61 }
 0x3b4   : > { %12600 = vmatprep.mubr.msk.f32.mxu1 %vm350_vm0, %v15538_v1 }
 0x3b7   : > { %12601 = vmatmul.mubr.msk.f32.gmra.mrb[14].mxu1 %vm350_vm0, %v15540_v11 }
 0x3b8   : > { %12603 = vmatprep.mubr.msk.f32.mxu1 %vm350_vm0, %v15546_v19 }
 0x3bb   : > { %12604 = vmatmul.mubr.msk.f32.gmra.mrb[16].mxu1 %vm350_vm0, %v15548_v18 }
 0x3bc   : > { %12606 = vmatprep.mubr.msk.f32.mxu1 %vm350_vm0, %v15554_v3 }
 0x3bf   : > { %12607 = vmatmul.mubr.msk.f32.gmra.mrb[18].mxu1 %vm350_vm0, %v15556_v22 }
 0x3c0   : > { %12609 = vmatprep.mubr.msk.f32.mxu1 %vm350_vm0, %v15562_v17 }
 0x3c3   : > { %12610 = vmatmul.mubr.msk.f32.gmra.mrb[20].mxu1 %vm350_vm0, %v15564_v27 }
 0x3c4   : > { %12612 = vmatprep.mubr.msk.f32.mxu1 %vm350_vm0, %v15570_v13 }
 0x3c7   : > { %12613 = vmatmul.mubr.msk.f32.gmra.mrb[22].mxu1 %vm350_vm0, %v15572_v5 }
 0x3c8   : > { %12615 = vmatprep.mubr.msk.f32.mxu1 %vm350_vm0, %v15578_v30 }
 0x3cb   : > { %12616 = vmatmul.mubr.msk.f32.gmra.mrb[24].mxu1 %vm350_vm0, %v15580_v9 }
 0x3cc   : > { %12618 = vmatprep.mubr.msk.f32.mxu1 %vm350_vm0, %v15586_v37 }
 0x3cf   : > { %12619 = vmatmul.mubr.msk.f32.gmra.mrb[26].mxu1 %vm350_vm0, %v15588_v28 }
 0x3d0   : > { %12621 = vmatprep.mubr.msk.f32.mxu1 %vm350_vm0, %v15594_v12 }
 0x3d3   : > { %12622 = vmatmul.mubr.msk.f32.gmra.mrb[28].mxu1 %vm350_vm0, %v15596_v38 }
 0x3d4   : > { %12624 = vmatprep.mubr.msk.f32.mxu1 %vm350_vm0, %v15602_v33 }
 0x3d7   : > { %12625 = vmatmul.mubr.msk.f32.gmra.mrb[30].mxu1 %vm350_vm0, %v15604_v41 }
 0x3d8   : > { %12627 = vmatprep.mubr.msk.f32.mxu1 %vm350_vm0, %v15610_v8 }
 0x3db   : > { %12628 = vmatmul.mubr.msk.f32.gmra.mrb[32].mxu1 %vm350_vm0, %v15612_v39 }
 0x3dc   : > { %12630 = vmatprep.mubr.msk.f32.mxu1 %vm350_vm0, %v15618_v34 }
 0x3df   : > { %12631 = vmatmul.mubr.msk.f32.gmra.mrb[34].mxu1 %vm350_vm0, %v15620_v31 }
 0x3e0   : > { %12633 = vmatprep.mubr.msk.f32.mxu1 %vm350_vm0, %v15626_v21 }
 0x3e3   : > { %12634 = vmatmul.mubr.msk.f32.gmra.mrb[36].mxu1 %vm350_vm0, %v15628_v16 }
 0x3e4   : > { %12636 = vmatprep.mubr.msk.f32.mxu1 %vm350_vm0, %v15634_v14 }
 0x3e7   : > { %12637 = vmatmul.mubr.msk.f32.gmra.mrb[38].mxu1 %vm350_vm0, %v15636_v24 }
 0x3e8   : > { %12639 = vmatprep.mubr.msk.f32.mxu1 %vm350_vm0, %v15642_v0 }
 0x3eb   : > { %12640 = vmatmul.mubr.msk.f32.gmra.mrb[40].mxu1 %vm350_vm0, %v15644_v59 }
 0x3ec   : > { %12642 = vmatprep.mubr.msk.f32.mxu1 %vm350_vm0, %v15650_v58 }
 0x3ef   : > { %12643 = vmatmul.mubr.msk.f32.gmra.mrb[42].mxu1 %vm350_vm0, %v15652_v55  ;;  %v14397_v55 = vld [vmem:[#allocation2 + $0x22] sm:$0xff] }
 0x3f0   : > { %12645 = vmatprep.mubr.msk.f32.mxu1 %vm350_vm0, %v15658_v4  ;;  %v10806_v4 = vld [vmem:[%s17509_s3 + $0x38] sm:$0xff] }
 0x3f3   : > { %12646 = vmatmul.mubr.msk.f32.gmra.mrb[44].mxu1 %vm350_vm0, %v15756_v46 }
 0x3f4   : > { %12648 = vmatprep.mubr.msk.f32.mxu1 %vm350_vm0, %v15758_v44 }
 0x3f7   : > { %12649 = vmatmul.mubr.msk.f32.gmra.mrb[46].mxu1 %vm350_vm0, %v15764_v45 }
 0x3f8   : > { %12653 = vmatprep.mubr.msk.f32.mxu1 %vm350_vm0, %v14396_v49  ;;  %v17750_v49 = vld [vmem:[#allocation23_spill] sm:$0xff] }
 0x3fb   : > { %12654 = vmatmul.mubr.msk.f32.vlgmr.msra.gmra.mrb[0].mxu1 %vm350_vm0, %v14397_v55  ;;  %v17749_v55 = vld [vmem:[#allocation22_spill] sm:$0xff] }
 0x3fc   : > { %12726 = vmatpush3.msra.mxu1 %v10757_v54  ;;  %12656 = vmatprep.mubr.msk.f32.mxu1 %vm350_vm0, %v14922_v52  ;;  %v17731_v52 = vld [vmem:[#allocation4_spill] sm:$0xff]  ;;  %v17748_v54 = vld [vmem:[#allocation21_spill] sm:$0xff] }
 0x3fd   : > { %12799 = vmatprep.subr.mxu1 %v10806_v4 }
 0x3ff   : > { %12657 = vmatmul.mubr.msk.f32.gmra.mrb[2].mxu1 %vm350_vm0, %v14924_v25  ;;  %v17732_v25 = vld [vmem:[#allocation5_spill] sm:$0xff] }
 0x400   : > { %12659 = vmatprep.mubr.msk.f32.mxu1 %vm350_vm0, %v14932_v53  ;;  %v17733_v53 = vld [vmem:[#allocation6_spill] sm:$0xff] }
 0x403   : > { %12660 = vmatmul.mubr.msk.f32.gmra.mrb[4].mxu1 %vm350_vm0, %v14944_v62  ;;  %v17734_v62 = vld [vmem:[#allocation7_spill] sm:$0xff] }
 0x404   : > { %12662 = vmatprep.mubr.msk.f32.mxu1 %vm350_vm0, %v14946_v63  ;;  %v17735_v63 = vld [vmem:[#allocation8_spill] sm:$0xff] }
 0x407   : > { %12663 = vmatmul.mubr.msk.f32.gmra.mrb[6].mxu1 %vm350_vm0, %v14948_v23  ;;  %v17736_v23 = vld [vmem:[#allocation9_spill] sm:$0xff] }
 0x408   : > { %12665 = vmatprep.mubr.msk.f32.mxu1 %vm350_vm0, %v14960_v2  ;;  %v17737_v2 = vld [vmem:[#allocation10_spill] sm:$0xff] }
 0x40b   : > { %12666 = vmatmul.mubr.msk.f32.gmra.mrb[8].mxu1 %vm350_vm0, %v14971_v10  ;;  %v17738_v10 = vld [vmem:[#allocation11_spill] sm:$0xff] }
 0x40c   : > { %12668 = vmatprep.mubr.msk.f32.mxu1 %vm350_vm0, %v14975_v6  ;;  %v17739_v6 = vld [vmem:[#allocation12_spill] sm:$0xff] }
 0x40f   : > { %12669 = vmatmul.mubr.msk.f32.gmra.mrb[10].mxu1 %vm350_vm0, %v14992_v26  ;;  %v17740_v26 = vld [vmem:[#allocation13_spill] sm:$0xff] }
 0x410   : > { %12671 = vmatprep.mubr.msk.f32.mxu1 %vm350_vm0, %v14996_v15  ;;  %v17741_v15 = vld [vmem:[#allocation14_spill] sm:$0xff] }
 0x413   : > { %12672 = vmatmul.mubr.msk.f32.gmra.mrb[12].mxu1 %vm350_vm0, %v14999_v29  ;;  %v17742_v29 = vld [vmem:[#allocation15_spill] sm:$0xff] }
 0x414   : > { %12674 = vmatprep.mubr.msk.f32.mxu1 %vm350_vm0, %v15010_v32  ;;  %v17743_v32 = vld [vmem:[#allocation16_spill] sm:$0xff] }
 0x417   : > { %12675 = vmatmul.mubr.msk.f32.gmra.mrb[14].mxu1 %vm350_vm0, %v15020_v20  ;;  %v17744_v20 = vld [vmem:[#allocation17_spill] sm:$0xff] }
 0x418   : > { %12677 = vmatprep.mubr.msk.f32.mxu1 %vm350_vm0, %v15022_v35  ;;  %v17745_v35 = vld [vmem:[#allocation18_spill] sm:$0xff] }
 0x41b   : > { %12678 = vmatmul.mubr.msk.f32.gmra.mrb[16].mxu1 %vm350_vm0, %v15024_v36  ;;  %v17746_v36 = vld [vmem:[#allocation19_spill] sm:$0xff] }
 0x41c   : > { %12680 = vmatprep.mubr.msk.f32.mxu1 %vm350_vm0, %v15038_v40  ;;  %v17747_v40 = vld [vmem:[#allocation20_spill] sm:$0xff] }
 0x41f   : > { %12681 = vmatmul.mubr.msk.f32.gmra.mrb[18].mxu1 %vm350_vm0, %v17731_v52  ;;  %v17751_v52 = vld [vmem:[#allocation24_spill] sm:$0xff] }
 0x420   : > { %12683 = vmatprep.mubr.msk.f32.mxu1 %vm350_vm0, %v17732_v25  ;;  %v17752_v25 = vld [vmem:[#allocation25_spill] sm:$0xff] }
 0x423   : > { %12684 = vmatmul.mubr.msk.f32.gmra.mrb[20].mxu1 %vm350_vm0, %v17733_v53  ;;  %v17753_v53 = vld [vmem:[#allocation26_spill] sm:$0xff] }
 0x424   : > { %12686 = vmatprep.mubr.msk.f32.mxu1 %vm350_vm0, %v17734_v62  ;;  %v17754_v62 = vld [vmem:[#allocation27_spill] sm:$0xff] }
 0x427   : > { %12687 = vmatmul.mubr.msk.f32.gmra.mrb[22].mxu1 %vm350_vm0, %v17735_v63  ;;  %v17755_v63 = vld [vmem:[#allocation28_spill] sm:$0xff] }
 0x428   : > { %12689 = vmatprep.mubr.msk.f32.mxu1 %vm350_vm0, %v17736_v23  ;;  %v17756_v23 = vld [vmem:[#allocation29_spill] sm:$0xff] }
 0x42b   : > { %12690 = vmatmul.mubr.msk.f32.gmra.mrb[24].mxu1 %vm350_vm0, %v17737_v2  ;;  %v15859_v2 = vld [vmem:[#allocation2 + $0x182] sm:$0xff] }
 0x42c   : > { %12692 = vmatprep.mubr.msk.f32.mxu1 %vm350_vm0, %v17738_v10  ;;  %v15861_v10 = vld [vmem:[#allocation2 + $0x18a] sm:$0xff] }
 0x42f   : > { %12693 = vmatmul.mubr.msk.f32.gmra.mrb[26].mxu1 %vm350_vm0, %v17739_v6  ;;  %v15867_v6 = vld [vmem:[#allocation2 + $0x192] sm:$0xff] }
 0x430   : > { %12695 = vmatprep.mubr.msk.f32.mxu1 %vm350_vm0, %v17740_v26  ;;  %v17757_v26 = vld [vmem:[#allocation30_spill] sm:$0xff] }
 0x433   : > { %12696 = vmatmul.mubr.msk.f32.gmra.mrb[28].mxu1 %vm350_vm0, %v17741_v15  ;;  %v10855_v15 = vld [vmem:[%s17509_s3 + $0x40] sm:$0xff] }
 0x434   : > { %12698 = vmatprep.mubr.msk.f32.mxu1 %vm350_vm0, %v17742_v29  ;;  %v17758_v29 = vld [vmem:[#allocation31_spill] sm:$0xff] }
 0x437   : > { %12699 = vmatmul.mubr.msk.f32.gmra.mrb[30].mxu1 %vm350_vm0, %v17743_v32  ;;  %v17759_v32 = vld [vmem:[#allocation32_spill] sm:$0xff] }
 0x438   : > { %12701 = vmatprep.mubr.msk.f32.mxu1 %vm350_vm0, %v17744_v20  ;;  %v17760_v20 = vld [vmem:[#allocation33_spill] sm:$0xff] }
 0x43b   : > { %12702 = vmatmul.mubr.msk.f32.gmra.mrb[32].mxu1 %vm350_vm0, %v17745_v35  ;;  %v17761_v35 = vld [vmem:[#allocation34_spill] sm:$0xff] }
 0x43c   : > { %12704 = vmatprep.mubr.msk.f32.mxu1 %vm350_vm0, %v17746_v36  ;;  %v17762_v36 = vld [vmem:[#allocation35_spill] sm:$0xff] }
 0x43f   : > { %12705 = vmatmul.mubr.msk.f32.gmra.mrb[34].mxu1 %vm350_vm0, %v17747_v40  ;;  %v17763_v40 = vld [vmem:[#allocation36_spill] sm:$0xff] }
 0x440   : > { %12707 = vmatprep.mubr.msk.f32.mxu1 %vm350_vm0, %v17748_v54  ;;  %v17764_v54 = vld [vmem:[#allocation37_spill] sm:$0xff] }
 0x443   : > { %12708 = vmatmul.mubr.msk.f32.gmra.mrb[36].mxu1 %vm350_vm0, %v17749_v55  ;;  %v17766_v55 = vld [vmem:[#allocation39_spill] sm:$0xff] }
 0x444   : > { %12710 = vmatprep.mubr.msk.f32.mxu1 %vm350_vm0, %v17750_v49  ;;  %v17767_v49 = vld [vmem:[#allocation40_spill] sm:$0xff] }
 0x447   : > { %12711 = vmatmul.mubr.msk.f32.gmra.mrb[38].mxu1 %vm350_vm0, %v17751_v52  ;;  %v17768_v52 = vld [vmem:[#allocation41_spill] sm:$0xff] }
 0x448   : > { %12713 = vmatprep.mubr.msk.f32.mxu1 %vm350_vm0, %v17752_v25  ;;  %v17769_v25 = vld [vmem:[#allocation42_spill] sm:$0xff] }
 0x44b   : > { %12714 = vmatmul.mubr.msk.f32.gmra.mrb[40].mxu1 %vm350_vm0, %v17753_v53  ;;  %v17770_v53 = vld [vmem:[#allocation43_spill] sm:$0xff] }
 0x44c   : > { %12716 = vmatprep.mubr.msk.f32.mxu1 %vm350_vm0, %v17754_v62  ;;  %v17771_v62 = vld [vmem:[#allocation44_spill] sm:$0xff] }
 0x44f   : > { %12717 = vmatmul.mubr.msk.f32.gmra.mrb[42].mxu1 %vm350_vm0, %v17755_v63  ;;  %v17772_v63 = vld [vmem:[#allocation45_spill] sm:$0xff] }
 0x450   : > { %12719 = vmatprep.mubr.msk.f32.mxu1 %vm350_vm0, %v17756_v23  ;;  %v17773_v23 = vld [vmem:[#allocation46_spill] sm:$0xff] }
 0x453   : > { %12720 = vmatmul.mubr.msk.f32.gmra.mrb[44].mxu1 %vm350_vm0, %v15859_v2 }
 0x454   : > { %12722 = vmatprep.mubr.msk.f32.mxu1 %vm350_vm0, %v15861_v10 }
 0x457   : > { %12723 = vmatmul.mubr.msk.f32.gmra.mrb[46].mxu1 %vm350_vm0, %v15867_v6 }
 0x458   : > { %12727 = vmatprep.mubr.msk.f32.mxu1 %vm350_vm0, %v17757_v26  ;;  %v17774_v26 = vld [vmem:[#allocation47_spill] sm:$0xff] }
 0x45b   : > { %12728 = vmatmul.mubr.msk.f32.vlgmr.msra.gmra.mrb[0].mxu1 %vm350_vm0, %v17758_v29  ;;  %v17775_v29 = vld [vmem:[#allocation48_spill] sm:$0xff] }
 0x45c   : > { %12800 = vmatpush3.msra.mxu1 %v10806_v4  ;;  %12730 = vmatprep.mubr.msk.f32.mxu1 %vm350_vm0, %v17759_v32  ;;  %v17765_v4 = vld [vmem:[#allocation38_spill] sm:$0xff]  ;;  %v17776_v32 = vld [vmem:[#allocation49_spill] sm:$0xff] }
 0x45d   : > { %12873 = vmatprep.subr.mxu1 %v10855_v15 }
 0x45f   : > { %12731 = vmatmul.mubr.msk.f32.gmra.mrb[2].mxu1 %vm350_vm0, %v17760_v20  ;;  %v17777_v20 = vld [vmem:[#allocation50_spill] sm:$0xff] }
 0x460   : > { %12733 = vmatprep.mubr.msk.f32.mxu1 %vm350_vm0, %v17761_v35  ;;  %v17778_v35 = vld [vmem:[#allocation51_spill] sm:$0xff] }
 0x463   : > { %12734 = vmatmul.mubr.msk.f32.gmra.mrb[4].mxu1 %vm350_vm0, %v17762_v36  ;;  %v17779_v36 = vld [vmem:[#allocation52_spill] sm:$0xff] }
 0x464   : > { %12736 = vmatprep.mubr.msk.f32.mxu1 %vm350_vm0, %v17763_v40  ;;  %v17780_v40 = vld [vmem:[#allocation53_spill] sm:$0xff] }
 0x467   : > { %12737 = vmatmul.mubr.msk.f32.gmra.mrb[6].mxu1 %vm350_vm0, %v17764_v54  ;;  %v17781_v54 = vld [vmem:[#allocation54_spill] sm:$0xff] }
 0x468   : > { %12739 = vmatprep.mubr.msk.f32.mxu1 %vm350_vm0, %v17765_v4  ;;  %v17782_v4 = vld [vmem:[#allocation55_spill] sm:$0xff] }
 0x46b   : > { %12740 = vmatmul.mubr.msk.f32.gmra.mrb[8].mxu1 %vm350_vm0, %v17766_v55  ;;  %v17783_v55 = vld [vmem:[#allocation56_spill] sm:$0xff] }
 0x46c   : > { %12742 = vmatprep.mubr.msk.f32.mxu1 %vm350_vm0, %v17767_v49  ;;  %v17784_v49 = vld [vmem:[#allocation57_spill] sm:$0xff] }
 0x46f   : > { %12743 = vmatmul.mubr.msk.f32.gmra.mrb[10].mxu1 %vm350_vm0, %v17768_v52  ;;  %v17785_v52 = vld [vmem:[#allocation58_spill] sm:$0xff] }
 0x470   : > { %12745 = vmatprep.mubr.msk.f32.mxu1 %vm350_vm0, %v17769_v25  ;;  %v17786_v25 = vld [vmem:[#allocation59_spill] sm:$0xff] }
 0x473   : > { %12746 = vmatmul.mubr.msk.f32.gmra.mrb[12].mxu1 %vm350_vm0, %v17770_v53  ;;  %v17787_v53 = vld [vmem:[#allocation60_spill] sm:$0xff] }
 0x474   : > { %12748 = vmatprep.mubr.msk.f32.mxu1 %vm350_vm0, %v17771_v62  ;;  %v17788_v62 = vld [vmem:[#allocation61_spill] sm:$0xff] }
 0x477   : > { %12749 = vmatmul.mubr.msk.f32.gmra.mrb[14].mxu1 %vm350_vm0, %v17772_v63  ;;  %v17789_v63 = vld [vmem:[#allocation62_spill] sm:$0xff] }
 0x478   : > { %12751 = vmatprep.mubr.msk.f32.mxu1 %vm350_vm0, %v17773_v23  ;;  %v17790_v23 = vld [vmem:[#allocation63_spill] sm:$0xff] }
 0x47b   : > { %12752 = vmatmul.mubr.msk.f32.gmra.mrb[16].mxu1 %vm350_vm0, %v17774_v26  ;;  %v17791_v26 = vld [vmem:[#allocation64_spill] sm:$0xff] }
 0x47c   : > { %12754 = vmatprep.mubr.msk.f32.mxu1 %vm350_vm0, %v17775_v29  ;;  %v17792_v29 = vld [vmem:[#allocation65_spill] sm:$0xff] }
 0x47f   : > { %12755 = vmatmul.mubr.msk.f32.gmra.mrb[18].mxu1 %vm350_vm0, %v17776_v32  ;;  %v17793_v32 = vld [vmem:[#allocation66_spill] sm:$0xff] }
 0x480   : > { %12757 = vmatprep.mubr.msk.f32.mxu1 %vm350_vm0, %v17777_v20  ;;  %v17794_v20 = vld [vmem:[#allocation67_spill] sm:$0xff] }
 0x483   : > { %12758 = vmatmul.mubr.msk.f32.gmra.mrb[20].mxu1 %vm350_vm0, %v17778_v35  ;;  %v17795_v35 = vld [vmem:[#allocation68_spill] sm:$0xff] }
 0x484   : > { %12760 = vmatprep.mubr.msk.f32.mxu1 %vm350_vm0, %v17779_v36  ;;  %v17796_v36 = vld [vmem:[#allocation69_spill] sm:$0xff] }
 0x487   : > { %12761 = vmatmul.mubr.msk.f32.gmra.mrb[22].mxu1 %vm350_vm0, %v17780_v40  ;;  %v17797_v40 = vld [vmem:[#allocation70_spill] sm:$0xff] }
 0x488   : > { %12763 = vmatprep.mubr.msk.f32.mxu1 %vm350_vm0, %v17781_v54  ;;  %v17798_v54 = vld [vmem:[#allocation71_spill] sm:$0xff] }
 0x48b   : > { %12764 = vmatmul.mubr.msk.f32.gmra.mrb[24].mxu1 %vm350_vm0, %v17782_v4  ;;  %v17799_v4 = vld [vmem:[#allocation72_spill] sm:$0xff] }
 0x48c   : > { %12766 = vmatprep.mubr.msk.f32.mxu1 %vm350_vm0, %v17783_v55  ;;  %v17800_v55 = vld [vmem:[#allocation73_spill] sm:$0xff] }
 0x48f   : > { %12767 = vmatmul.mubr.msk.f32.gmra.mrb[26].mxu1 %vm350_vm0, %v17784_v49  ;;  %v17801_v49 = vld [vmem:[#allocation74_spill] sm:$0xff] }
 0x490   : > { %12769 = vmatprep.mubr.msk.f32.mxu1 %vm350_vm0, %v17785_v52  ;;  %v3958_v52 = vld [vmem:[#allocation2 + $0x198] sm:$0xff] }
 0x493   : > { %12770 = vmatmul.mubr.msk.f32.gmra.mrb[28].mxu1 %vm350_vm0, %v17786_v25  ;;  %v3959_v25 = vld [vmem:[#allocation2 + $0x1a0] sm:$0xff] }
 0x494   : > { %12772 = vmatprep.mubr.msk.f32.mxu1 %vm350_vm0, %v17787_v53  ;;  %v3960_v53 = vld [vmem:[#allocation2 + $0x1a8] sm:$0xff] }
 0x497   : > { %12773 = vmatmul.mubr.msk.f32.gmra.mrb[30].mxu1 %vm350_vm0, %v17788_v62  ;;  %v4982_v62 = vld [vmem:[#allocation2 + $0x16a] sm:$0xff] }
 0x498   : > { %12775 = vmatprep.mubr.msk.f32.mxu1 %vm350_vm0, %v17789_v63  ;;  %v4983_v63 = vld [vmem:[#allocation2 + $0x172] sm:$0xff] }
 0x49b   : > { %12776 = vmatmul.mubr.msk.f32.gmra.mrb[32].mxu1 %vm350_vm0, %v17790_v23  ;;  %v4984_v23 = vld [vmem:[#allocation2 + $0x17a] sm:$0xff] }
 0x49c   : > { %12778 = vmatprep.mubr.msk.f32.mxu1 %vm350_vm0, %v17791_v26  ;;  %v4988_v26 = vld [vmem:[#allocation2 + $0x19a] sm:$0xff] }
 0x49f   : > { %12779 = vmatmul.mubr.msk.f32.gmra.mrb[34].mxu1 %vm350_vm0, %v17792_v29  ;;  %v4989_v29 = vld [vmem:[#allocation2 + $0x1a2] sm:$0xff] }
 0x4a0   : > { %12781 = vmatprep.mubr.msk.f32.mxu1 %vm350_vm0, %v17793_v32  ;;  %v4990_v32 = vld [vmem:[#allocation2 + $0x1aa] sm:$0xff] }
 0x4a3   : > { %12782 = vmatmul.mubr.msk.f32.gmra.mrb[36].mxu1 %vm350_vm0, %v17794_v20  ;;  %v10907_v20 = vld [vmem:[%s17510_s4 + $0x8] sm:$0xf] }
 0x4a4   : > { %12784 = vmatprep.mubr.msk.f32.mxu1 %vm350_vm0, %v17795_v35  ;;  %12947 = vmatprep.subr.msk.mxu0 %vm5925_vm3, %v10907_v20  ;;  %v16126_v35 = vld [vmem:[%s17510_s4 + $0xc] sm:$0xf] }
 0x4a5   : > { %12948 = vmatpush3.msk.msra.mxu0 %vm5925_vm3, %v10907_v20 }
 0x4a7   : > { %12785 = vmatmul.mubr.msk.f32.gmra.mrb[38].mxu1 %vm350_vm0, %v17796_v36  ;;  %v16133_v36 = vld [vmem:[%s17511_s5] ss:$0 sm:$0xff] }
 0x4a8   : > { %12787 = vmatprep.mubr.msk.f32.mxu1 %vm350_vm0, %v17797_v40 }
 0x4ab   : > { %12788 = vmatmul.mubr.msk.f32.gmra.mrb[40].mxu1 %vm350_vm0, %v17798_v54  ;;  %v16138_v54 = vld [vmem:[%s17512_s6] ss:$0 sm:$0xff] }
 0x4ac   : > { %12790 = vmatprep.mubr.msk.f32.mxu1 %vm350_vm0, %v17799_v4 }
 0x4af   : > { %12791 = vmatmul.mubr.msk.f32.gmra.mrb[42].mxu1 %vm350_vm0, %v17800_v55 }
 0x4b0   : > { %12793 = vmatprep.mubr.msk.f32.mxu1 %vm350_vm0, %v17801_v49 }
 0x4b3   : > { %12794 = vmatmul.mubr.msk.f32.gmra.mrb[44].mxu1 %vm350_vm0, %v3958_v52 }
 0x4b4   : > { %12796 = vmatprep.mubr.msk.f32.mxu1 %vm350_vm0, %v3959_v25 }
 0x4b7   : > { %12797 = vmatmul.mubr.msk.f32.gmra.mrb[46].mxu1 %vm350_vm0, %v3960_v53 }
 0x4b8   : > { %12801 = vmatprep.mubr.msk.f32.mxu1 %vm350_vm0, %v15492_v48  ;;  %v4974_v48 = vld [vmem:[#allocation2 + $0x12a] sm:$0xff] }
 0x4bb   : > { %12802 = vmatmul.mubr.msk.f32.vlgmr.msra.gmra.mrb[0].mxu1 %vm350_vm0, %v15498_v7  ;;  %v4975_v7 = vld [vmem:[#allocation2 + $0x132] sm:$0xff] }
 0x4bc   : > { %12874 = vmatpush3.msra.mxu1 %v10855_v15  ;;  %12804 = vmatprep.mubr.msk.f32.mxu1 %vm350_vm0, %v15500_v42  ;;  %v4976_v42 = vld [vmem:[#allocation2 + $0x13a] sm:$0xff]  ;;  %v4981_v15 = vld [vmem:[#allocation2 + $0x162] sm:$0xff] }
 0x4bf   : > { %12805 = vmatmul.mubr.msk.f32.gmra.mrb[2].mxu1 %vm350_vm0, %v15506_v43  ;;  %v4977_v43 = vld [vmem:[#allocation2 + $0x142] sm:$0xff] }
 0x4c0   : > { %12807 = vmatprep.mubr.msk.f32.mxu1 %vm350_vm0, %v15508_v47  ;;  %v17802_v47 = vld [vmem:[#allocation75_spill] sm:$0xff] }
 0x4c3   : > { %12808 = vmatmul.mubr.msk.f32.gmra.mrb[4].mxu1 %vm350_vm0, %v15514_v50  ;;  %v17803_v50 = vld [vmem:[#allocation76_spill] sm:$0xff] }
 0x4c4   : > { %12810 = vmatprep.mubr.msk.f32.mxu1 %vm350_vm0, %v15516_v51  ;;  %v4473_v51 = vld [vmem:[#allocation2 + $0x199] sm:$0xff] }
 0x4c7   : > { %12811 = vmatmul.mubr.msk.f32.gmra.mrb[6].mxu1 %vm350_vm0, %v15522_v56  ;;  %v4474_v56 = vld [vmem:[#allocation2 + $0x1a1] sm:$0xff] }
 0x4c8   : > { %12813 = vmatprep.mubr.msk.f32.mxu1 %vm350_vm0, %v15524_v57  ;;  %v4475_v57 = vld [vmem:[#allocation2 + $0x1a9] sm:$0xff] }
 0x4cb   : > { %12814 = vmatmul.mubr.msk.f32.gmra.mrb[8].mxu1 %vm350_vm0, %v15530_v60  ;;  %v4943_v60 = vld [vmem:[#allocation2 + $0x32] sm:$0xff] }
 0x4cc   : > { %12816 = vmatprep.mubr.msk.f32.mxu1 %vm350_vm0, %v15532_v61  ;;  %v4944_v61 = vld [vmem:[#allocation2 + $0x3a] sm:$0xff] }
 0x4cf   : > { %12817 = vmatmul.mubr.msk.f32.gmra.mrb[10].mxu1 %vm350_vm0, %v15538_v1  ;;  %v4945_v1 = vld [vmem:[#allocation2 + $0x42] sm:$0xff] }
 0x4d0   : > { %12819 = vmatprep.mubr.msk.f32.mxu1 %vm350_vm0, %v15540_v11  ;;  %v4946_v11 = vld [vmem:[#allocation2 + $0x4a] sm:$0xff] }
 0x4d3   : > { %12820 = vmatmul.mubr.msk.f32.gmra.mrb[12].mxu1 %vm350_vm0, %v15546_v19  ;;  %v4947_v19 = vld [vmem:[#allocation2 + $0x52] sm:$0xff] }
 0x4d4   : > { %12822 = vmatprep.mubr.msk.f32.mxu1 %vm350_vm0, %v15548_v18  ;;  %v4948_v18 = vld [vmem:[#allocation2 + $0x5a] sm:$0xff] }
 0x4d7   : > { %12823 = vmatmul.mubr.msk.f32.gmra.mrb[14].mxu1 %vm350_vm0, %v15554_v3  ;;  %v4949_v3 = vld [vmem:[#allocation2 + $0x62] sm:$0xff] }
 0x4d8   : > { %12825 = vmatprep.mubr.msk.f32.mxu1 %vm350_vm0, %v15556_v22  ;;  %v4950_v22 = vld [vmem:[#allocation2 + $0x6a] sm:$0xff] }
 0x4db   : > { %12826 = vmatmul.mubr.msk.f32.gmra.mrb[16].mxu1 %vm350_vm0, %v15562_v17  ;;  %v4951_v17 = vld [vmem:[#allocation2 + $0x72] sm:$0xff] }
 0x4dc   : > { %12828 = vmatprep.mubr.msk.f32.mxu1 %vm350_vm0, %v15564_v27  ;;  %v4952_v27 = vld [vmem:[#allocation2 + $0x7a] sm:$0xff] }
 0x4df   : > { %12829 = vmatmul.mubr.msk.f32.gmra.mrb[18].mxu1 %vm350_vm0, %v15570_v13  ;;  %v4953_v13 = vld [vmem:[#allocation2 + $0x82] sm:$0xff] }
 0x4e0   : > { %12831 = vmatprep.mubr.msk.f32.mxu1 %vm350_vm0, %v15572_v5  ;;  %v4954_v5 = vld [vmem:[#allocation2 + $0x8a] sm:$0xff] }
 0x4e3   : > { %12832 = vmatmul.mubr.msk.f32.gmra.mrb[20].mxu1 %vm350_vm0, %v15578_v30  ;;  %v4955_v30 = vld [vmem:[#allocation2 + $0x92] sm:$0xff] }
 0x4e4   : > { %12834 = vmatprep.mubr.msk.f32.mxu1 %vm350_vm0, %v15580_v9  ;;  %v4956_v9 = vld [vmem:[#allocation2 + $0x9a] sm:$0xff] }
 0x4e7   : > { %12835 = vmatmul.mubr.msk.f32.gmra.mrb[22].mxu1 %vm350_vm0, %v15586_v37  ;;  %v4957_v37 = vld [vmem:[#allocation2 + $0xa2] sm:$0xff] }
 0x4e8   : > { %12837 = vmatprep.mubr.msk.f32.mxu1 %vm350_vm0, %v15588_v28  ;;  %v4958_v28 = vld [vmem:[#allocation2 + $0xaa] sm:$0xff] }
 0x4eb   : > { %12838 = vmatmul.mubr.msk.f32.gmra.mrb[24].mxu1 %vm350_vm0, %v15594_v12  ;;  %v4973_v12 = vld [vmem:[#allocation2 + $0x122] sm:$0xff] }
 0x4ec   : > { %12840 = vmatprep.mubr.msk.f32.mxu1 %vm350_vm0, %v15596_v38  ;;  %v4959_v38 = vld [vmem:[#allocation2 + $0xb2] sm:$0xff] }
 0x4ef   : > { %12841 = vmatmul.mubr.msk.f32.gmra.mrb[26].mxu1 %vm350_vm0, %v15602_v33  ;;  %v4972_v33 = vld [vmem:[#allocation2 + $0x11a] sm:$0xff] }
 0x4f0   : > { %12843 = vmatprep.mubr.msk.f32.mxu1 %vm350_vm0, %v15604_v41  ;;  %v4971_v41 = vld [vmem:[#allocation2 + $0x112] sm:$0xff] }
 0x4f3   : > { %12844 = vmatmul.mubr.msk.f32.gmra.mrb[28].mxu1 %vm350_vm0, %v15610_v8  ;;  %v4970_v8 = vld [vmem:[#allocation2 + $0x10a] sm:$0xff] }
 0x4f4   : > { %12846 = vmatprep.mubr.msk.f32.mxu1 %vm350_vm0, %v15612_v39  ;;  %v4969_v39 = vld [vmem:[#allocation2 + $0x102] sm:$0xff] }
 0x4f7   : > { %12847 = vmatmul.mubr.msk.f32.gmra.mrb[30].mxu1 %vm350_vm0, %v15618_v34  ;;  %v4968_v34 = vld [vmem:[#allocation2 + $0xfa] sm:$0xff] }
 0x4f8   : > { %12849 = vmatprep.mubr.msk.f32.mxu1 %vm350_vm0, %v15620_v31  ;;  %v4967_v31 = vld [vmem:[#allocation2 + $0xf2] sm:$0xff] }
 0x4fb   : > { %12850 = vmatmul.mubr.msk.f32.gmra.mrb[32].mxu1 %vm350_vm0, %v15626_v21  ;;  %v4966_v21 = vld [vmem:[#allocation2 + $0xea] sm:$0xff] }
 0x4fc   : > { %12852 = vmatprep.mubr.msk.f32.mxu1 %vm350_vm0, %v15628_v16  ;;  %v4965_v16 = vld [vmem:[#allocation2 + $0xe2] sm:$0xff] }
 0x4ff   : > { %12853 = vmatmul.mubr.msk.f32.gmra.mrb[34].mxu1 %vm350_vm0, %v15634_v14  ;;  %v4964_v14 = vld [vmem:[#allocation2 + $0xda] sm:$0xff] }
 0x500   : > { %12855 = vmatprep.mubr.msk.f32.mxu1 %vm350_vm0, %v15636_v24  ;;  %v4963_v24 = vld [vmem:[#allocation2 + $0xd2] sm:$0xff] }
 0x503   : > { %12856 = vmatmul.mubr.msk.f32.gmra.mrb[36].mxu1 %vm350_vm0, %v15642_v0  ;;  %v4962_v0 = vld [vmem:[#allocation2 + $0xca] sm:$0xff] }
 0x504   : > { %12858 = vmatprep.mubr.msk.f32.mxu1 %vm350_vm0, %v15644_v59  ;;  %v4961_v59 = vld [vmem:[#allocation2 + $0xc2] sm:$0xff] }
 0x507   : > { %12859 = vmatmul.mubr.msk.f32.gmra.mrb[38].mxu1 %vm350_vm0, %v15650_v58  ;;  %v4960_v58 = vld [vmem:[#allocation2 + $0xba] sm:$0xff] }
 0x508   : > { %12861 = vmatprep.mubr.msk.f32.mxu1 %vm350_vm0, %v17802_v47 }
 0x50b   : > { %12862 = vmatmul.mubr.msk.f32.gmra.mrb[40].mxu1 %vm350_vm0, %v17803_v50 }
 0x50c   : > { %12864 = vmatprep.mubr.msk.f32.mxu1 %vm350_vm0, %v15756_v46  ;;  %v4978_v46 = vld [vmem:[#allocation2 + $0x14a] sm:$0xff] }
 0x50f   : > { %12865 = vmatmul.mubr.msk.f32.gmra.mrb[42].mxu1 %vm350_vm0, %v15758_v44  ;;  %v4979_v44 = vld [vmem:[#allocation2 + $0x152] sm:$0xff] }
 0x510   : > { %12867 = vmatprep.mubr.msk.f32.mxu1 %vm350_vm0, %v15764_v45  ;;  %v4980_v45 = vld [vmem:[#allocation2 + $0x15a] sm:$0xff] }
 0x513   : > { %12868 = vmatmul.mubr.msk.f32.gmra.mrb[44].mxu1 %vm350_vm0, %v4473_v51 }
 0x514   : > { %12870 = vmatprep.mubr.msk.f32.mxu1 %vm350_vm0, %v4474_v56 }
 0x517   : > { %12871 = vmatmul.mubr.msk.f32.gmra.mrb[46].mxu1 %vm350_vm0, %v4475_v57 }
 0x518   : > { %12875 = vmatprep.mubr.msk.f32.mxu1 %vm350_vm0, %v4943_v60 }
 0x51b   : > { %12876 = vmatmul.mubr.msk.f32.vlgmr.msra.gmra.mrb[0].mxu1 %vm350_vm0, %v4944_v61 }
 0x51c   : > { %12878 = vmatprep.mubr.msk.f32.mxu1 %vm350_vm0, %v4945_v1 }
 0x51f   : > { %12879 = vmatmul.mubr.msk.f32.gmra.mrb[2].mxu1 %vm350_vm0, %v4946_v11 }
 0x520   : > { %12881 = vmatprep.mubr.msk.f32.mxu1 %vm350_vm0, %v4947_v19 }
 0x523   : > { %12882 = vmatmul.mubr.msk.f32.gmra.mrb[4].mxu1 %vm350_vm0, %v4948_v18 }
 0x524   : > { %12884 = vmatprep.mubr.msk.f32.mxu1 %vm350_vm0, %v4949_v3 }
 0x527   : > { %12885 = vmatmul.mubr.msk.f32.gmra.mrb[6].mxu1 %vm350_vm0, %v4950_v22 }
 0x528   : > { %12887 = vmatprep.mubr.msk.f32.mxu1 %vm350_vm0, %v4951_v17 }
 0x52b   : > { %12888 = vmatmul.mubr.msk.f32.gmra.mrb[8].mxu1 %vm350_vm0, %v4952_v27 }
 0x52c   : > { %12890 = vmatprep.mubr.msk.f32.mxu1 %vm350_vm0, %v4953_v13 }
 0x52f   : > { %12891 = vmatmul.mubr.msk.f32.gmra.mrb[10].mxu1 %vm350_vm0, %v4954_v5 }
 0x530   : > { %12893 = vmatprep.mubr.msk.f32.mxu1 %vm350_vm0, %v4955_v30 }
 0x533   : > { %12894 = vmatmul.mubr.msk.f32.gmra.mrb[12].mxu1 %vm350_vm0, %v4956_v9 }
 0x534   : > { %12896 = vmatprep.mubr.msk.f32.mxu1 %vm350_vm0, %v4957_v37 }
 0x537   : > { %12897 = vmatmul.mubr.msk.f32.gmra.mrb[14].mxu1 %vm350_vm0, %v4958_v28 }
 0x538   : > { %12899 = vmatprep.mubr.msk.f32.mxu1 %vm350_vm0, %v4959_v38 }
 0x53b   : > { %12900 = vmatmul.mubr.msk.f32.gmra.mrb[16].mxu1 %vm350_vm0, %v4960_v58 }
 0x53c   : > { %12902 = vmatprep.mubr.msk.f32.mxu1 %vm350_vm0, %v4961_v59 }
 0x53f   : > { %12903 = vmatmul.mubr.msk.f32.gmra.mrb[18].mxu1 %vm350_vm0, %v4962_v0 }
 0x540   : > { %12905 = vmatprep.mubr.msk.f32.mxu1 %vm350_vm0, %v4963_v24 }
 0x543   : > { %12906 = vmatmul.mubr.msk.f32.gmra.mrb[20].mxu1 %vm350_vm0, %v4964_v14 }
 0x544   : > { %12908 = vmatprep.mubr.msk.f32.mxu1 %vm350_vm0, %v4965_v16 }
 0x547   : > { %12909 = vmatmul.mubr.msk.f32.gmra.mrb[22].mxu1 %vm350_vm0, %v4966_v21 }
 0x548   : > { %12911 = vmatprep.mubr.msk.f32.mxu1 %vm350_vm0, %v4967_v31 }
 0x54b   : > { %12912 = vmatmul.mubr.msk.f32.gmra.mrb[24].mxu1 %vm350_vm0, %v4968_v34 }
 0x54c   : > { %12914 = vmatprep.mubr.msk.f32.mxu1 %vm350_vm0, %v4969_v39 }
 0x54f   : > { %12915 = vmatmul.mubr.msk.f32.gmra.mrb[26].mxu1 %vm350_vm0, %v4970_v8 }
 0x550   : > { %12917 = vmatprep.mubr.msk.f32.mxu1 %vm350_vm0, %v4971_v41 }
 0x553   : > { %12918 = vmatmul.mubr.msk.f32.gmra.mrb[28].mxu1 %vm350_vm0, %v4972_v33 }
 0x554   : > { %12920 = vmatprep.mubr.msk.f32.mxu1 %vm350_vm0, %v4973_v12 }
 0x557   : > { %12921 = vmatmul.mubr.msk.f32.gmra.mrb[30].mxu1 %vm350_vm0, %v4974_v48 }
 0x558   : > { %12923 = vmatprep.mubr.msk.f32.mxu1 %vm350_vm0, %v4975_v7 }
 0x55b   : > { %12924 = vmatmul.mubr.msk.f32.gmra.mrb[32].mxu1 %vm350_vm0, %v4976_v42 }
 0x55c   : > { %12926 = vmatprep.mubr.msk.f32.mxu1 %vm350_vm0, %v4977_v43 }
 0x55f   : > { %12927 = vmatmul.mubr.msk.f32.gmra.mrb[34].mxu1 %vm350_vm0, %v4978_v46 }
 0x560   : > { %12929 = vmatprep.mubr.msk.f32.mxu1 %vm350_vm0, %v4979_v44 }
 0x563   : > { %12930 = vmatmul.mubr.msk.f32.gmra.mrb[36].mxu1 %vm350_vm0, %v4980_v45 }
 0x564   : > { %12932 = vmatprep.mubr.msk.f32.mxu1 %vm350_vm0, %v4981_v15 }
 0x567   : > { %12933 = vmatmul.mubr.msk.f32.gmra.mrb[38].mxu1 %vm350_vm0, %v4982_v62 }
 0x568   : > { %12935 = vmatprep.mubr.msk.f32.mxu1 %vm350_vm0, %v4983_v63 }
 0x56b   : > { %12936 = vmatmul.mubr.msk.f32.gmra.mrb[40].mxu1 %vm350_vm0, %v4984_v23 }
 0x56c   : > { %12938 = vmatprep.mubr.msk.f32.mxu1 %vm350_vm0, %v15859_v2  ;;  %v5731_v2 = vld [vmem:[#allocation3 + $0x2] sm:$0xff] }
 0x56d   : > { %12949 = vmatprep.mubr.msk.f32.mxu0 %vm408_vm1, %v5731_v2 }
 0x56f   : > { %12939 = vmatmul.mubr.msk.f32.gmra.mrb[42].mxu1 %vm350_vm0, %v15861_v10  ;;  %v5680_v10 = vld [vmem:[%s17510_s4] sm:$0xf] }
 0x570   : > { %12941 = vmatprep.mubr.msk.f32.mxu1 %vm350_vm0, %v15867_v6  ;;  %13021 = vmatprep.subr.msk.mxu0 %vm5925_vm3, %v5680_v10  ;;  %v5732_v6 = vld [vmem:[#allocation3 + $0xa] sm:$0xff] }
 0x571   : > { %12950 = vmatmul.mubr.msk.f32.vlgmr.msra.gmra.mrb[2].mxu0 %vm408_vm1, %v5732_v6 }
 0x572   : > { %13022 = vmatpush3.msk.msra.mxu0 %vm5925_vm3, %v5680_v10 }
 0x573   : > { %12942 = vmatmul.mubr.msk.f32.gmra.mrb[44].mxu1 %vm350_vm0, %v4988_v26  ;;  %13095 = vmatprep.subr.msk.mxu0 %vm5925_vm3, %v16126_v35 }
 0x574   : > { %12944 = vmatprep.mubr.msk.f32.mxu1 %vm350_vm0, %v4989_v29 }
 0x577   : > { %12945 = vmatmul.mubr.msk.f32.gmra.mrb[46].mxu1 %vm350_vm0, %v4990_v32 }
 0x5ee   : > { %v12877_v40 = vpop.f32.mrb[0].mxu1 }
 0x5ef   : > { %v5498_v4 = vmul.f32 %v12877_v40, %v16133_v36  ;;  %v5203_v55 = vpop.f32.mrb[1].mxu1 }
 0x5f0   : > { %v5497_v49 = vmul.f32 %v16133_v36, %v5203_v55 }
 0x5f1   : > { %v5537_v52 = vadd.f32 %v16138_v54, %v5498_v4 }
 0x5f2   : > { %v5536_v25 = vadd.f32 %v16138_v54, %v5497_v49  ;;  %v12880_v53 = vpop.f32.mrb[2].mxu1 }
 0x5f3   : > { %v5569_v47 = vmax.f32 %v5537_v52, 0.0  ;;  %v5499_v50 = vmul.f32 %v12880_v53, %v16133_v36  ;;  %v5213_v51 = vpop.f32.mrb[3].mxu1 }
 0x5f4   : > { %v5568_v56 = vmax.f32 %v5536_v25, 0.0 }
 0x5f5   : > { %5601 = vst.msk [vmem:[#allocation3 + $0x21] sm:$0xff] %vm408_vm1, %v5569_v47  ;;  %v5538_v57 = vadd.f32 %v16138_v54, %v5499_v50 }
 0x5f6   : > { %5600 = vst.msk [vmem:[#allocation3 + $0x19] sm:$0xff] %vm408_vm1, %v5568_v56  ;;  %v12883_v60 = vpop.f32.mrb[4].mxu1 }
 0x5f7   : > { %v5570_v61 = vmax.f32 %v5538_v57, 0.0  ;;  %v5222_v1 = vpop.f32.mrb[5].mxu1 }
 0x5f8   : > { %v5500_v11 = vmul.f32 %v16133_v36, %v5222_v1 }
 0x5f9   : > { %5602 = vst.msk [vmem:[#allocation3 + $0x31] sm:$0xff] %vm408_vm1, %v5570_v61 }
 0x5fa   : > { %v5539_v19 = vadd.f32 %v16138_v54, %v5500_v11  ;;  %v12886_v18 = vpop.f32.mrb[6].mxu1 }
 0x5fb   : > { %v5502_v3 = vmul.f32 %v12886_v18, %v16133_v36  ;;  %v5231_v22 = vpop.f32.mrb[7].mxu1 }
 0x5fc   : > { %v5571_v17 = vmax.f32 %v5539_v19, 0.0  ;;  %v5501_v27 = vmul.f32 %v16133_v36, %v5231_v22  ;;  %v5735_v59 = vld [vmem:[#allocation3 + $0x22] sm:$0xff] }
 0x5fd   : > { %v5541_v13 = vadd.f32 %v16138_v54, %v5502_v3  ;;  %v5733_v5 = vld [vmem:[#allocation3 + $0x12] sm:$0xff]  ;;  %v5734_v30 = vld [vmem:[#allocation3 + $0x1a] sm:$0xff] }
 0x5fe   : > { %5603 = vst.msk [vmem:[#allocation3 + $0x39] sm:$0xff] %vm408_vm1, %v5571_v17  ;;  %v5540_v9 = vadd.f32 %v16138_v54, %v5501_v27  ;;  %v12889_v37 = vpop.f32.mrb[8].mxu1  ;;  %12952 = vmatprep.mubr.msk.f32.mxu0 %vm408_vm1, %v5733_v5 }
 0x5ff   : > { %v5573_v28 = vmax.f32 %v5541_v13, 0.0  ;;  %v5503_v38 = vmul.f32 %v12889_v37, %v16133_v36  ;;  %v5241_v58 = vpop.f32.mrb[9].mxu1  ;;  %12953 = vmatmul.mubr.msk.f32.gmra.mrb[4].mxu0 %vm408_vm1, %v5734_v30 }
 0x600   : > { %v5572_v0 = vmax.f32 %v5540_v9, 0.0  ;;  %12955 = vmatprep.mubr.msk.f32.mxu0 %vm408_vm1, %v5735_v59  ;;  %v5736_v16 = vld [vmem:[#allocation3 + $0x2a] sm:$0xff] }
 0x601   : > { %5605 = vst.msk [vmem:[#allocation3 + $0x51] sm:$0xff] %vm408_vm1, %v5573_v28  ;;  %v5542_v24 = vadd.f32 %v16138_v54, %v5503_v38 }
 0x602   : > { %5604 = vst.msk [vmem:[#allocation3 + $0x49] sm:$0xff] %vm408_vm1, %v5572_v0  ;;  %v12892_v14 = vpop.f32.mrb[10].mxu1 }
 0x603   : > { %v5574_v21 = vmax.f32 %v5542_v24, 0.0  ;;  %v5250_v31 = vpop.f32.mrb[11].mxu1  ;;  %12956 = vmatmul.mubr.msk.f32.gmra.mrb[6].mxu0 %vm408_vm1, %v5736_v16 }
 0x604   : > { %v5504_v34 = vmul.f32 %v16133_v36, %v5250_v31 }
 0x605   : > { %5606 = vst.msk [vmem:[#allocation3 + $0x61] sm:$0xff] %vm408_vm1, %v5574_v21  ;;  %v5737_v39 = vld [vmem:[#allocation3 + $0x32] sm:$0xff]  ;;  %v5738_v8 = vld [vmem:[#allocation3 + $0x3a] sm:$0xff] }
 0x606   : > { %v5543_v41 = vadd.f32 %v16138_v54, %v5504_v34  ;;  %v12895_v33 = vpop.f32.mrb[12].mxu1  ;;  %12958 = vmatprep.mubr.msk.f32.mxu0 %vm408_vm1, %v5737_v39 }
 0x607   : > { %v5506_v12 = vmul.f32 %v12895_v33, %v16133_v36  ;;  %v5259_v48 = vpop.f32.mrb[13].mxu1  ;;  %12959 = vmatmul.mubr.msk.f32.gmra.mrb[8].mxu0 %vm408_vm1, %v5738_v8 }
 0x608   : > { %v5575_v7 = vmax.f32 %v5543_v41, 0.0  ;;  %v5505_v42 = vmul.f32 %v16133_v36, %v5259_v48  ;;  %v5741_v26 = vld [vmem:[#allocation3 + $0x52] sm:$0xff] }
 0x609   : > { %v5545_v43 = vadd.f32 %v16138_v54, %v5506_v12  ;;  %v5739_v46 = vld [vmem:[#allocation3 + $0x42] sm:$0xff]  ;;  %v5740_v44 = vld [vmem:[#allocation3 + $0x4a] sm:$0xff] }
 0x60a   : > { %5607 = vst.msk [vmem:[#allocation3 + $0x69] sm:$0xff] %vm408_vm1, %v5575_v7  ;;  %v5544_v45 = vadd.f32 %v16138_v54, %v5505_v42  ;;  %v12898_v15 = vpop.f32.mrb[14].mxu1  ;;  %12961 = vmatprep.mubr.msk.f32.mxu0 %vm408_vm1, %v5739_v46 }
 0x60b   : > { %v5577_v62 = vmax.f32 %v5545_v43, 0.0  ;;  %v5507_v63 = vmul.f32 %v12898_v15, %v16133_v36  ;;  %v5269_v23 = vpop.f32.mrb[15].mxu1  ;;  %12962 = vmatmul.mubr.msk.f32.gmra.mrb[10].mxu0 %vm408_vm1, %v5740_v44 }
 0x60c   : > { %v5576_v29 = vmax.f32 %v5544_v45, 0.0  ;;  %12964 = vmatprep.mubr.msk.f32.mxu0 %vm408_vm1, %v5741_v26  ;;  %v5742_v2 = vld [vmem:[#allocation3 + $0x5a] sm:$0xff] }
 0x60d   : > { %5609 = vst.msk [vmem:[#allocation3 + $0x81] sm:$0xff] %vm408_vm1, %v5577_v62  ;;  %v5546_v32 = vadd.f32 %v16138_v54, %v5507_v63 }
 0x60e   : > { %5608 = vst.msk [vmem:[#allocation3 + $0x79] sm:$0xff] %vm408_vm1, %v5576_v29  ;;  %v12901_v20 = vpop.f32.mrb[16].mxu1 }
 0x60f   : > { %v5578_v10 = vmax.f32 %v5546_v32, 0.0  ;;  %v5278_v6 = vpop.f32.mrb[17].mxu1  ;;  %12965 = vmatmul.mubr.msk.f32.gmra.mrb[12].mxu0 %vm408_vm1, %v5742_v2 }
 0x610   : > { %v5508_v40 = vmul.f32 %v16133_v36, %v5278_v6 }
 0x611   : > { %5610 = vst.msk [vmem:[#allocation3 + $0x91] sm:$0xff] %vm408_vm1, %v5578_v10  ;;  %v5743_v4 = vld [vmem:[#allocation3 + $0x62] sm:$0xff]  ;;  %v5744_v55 = vld [vmem:[#allocation3 + $0x6a] sm:$0xff] }
 0x612   : > { %v5547_v49 = vadd.f32 %v16138_v54, %v5508_v40  ;;  %v12904_v52 = vpop.f32.mrb[18].mxu1  ;;  %12967 = vmatprep.mubr.msk.f32.mxu0 %vm408_vm1, %v5743_v4 }
 0x613   : > { %v5510_v25 = vmul.f32 %v12904_v52, %v16133_v36  ;;  %v5287_v53 = vpop.f32.mrb[19].mxu1  ;;  %12968 = vmatmul.mubr.msk.f32.gmra.mrb[14].mxu0 %vm408_vm1, %v5744_v55 }
 0x614   : > { %v5579_v47 = vmax.f32 %v5547_v49, 0.0  ;;  %v5509_v50 = vmul.f32 %v16133_v36, %v5287_v53  ;;  %v5747_v18 = vld [vmem:[#allocation3 + $0x82] sm:$0xff] }
 0x615   : > { %v5549_v51 = vadd.f32 %v16138_v54, %v5510_v25  ;;  %v5745_v56 = vld [vmem:[#allocation3 + $0x72] sm:$0xff]  ;;  %v5746_v57 = vld [vmem:[#allocation3 + $0x7a] sm:$0xff] }
 0x616   : > { %5611 = vst.msk [vmem:[#allocation3 + $0x99] sm:$0xff] %vm408_vm1, %v5579_v47  ;;  %v5548_v60 = vadd.f32 %v16138_v54, %v5509_v50  ;;  %v12907_v61 = vpop.f32.mrb[20].mxu1  ;;  %12970 = vmatprep.mubr.msk.f32.mxu0 %vm408_vm1, %v5745_v56 }
 0x617   : > { %v5581_v1 = vmax.f32 %v5549_v51, 0.0  ;;  %v5511_v11 = vmul.f32 %v12907_v61, %v16133_v36  ;;  %v5297_v19 = vpop.f32.mrb[21].mxu1  ;;  %12971 = vmatmul.mubr.msk.f32.gmra.mrb[16].mxu0 %vm408_vm1, %v5746_v57 }
 0x618   : > { %v5580_v3 = vmax.f32 %v5548_v60, 0.0  ;;  %12973 = vmatprep.mubr.msk.f32.mxu0 %vm408_vm1, %v5747_v18  ;;  %v5748_v27 = vld [vmem:[#allocation3 + $0x8a] sm:$0xff] }
 0x619   : > { %5613 = vst.msk [vmem:[#allocation3 + $0xb1] sm:$0xff] %vm408_vm1, %v5581_v1  ;;  %v5550_v22 = vadd.f32 %v16138_v54, %v5511_v11 }
 0x61a   : > { %5612 = vst.msk [vmem:[#allocation3 + $0xa9] sm:$0xff] %vm408_vm1, %v5580_v3  ;;  %v12910_v17 = vpop.f32.mrb[22].mxu1 }
 0x61b   : > { %v5582_v13 = vmax.f32 %v5550_v22, 0.0  ;;  %v5306_v5 = vpop.f32.mrb[23].mxu1  ;;  %12974 = vmatmul.mubr.msk.f32.gmra.mrb[18].mxu0 %vm408_vm1, %v5748_v27 }
 0x61c   : > { %v5512_v30 = vmul.f32 %v16133_v36, %v5306_v5 }
 0x61d   : > { %5614 = vst.msk [vmem:[#allocation3 + $0xc1] sm:$0xff] %vm408_vm1, %v5582_v13  ;;  %v5749_v9 = vld [vmem:[#allocation3 + $0x92] sm:$0xff]  ;;  %v5750_v37 = vld [vmem:[#allocation3 + $0x9a] sm:$0xff] }
 0x61e   : > { %v5551_v28 = vadd.f32 %v16138_v54, %v5512_v30  ;;  %v12913_v38 = vpop.f32.mrb[24].mxu1  ;;  %12976 = vmatprep.mubr.msk.f32.mxu0 %vm408_vm1, %v5749_v9 }
 0x61f   : > { %v5514_v58 = vmul.f32 %v12913_v38, %v16133_v36  ;;  %v5315_v59 = vpop.f32.mrb[25].mxu1  ;;  %12977 = vmatmul.mubr.msk.f32.gmra.mrb[20].mxu0 %vm408_vm1, %v5750_v37 }
 0x620   : > { %v5583_v0 = vmax.f32 %v5551_v28, 0.0  ;;  %v5513_v24 = vmul.f32 %v16133_v36, %v5315_v59  ;;  %v5753_v33 = vld [vmem:[#allocation3 + $0xb2] sm:$0xff] }
 0x621   : > { %v5553_v14 = vadd.f32 %v16138_v54, %v5514_v58  ;;  %v5751_v16 = vld [vmem:[#allocation3 + $0xa2] sm:$0xff]  ;;  %v5752_v21 = vld [vmem:[#allocation3 + $0xaa] sm:$0xff] }
 0x622   : > { %5615 = vst.msk [vmem:[#allocation3 + $0xc9] sm:$0xff] %vm408_vm1, %v5583_v0  ;;  %v5552_v31 = vadd.f32 %v16138_v54, %v5513_v24  ;;  %v12916_v34 = vpop.f32.mrb[26].mxu1  ;;  %12979 = vmatprep.mubr.msk.f32.mxu0 %vm408_vm1, %v5751_v16 }
 0x623   : > { %v5585_v39 = vmax.f32 %v5553_v14, 0.0  ;;  %v5515_v8 = vmul.f32 %v12916_v34, %v16133_v36  ;;  %v5325_v41 = vpop.f32.mrb[27].mxu1  ;;  %12980 = vmatmul.mubr.msk.f32.gmra.mrb[22].mxu0 %vm408_vm1, %v5752_v21 }
 0x624   : > { %v5584_v12 = vmax.f32 %v5552_v31, 0.0  ;;  %12982 = vmatprep.mubr.msk.f32.mxu0 %vm408_vm1, %v5753_v33  ;;  %v5754_v42 = vld [vmem:[#allocation3 + $0xba] sm:$0xff] }
 0x625   : > { %5617 = vst.msk [vmem:[#allocation3 + $0xe1] sm:$0xff] %vm408_vm1, %v5585_v39  ;;  %v5554_v48 = vadd.f32 %v16138_v54, %v5515_v8 }
 0x626   : > { %5616 = vst.msk [vmem:[#allocation3 + $0xd9] sm:$0xff] %vm408_vm1, %v5584_v12  ;;  %v12919_v7 = vpop.f32.mrb[28].mxu1 }
 0x627   : > { %v5586_v43 = vmax.f32 %v5554_v48, 0.0  ;;  %v5334_v46 = vpop.f32.mrb[29].mxu1  ;;  %12983 = vmatmul.mubr.msk.f32.gmra.mrb[24].mxu0 %vm408_vm1, %v5754_v42 }
 0x628   : > { %v5516_v44 = vmul.f32 %v16133_v36, %v5334_v46 }
 0x629   : > { %5618 = vst.msk [vmem:[#allocation3 + $0xf1] sm:$0xff] %vm408_vm1, %v5586_v43  ;;  %v5755_v45 = vld [vmem:[#allocation3 + $0xc2] sm:$0xff]  ;;  %v5756_v15 = vld [vmem:[#allocation3 + $0xca] sm:$0xff] }
 0x62a   : > { %v5555_v62 = vadd.f32 %v16138_v54, %v5516_v44  ;;  %v12922_v63 = vpop.f32.mrb[30].mxu1  ;;  %12985 = vmatprep.mubr.msk.f32.mxu0 %vm408_vm1, %v5755_v45 }
 0x62b   : > { %v5518_v23 = vmul.f32 %v12922_v63, %v16133_v36  ;;  %v5343_v26 = vpop.f32.mrb[31].mxu1  ;;  %12986 = vmatmul.mubr.msk.f32.gmra.mrb[26].mxu0 %vm408_vm1, %v5756_v15 }
 0x62c   : > { %v5587_v29 = vmax.f32 %v5555_v62, 0.0  ;;  %v5517_v32 = vmul.f32 %v16133_v36, %v5343_v26  ;;  %v5759_v52 = vld [vmem:[#allocation3 + $0xe2] sm:$0xff] }
 0x62d   : > { %v5557_v20 = vadd.f32 %v16138_v54, %v5518_v23  ;;  %v5757_v2 = vld [vmem:[#allocation3 + $0xd2] sm:$0xff]  ;;  %v5758_v10 = vld [vmem:[#allocation3 + $0xda] sm:$0xff] }
 0x62e   : > { %5619 = vst.msk [vmem:[#allocation3 + $0xf9] sm:$0xff] %vm408_vm1, %v5587_v29  ;;  %v5556_v6 = vadd.f32 %v16138_v54, %v5517_v32  ;;  %v12925_v40 = vpop.f32.mrb[32].mxu1  ;;  %12988 = vmatprep.mubr.msk.f32.mxu0 %vm408_vm1, %v5757_v2 }
 0x62f   : > { %v5589_v4 = vmax.f32 %v5557_v20, 0.0  ;;  %v5519_v55 = vmul.f32 %v12925_v40, %v16133_v36  ;;  %v5353_v49 = vpop.f32.mrb[33].mxu1  ;;  %12989 = vmatmul.mubr.msk.f32.gmra.mrb[28].mxu0 %vm408_vm1, %v5758_v10 }
 0x630   : > { %v5588_v25 = vmax.f32 %v5556_v6, 0.0  ;;  %12991 = vmatprep.mubr.msk.f32.mxu0 %vm408_vm1, %v5759_v52  ;;  %v5760_v50 = vld [vmem:[#allocation3 + $0xea] sm:$0xff] }
 0x631   : > { %5621 = vst.msk [vmem:[#allocation3 + $0x111] sm:$0xff] %vm408_vm1, %v5589_v4  ;;  %v5558_v53 = vadd.f32 %v16138_v54, %v5519_v55 }
 0x632   : > { %5620 = vst.msk [vmem:[#allocation3 + $0x109] sm:$0xff] %vm408_vm1, %v5588_v25  ;;  %v12928_v47 = vpop.f32.mrb[34].mxu1 }
 0x633   : > { %v5590_v51 = vmax.f32 %v5558_v53, 0.0  ;;  %v5362_v56 = vpop.f32.mrb[35].mxu1  ;;  %12992 = vmatmul.mubr.msk.f32.gmra.mrb[30].mxu0 %vm408_vm1, %v5760_v50  ;;  %v5633_v53 = vld [vmem:[#allocation3 + $0x8] sm:$0xff]  ;;  %v5634_v47 = vld [vmem:[#allocation3 + $0x10] sm:$0xff]  ;;  %v16325_v50 = vld [vmem:[%s17510_s4 + $0x4] sm:$0xf] }
 0x634   : > { %v5520_v57 = vmul.f32 %v16133_v36, %v5362_v56  ;;  %v16337_v56 = vld [vmem:[#allocation3 + $0x20] sm:$0xff] }
 0x635   : > { %5622 = vst.msk [vmem:[#allocation3 + $0x121] sm:$0xff] %vm408_vm1, %v5590_v51  ;;  %v5761_v60 = vld [vmem:[#allocation3 + $0xf2] sm:$0xff]  ;;  %v5762_v61 = vld [vmem:[#allocation3 + $0xfa] sm:$0xff] }
 0x636   : > { %v5559_v1 = vadd.f32 %v16138_v54, %v5520_v57  ;;  %v12931_v11 = vpop.f32.mrb[36].mxu1  ;;  %12994 = vmatprep.mubr.msk.f32.mxu0 %vm408_vm1, %v5761_v60  ;;  %v16333_v51 = vld [vmem:[#allocation3 + $0x18] sm:$0xff]  ;;  %v16341_v57 = vld [vmem:[#allocation3 + $0x28] sm:$0xff] }
 0x637   : > { %v5522_v19 = vmul.f32 %v12931_v11, %v16133_v36  ;;  %v5371_v18 = vpop.f32.mrb[37].mxu1  ;;  %12995 = vmatmul.mubr.msk.f32.gmra.mrb[32].mxu0 %vm408_vm1, %v5762_v61  ;;  %v16349_v60 = vld [vmem:[#allocation3 + $0x38] sm:$0xff]  ;;  %v16353_v61 = vld [vmem:[#allocation3 + $0x40] sm:$0xff]  ;;  %v16361_v11 = vld [vmem:[#allocation3 + $0x50] sm:$0xff] }
 0x638   : > { %v5591_v3 = vmax.f32 %v5559_v1, 0.0  ;;  %v5521_v22 = vmul.f32 %v16133_v36, %v5371_v18  ;;  %v5765_v38 = vld [vmem:[#allocation3 + $0x112] sm:$0xff]  ;;  %v16357_v1 = vld [vmem:[#allocation3 + $0x48] sm:$0xff]  ;;  %17804 = vst [vmem:[#allocation4_spill] sm:$0xff] %v16361_v11  ;;  %v16369_v18 = vld [vmem:[#allocation3 + $0x60] sm:$0xff] }
 0x639   : > { %v5561_v17 = vadd.f32 %v16138_v54, %v5522_v19  ;;  %v5763_v27 = vld [vmem:[#allocation3 + $0x102] sm:$0xff]  ;;  %v5764_v13 = vld [vmem:[#allocation3 + $0x10a] sm:$0xff]  ;;  %v16365_v19 = vld [vmem:[#allocation3 + $0x58] sm:$0xff]  ;;  %17806 = vst [vmem:[#allocation6_spill] sm:$0xff] %v16369_v18 }
 0x63a   : > { %5623 = vst.msk [vmem:[#allocation3 + $0x129] sm:$0xff] %vm408_vm1, %v5591_v3  ;;  %v5560_v5 = vadd.f32 %v16138_v54, %v5521_v22  ;;  %v12934_v30 = vpop.f32.mrb[38].mxu1  ;;  %12997 = vmatprep.mubr.msk.f32.mxu0 %vm408_vm1, %v5763_v27  ;;  %17805 = vst [vmem:[#allocation5_spill] sm:$0xff] %v16365_v19  ;;  %v16373_v3 = vld [vmem:[#allocation3 + $0x68] sm:$0xff]  ;;  %v16377_v22 = vld [vmem:[#allocation3 + $0x70] sm:$0xff] }
 0x63b   : > { %v5593_v9 = vmax.f32 %v5561_v17, 0.0  ;;  %v5523_v37 = vmul.f32 %v12934_v30, %v16133_v36  ;;  %v5381_v28 = vpop.f32.mrb[39].mxu1  ;;  %12998 = vmatmul.mubr.msk.f32.gmra.mrb[34].mxu0 %vm408_vm1, %v5764_v13  ;;  %17807 = vst [vmem:[#allocation7_spill] sm:$0xff] %v16373_v3  ;;  %17808 = vst [vmem:[#allocation8_spill] sm:$0xff] %v16377_v22  ;;  %v16381_v17 = vld [vmem:[#allocation3 + $0x78] sm:$0xff]  ;;  %v16385_v27 = vld [vmem:[#allocation3 + $0x80] sm:$0xff] }
 0x63c   : > { %v5592_v58 = vmax.f32 %v5560_v5, 0.0  ;;  %13000 = vmatprep.mubr.msk.f32.mxu0 %vm408_vm1, %v5765_v38  ;;  %v16253_v24 = vld [vmem:[#allocation3 + $0x11a] sm:$0xff]  ;;  %17809 = vst [vmem:[#allocation9_spill] sm:$0xff] %v16381_v17  ;;  %17810 = vst [vmem:[#allocation10_spill] sm:$0xff] %v16385_v27  ;;  %v16389_v13 = vld [vmem:[#allocation3 + $0x88] sm:$0xff] }
 0x63d   : > { %5625 = vst.msk [vmem:[#allocation3 + $0x141] sm:$0xff] %vm408_vm1, %v5593_v9  ;;  %v5562_v59 = vadd.f32 %v16138_v54, %v5523_v37  ;;  %17811 = vst [vmem:[#allocation11_spill] sm:$0xff] %v16389_v13  ;;  %v16393_v5 = vld [vmem:[#allocation3 + $0x90] sm:$0xff]  ;;  %v16397_v30 = vld [vmem:[#allocation3 + $0x98] sm:$0xff] }
 0x63e   : > { %5624 = vst.msk [vmem:[#allocation3 + $0x139] sm:$0xff] %vm408_vm1, %v5592_v58  ;;  %v12937_v0 = vpop.f32.mrb[40].mxu1  ;;  %17812 = vst [vmem:[#allocation12_spill] sm:$0xff] %v16393_v5  ;;  %v16401_v9 = vld [vmem:[#allocation3 + $0xa0] sm:$0xff]  ;;  %v16405_v37 = vld [vmem:[#allocation3 + $0xa8] sm:$0xff] }
 0x63f   : > { %v5594_v14 = vmax.f32 %v5562_v59, 0.0  ;;  %v5390_v16 = vpop.f32.mrb[41].mxu1  ;;  %13001 = vmatmul.mubr.msk.f32.gmra.mrb[36].mxu0 %vm408_vm1, %v16253_v24  ;;  %17813 = vst [vmem:[#allocation13_spill] sm:$0xff] %v16397_v30  ;;  %17814 = vst [vmem:[#allocation14_spill] sm:$0xff] %v16401_v9  ;;  %v16409_v28 = vld [vmem:[#allocation3 + $0xb0] sm:$0xff]  ;;  %v16413_v38 = vld [vmem:[#allocation3 + $0xb8] sm:$0xff] }
 0x640   : > { %v5524_v21 = vmul.f32 %v16133_v36, %v5390_v16  ;;  %17815 = vst [vmem:[#allocation15_spill] sm:$0xff] %v16405_v37  ;;  %17816 = vst [vmem:[#allocation16_spill] sm:$0xff] %v16409_v28  ;;  %v16417_v58 = vld [vmem:[#allocation3 + $0xc0] sm:$0xff]  ;;  %v16421_v59 = vld [vmem:[#allocation3 + $0xc8] sm:$0xff] }
 0x641   : > { %5626 = vst.msk [vmem:[#allocation3 + $0x151] sm:$0xff] %vm408_vm1, %v5594_v14  ;;  %v16259_v31 = vld [vmem:[#allocation3 + $0x122] sm:$0xff]  ;;  %v16261_v34 = vld [vmem:[#allocation3 + $0x12a] sm:$0xff]  ;;  %17817 = vst [vmem:[#allocation17_spill] sm:$0xff] %v16413_v38 }
 0x642   : > { %v5563_v39 = vadd.f32 %v16138_v54, %v5524_v21  ;;  %v12940_v8 = vpop.f32.mrb[42].mxu1  ;;  %13003 = vmatprep.mubr.msk.f32.mxu0 %vm408_vm1, %v16259_v31  ;;  %17818 = vst [vmem:[#allocation18_spill] sm:$0xff] %v16417_v58  ;;  %17819 = vst [vmem:[#allocation19_spill] sm:$0xff] %v16421_v59  ;;  %v16425_v0 = vld [vmem:[#allocation3 + $0xd0] sm:$0xff]  ;;  %v16429_v14 = vld [vmem:[#allocation3 + $0xd8] sm:$0xff] }
 0x643   : > { %v5526_v41 = vmul.f32 %v12940_v8, %v16133_v36  ;;  %v5399_v33 = vpop.f32.mrb[43].mxu1  ;;  %13004 = vmatmul.mubr.msk.f32.gmra.mrb[38].mxu0 %vm408_vm1, %v16261_v34  ;;  %17820 = vst [vmem:[#allocation20_spill] sm:$0xff] %v16425_v0  ;;  %17821 = vst [vmem:[#allocation21_spill] sm:$0xff] %v16429_v14  ;;  %v16433_v16 = vld [vmem:[#allocation3 + $0xe0] sm:$0xff]  ;;  %v16437_v21 = vld [vmem:[#allocation3 + $0xe8] sm:$0xff] }
 0x644   : > { %v5595_v12 = vmax.f32 %v5563_v39, 0.0  ;;  %v5525_v48 = vmul.f32 %v16133_v36, %v5399_v33  ;;  %v16282_v63 = vld [vmem:[#allocation3 + $0x142] sm:$0xff]  ;;  %17822 = vst [vmem:[#allocation22_spill] sm:$0xff] %v16433_v16  ;;  %17823 = vst [vmem:[#allocation23_spill] sm:$0xff] %v16437_v21  ;;  %v16441_v39 = vld [vmem:[#allocation3 + $0xf0] sm:$0xff] }
 0x645   : > { %v5565_v7 = vadd.f32 %v16138_v54, %v5526_v41  ;;  %v16271_v42 = vld [vmem:[#allocation3 + $0x132] sm:$0xff]  ;;  %v16273_v43 = vld [vmem:[#allocation3 + $0x13a] sm:$0xff]  ;;  %17824 = vst [vmem:[#allocation24_spill] sm:$0xff] %v16441_v39  ;;  %v16453_v33 = vld [vmem:[#allocation3 + $0x108] sm:$0xff] }
 0x646   : > { %5627 = vst.msk [vmem:[#allocation3 + $0x159] sm:$0xff] %vm408_vm1, %v5595_v12  ;;  %v5564_v46 = vadd.f32 %v16138_v54, %v5525_v48  ;;  %v12943_v44 = vpop.f32.mrb[44].mxu1  ;;  %13006 = vmatprep.mubr.msk.f32.mxu0 %vm408_vm1, %v16271_v42  ;;  %v16445_v8 = vld [vmem:[#allocation3 + $0xf8] sm:$0xff]  ;;  %v16449_v41 = vld [vmem:[#allocation3 + $0x100] sm:$0xff]  ;;  %17827 = vst [vmem:[#allocation27_spill] sm:$0xff] %v16453_v33 }
 0x647   : > { %v5597_v45 = vmax.f32 %v5565_v7, 0.0  ;;  %v5527_v15 = vmul.f32 %v12943_v44, %v16133_v36  ;;  %v5409_v62 = vpop.f32.mrb[45].mxu1  ;;  %13007 = vmatmul.mubr.msk.f32.gmra.mrb[40].mxu0 %vm408_vm1, %v16273_v43  ;;  %17825 = vst [vmem:[#allocation25_spill] sm:$0xff] %v16445_v8  ;;  %17826 = vst [vmem:[#allocation26_spill] sm:$0xff] %v16449_v41  ;;  %v16457_v12 = vld [vmem:[#allocation3 + $0x110] sm:$0xff]  ;;  %v16461_v48 = vld [vmem:[#allocation3 + $0x118] sm:$0xff] }
 0x648   : > { %v5596_v23 = vmax.f32 %v5564_v46, 0.0  ;;  %13009 = vmatprep.mubr.msk.f32.mxu0 %vm408_vm1, %v16282_v63  ;;  %v16289_v32 = vld [vmem:[#allocation3 + $0x14a] sm:$0xff]  ;;  %17828 = vst [vmem:[#allocation28_spill] sm:$0xff] %v16457_v12  ;;  %17829 = vst [vmem:[#allocation29_spill] sm:$0xff] %v16461_v48  ;;  %v16465_v7 = vld [vmem:[#allocation3 + $0x120] sm:$0xff] }
 0x649   : > { %5629 = vst.msk [vmem:[#allocation3 + $0x171] sm:$0xff] %vm408_vm1, %v5597_v45  ;;  %v5566_v26 = vadd.f32 %v16138_v54, %v5527_v15  ;;  %17830 = vst [vmem:[#allocation30_spill] sm:$0xff] %v16465_v7  ;;  %v16469_v46 = vld [vmem:[#allocation3 + $0x128] sm:$0xff]  ;;  %v16473_v44 = vld [vmem:[#allocation3 + $0x130] sm:$0xff] }
 0x64a   : > { %5628 = vst.msk [vmem:[#allocation3 + $0x169] sm:$0xff] %vm408_vm1, %v5596_v23  ;;  %v12946_v29 = vpop.f32.mrb[46].mxu1  ;;  %17831 = vst [vmem:[#allocation31_spill] sm:$0xff] %v16469_v46  ;;  %v16477_v45 = vld [vmem:[#allocation3 + $0x138] sm:$0xff]  ;;  %v16481_v15 = vld [vmem:[#allocation3 + $0x140] sm:$0xff] }
 0x64b   : > { %v5598_v20 = vmax.f32 %v5566_v26, 0.0  ;;  %v5418_v2 = vpop.f32.mrb[47].mxu1  ;;  %13010 = vmatmul.mubr.msk.f32.gmra.mrb[42].mxu0 %vm408_vm1, %v16289_v32  ;;  %17832 = vst [vmem:[#allocation32_spill] sm:$0xff] %v16473_v44  ;;  %17833 = vst [vmem:[#allocation33_spill] sm:$0xff] %v16477_v45  ;;  %v16485_v62 = vld [vmem:[#allocation3 + $0x148] sm:$0xff]  ;;  %v16489_v23 = vld [vmem:[#allocation3 + $0x150] sm:$0xff] }
 0x64c   : > { %v5528_v10 = vmul.f32 %v16133_v36, %v5418_v2  ;;  %17834 = vst [vmem:[#allocation34_spill] sm:$0xff] %v16481_v15  ;;  %17835 = vst [vmem:[#allocation35_spill] sm:$0xff] %v16485_v62 }
 0x64d   : > { %5630 = vst.msk [vmem:[#allocation3 + $0x181] sm:$0xff] %vm408_vm1, %v5598_v20  ;;  %v16295_v6 = vld [vmem:[#allocation3 + $0x152] sm:$0xff]  ;;  %v16297_v40 = vld [vmem:[#allocation3 + $0x15a] sm:$0xff]  ;;  %17836 = vst [vmem:[#allocation36_spill] sm:$0xff] %v16489_v23 }
 0x64e   : > { %v5567_v4 = vadd.f32 %v16138_v54, %v5528_v10  ;;  %13012 = vmatprep.mubr.msk.f32.mxu0 %vm408_vm1, %v16295_v6  ;;  %v5632_v54 = vld [vmem:[#allocation3] sm:$0xff]  ;;  %v16493_v26 = vld [vmem:[#allocation3 + $0x158] sm:$0xff] }
 0x64f   : > { %13013 = vmatmul.mubr.msk.f32.gmra.mrb[44].mxu0 %vm408_vm1, %v16297_v40  ;;  %17837 = vst [vmem:[#allocation37_spill] sm:$0xff] %v16493_v26  ;;  %v16497_v29 = vld [vmem:[#allocation3 + $0x160] sm:$0xff] }
 0x650   : > { %v5599_v55 = vmax.f32 %v5567_v4, 0.0  ;;  %v16313_v36 = vld [vmem:[#allocation3 + $0x172] sm:$0xff]  ;;  %17838 = vst [vmem:[#allocation38_spill] sm:$0xff] %v16497_v29  ;;  %v11105_v4 = vld [vmem:[%s17510_s4 + $0x10] sm:$0xf] }
 0x651   : > { %v16304_v49 = vld [vmem:[#allocation3 + $0x162] sm:$0xff]  ;;  %v16306_v52 = vld [vmem:[#allocation3 + $0x16a] sm:$0xff]  ;;  %v16509_v10 = vld [vmem:[#allocation3 + $0x178] sm:$0xff] }
 0x652   : > { %5631 = vst.msk [vmem:[#allocation3 + $0x189] sm:$0xff] %vm408_vm1, %v5599_v55  ;;  %13015 = vmatprep.mubr.msk.f32.mxu0 %vm408_vm1, %v16304_v49  ;;  %v16501_v20 = vld [vmem:[#allocation3 + $0x168] sm:$0xff]  ;;  %v16505_v2 = vld [vmem:[#allocation3 + $0x170] sm:$0xff]  ;;  %17841 = vst [vmem:[#allocation41_spill] sm:$0xff] %v16509_v10 }
 0x653   : > { %13016 = vmatmul.mubr.msk.f32.gmra.mrb[46].mxu0 %vm408_vm1, %v16306_v52  ;;  %17839 = vst [vmem:[#allocation39_spill] sm:$0xff] %v16501_v20  ;;  %17840 = vst [vmem:[#allocation40_spill] sm:$0xff] %v16505_v2 }
 0x654   : > { %13018 = vmatprep.mubr.msk.f32.mxu0 %vm408_vm1, %v16313_v36  ;;  %v16317_v25 = vld [vmem:[#allocation3 + $0x17a] sm:$0xff] }
 0x655   : > { %v16609_v55 = vld [vmem:[#allocation3 + $0x180] sm:$0xff] }
 0x656   : > { %17842 = vst [vmem:[#allocation42_spill] sm:$0xff] %v16609_v55 }
 0x657   : > { %13019 = vmatmul.mubr.msk.f32.gmra.mrb[48].mxu0 %vm408_vm1, %v16317_v25 }
 0x658   : > { %13023 = vmatprep.mubr.msk.f32.mxu0 %vm408_vm1, %v5632_v54 }
 0x659   : > { %v16613_v54 = vld [vmem:[#allocation3 + $0x188] sm:$0xff] }
 0x65a   : > { %17843 = vst [vmem:[#allocation43_spill] sm:$0xff] %v16613_v54 }
 0x65b   : > { %13024 = vmatmul.mubr.msk.f32.vlgmr.msra.gmra.mrb[2].mxu0 %vm408_vm1, %v5633_v53  ;;  %v5681_v53 = vld [vmem:[#allocation3 + $0x1] sm:$0xff] }
 0x65c   : > { %13096 = vmatpush3.msk.msra.mxu0 %vm5925_vm3, %v16126_v35  ;;  %13026 = vmatprep.mubr.msk.f32.mxu0 %vm408_vm1, %v5634_v47  ;;  %v16345_v35 = vld [vmem:[#allocation3 + $0x30] sm:$0xff] }
 0x65d   : > { %13169 = vmatprep.subr.msk.mxu0 %vm5925_vm3, %v16325_v50  ;;  %v16617_v47 = vld [vmem:[#allocation3 + $0x190] sm:$0xff] }
 0x65e   : > { %17844 = vst [vmem:[#allocation44_spill] sm:$0xff] %v16617_v47 }
 0x65f   : > { %13027 = vmatmul.mubr.msk.f32.gmra.mrb[4].mxu0 %vm408_vm1, %v16333_v51 }
 0x660   : > { %13029 = vmatprep.mubr.msk.f32.mxu0 %vm408_vm1, %v16337_v56 }
 0x663   : > { %13030 = vmatmul.mubr.msk.f32.gmra.mrb[6].mxu0 %vm408_vm1, %v16341_v57 }
 0x664   : > { %13032 = vmatprep.mubr.msk.f32.mxu0 %vm408_vm1, %v16345_v35 }
 0x667   : > { %13033 = vmatmul.mubr.msk.f32.gmra.mrb[8].mxu0 %vm408_vm1, %v16349_v60 }
 0x668   : > { %13035 = vmatprep.mubr.msk.f32.mxu0 %vm408_vm1, %v16353_v61 }
 0x66b   : > { %13036 = vmatmul.mubr.msk.f32.gmra.mrb[10].mxu0 %vm408_vm1, %v16357_v1 }
 0x66c   : > { %13038 = vmatprep.mubr.msk.f32.mxu0 %vm408_vm1, %v16361_v11 }
 0x66f   : > { %13039 = vmatmul.mubr.msk.f32.gmra.mrb[12].mxu0 %vm408_vm1, %v16365_v19 }
 0x670   : > { %13041 = vmatprep.mubr.msk.f32.mxu0 %vm408_vm1, %v16369_v18 }
 0x673   : > { %13042 = vmatmul.mubr.msk.f32.gmra.mrb[14].mxu0 %vm408_vm1, %v16373_v3 }
 0x674   : > { %13044 = vmatprep.mubr.msk.f32.mxu0 %vm408_vm1, %v16377_v22 }
 0x677   : > { %13045 = vmatmul.mubr.msk.f32.gmra.mrb[16].mxu0 %vm408_vm1, %v16381_v17 }
 0x678   : > { %13047 = vmatprep.mubr.msk.f32.mxu0 %vm408_vm1, %v16385_v27 }
 0x67b   : > { %13048 = vmatmul.mubr.msk.f32.gmra.mrb[18].mxu0 %vm408_vm1, %v16389_v13 }
 0x67c   : > { %13050 = vmatprep.mubr.msk.f32.mxu0 %vm408_vm1, %v16393_v5 }
 0x67f   : > { %13051 = vmatmul.mubr.msk.f32.gmra.mrb[20].mxu0 %vm408_vm1, %v16397_v30 }
 0x680   : > { %13053 = vmatprep.mubr.msk.f32.mxu0 %vm408_vm1, %v16401_v9 }
 0x683   : > { %13054 = vmatmul.mubr.msk.f32.gmra.mrb[22].mxu0 %vm408_vm1, %v16405_v37 }
 0x684   : > { %13056 = vmatprep.mubr.msk.f32.mxu0 %vm408_vm1, %v16409_v28 }
 0x687   : > { %13057 = vmatmul.mubr.msk.f32.gmra.mrb[24].mxu0 %vm408_vm1, %v16413_v38 }
 0x688   : > { %13059 = vmatprep.mubr.msk.f32.mxu0 %vm408_vm1, %v16417_v58 }
 0x68b   : > { %13060 = vmatmul.mubr.msk.f32.gmra.mrb[26].mxu0 %vm408_vm1, %v16421_v59 }
 0x68c   : > { %13062 = vmatprep.mubr.msk.f32.mxu0 %vm408_vm1, %v16425_v0 }
 0x68f   : > { %13063 = vmatmul.mubr.msk.f32.gmra.mrb[28].mxu0 %vm408_vm1, %v16429_v14 }
 0x690   : > { %13065 = vmatprep.mubr.msk.f32.mxu0 %vm408_vm1, %v16433_v16 }
 0x693   : > { %13066 = vmatmul.mubr.msk.f32.gmra.mrb[30].mxu0 %vm408_vm1, %v16437_v21 }
 0x694   : > { %13068 = vmatprep.mubr.msk.f32.mxu0 %vm408_vm1, %v16441_v39 }
 0x697   : > { %13069 = vmatmul.mubr.msk.f32.gmra.mrb[32].mxu0 %vm408_vm1, %v16445_v8 }
 0x698   : > { %13071 = vmatprep.mubr.msk.f32.mxu0 %vm408_vm1, %v16449_v41 }
 0x69b   : > { %13072 = vmatmul.mubr.msk.f32.gmra.mrb[34].mxu0 %vm408_vm1, %v16453_v33 }
 0x69c   : > { %13074 = vmatprep.mubr.msk.f32.mxu0 %vm408_vm1, %v16457_v12 }
 0x69f   : > { %13075 = vmatmul.mubr.msk.f32.gmra.mrb[36].mxu0 %vm408_vm1, %v16461_v48 }
 0x6a0   : > { %13077 = vmatprep.mubr.msk.f32.mxu0 %vm408_vm1, %v16465_v7 }
 0x6a3   : > { %13078 = vmatmul.mubr.msk.f32.gmra.mrb[38].mxu0 %vm408_vm1, %v16469_v46 }
 0x6a4   : > { %13080 = vmatprep.mubr.msk.f32.mxu0 %vm408_vm1, %v16473_v44 }
 0x6a7   : > { %13081 = vmatmul.mubr.msk.f32.gmra.mrb[40].mxu0 %vm408_vm1, %v16477_v45 }
 0x6a8   : > { %13083 = vmatprep.mubr.msk.f32.mxu0 %vm408_vm1, %v16481_v15 }
 0x6ab   : > { %13084 = vmatmul.mubr.msk.f32.gmra.mrb[42].mxu0 %vm408_vm1, %v16485_v62 }
 0x6ac   : > { %13086 = vmatprep.mubr.msk.f32.mxu0 %vm408_vm1, %v16489_v23 }
 0x6af   : > { %13087 = vmatmul.mubr.msk.f32.gmra.mrb[44].mxu0 %vm408_vm1, %v16493_v26 }
 0x6b0   : > { %13089 = vmatprep.mubr.msk.f32.mxu0 %vm408_vm1, %v16497_v29 }
 0x6b3   : > { %13090 = vmatmul.mubr.msk.f32.gmra.mrb[46].mxu0 %vm408_vm1, %v16501_v20 }
 0x6b4   : > { %13092 = vmatprep.mubr.msk.f32.mxu0 %vm408_vm1, %v16505_v2 }
 0x6b7   : > { %13093 = vmatmul.mubr.msk.f32.gmra.mrb[48].mxu0 %vm408_vm1, %v16509_v10 }
 0x6b8   : > { %13097 = vmatprep.mubr.msk.f32.mxu0 %vm408_vm1, %v16333_v51  ;;  %v5683_v51 = vld [vmem:[#allocation3 + $0x11] sm:$0xff] }
 0x6bb   : > { %13098 = vmatmul.mubr.msk.f32.vlgmr.msra.gmra.mrb[2].mxu0 %vm408_vm1, %v16337_v56  ;;  %v16625_v56 = vld [vmem:[%s17510_s4 + $0x14] sm:$0xf] }
 0x6bc   : > { %13170 = vmatpush3.msk.msra.mxu0 %vm5925_vm3, %v16325_v50  ;;  %13100 = vmatprep.mubr.msk.f32.mxu0 %vm408_vm1, %v16341_v57  ;;  %v5682_v50 = vld [vmem:[#allocation3 + $0x9] sm:$0xff]  ;;  %v16632_v57 = vld [vmem:[#allocation3 + $0x19] sm:$0xff] }
 0x6bd   : > { %13243 = vmatprep.subr.msk.mxu0 %vm5925_vm3, %v11105_v4 }
 0x6bf   : > { %13101 = vmatmul.mubr.msk.f32.gmra.mrb[4].mxu0 %vm408_vm1, %v16345_v35 }
 0x6c0   : > { %13103 = vmatprep.mubr.msk.f32.mxu0 %vm408_vm1, %v16349_v60 }
 0x6c3   : > { %13104 = vmatmul.mubr.msk.f32.gmra.mrb[6].mxu0 %vm408_vm1, %v16353_v61 }
 0x6c4   : > { %13106 = vmatprep.mubr.msk.f32.mxu0 %vm408_vm1, %v16357_v1 }
 0x6c7   : > { %13107 = vmatmul.mubr.msk.f32.gmra.mrb[8].mxu0 %vm408_vm1, %v16361_v11  ;;  %v11205_v11 = vld [vmem:[%s17510_s4 + $0x18] sm:$0xf] }
 0x6c8   : > { %13109 = vmatprep.mubr.msk.f32.mxu0 %vm408_vm1, %v16365_v19  ;;  %v16808_v19 = vld [vmem:[#allocation3 + $0x179] sm:$0xff] }
 0x6c9   : > { %17846 = vst [vmem:[#allocation46_spill] sm:$0xff] %v16808_v19 }
 0x6cb   : > { %13110 = vmatmul.mubr.msk.f32.gmra.mrb[10].mxu0 %vm408_vm1, %v16369_v18  ;;  %v16804_v18 = vld [vmem:[#allocation3 + $0x171] sm:$0xff] }
 0x6cc   : > { %13112 = vmatprep.mubr.msk.f32.mxu0 %vm408_vm1, %v16373_v3  ;;  %v16800_v3 = vld [vmem:[#allocation3 + $0x169] sm:$0xff]  ;;  %17845 = vst [vmem:[#allocation45_spill] sm:$0xff] %v16804_v18 }
 0x6cf   : > { %13113 = vmatmul.mubr.msk.f32.gmra.mrb[12].mxu0 %vm408_vm1, %v16377_v22  ;;  %v16794_v22 = vld [vmem:[#allocation3 + $0x159] sm:$0xff] }
 0x6d0   : > { %13115 = vmatprep.mubr.msk.f32.mxu0 %vm408_vm1, %v16381_v17  ;;  %v16792_v17 = vld [vmem:[#allocation3 + $0x161] sm:$0xff] }
 0x6d3   : > { %13116 = vmatmul.mubr.msk.f32.gmra.mrb[14].mxu0 %vm408_vm1, %v16385_v27  ;;  %v16788_v27 = vld [vmem:[#allocation3 + $0x151] sm:$0xff] }
 0x6d4   : > { %13118 = vmatprep.mubr.msk.f32.mxu0 %vm408_vm1, %v16389_v13  ;;  %v16784_v13 = vld [vmem:[#allocation3 + $0x149] sm:$0xff] }
 0x6d7   : > { %13119 = vmatmul.mubr.msk.f32.gmra.mrb[16].mxu0 %vm408_vm1, %v16393_v5  ;;  %v16780_v5 = vld [vmem:[#allocation3 + $0x141] sm:$0xff] }
 0x6d8   : > { %13121 = vmatprep.mubr.msk.f32.mxu0 %vm408_vm1, %v16397_v30  ;;  %v16776_v30 = vld [vmem:[#allocation3 + $0x139] sm:$0xff] }
 0x6db   : > { %13122 = vmatmul.mubr.msk.f32.gmra.mrb[18].mxu0 %vm408_vm1, %v16401_v9  ;;  %v16770_v9 = vld [vmem:[#allocation3 + $0x129] sm:$0xff] }
 0x6dc   : > { %13124 = vmatprep.mubr.msk.f32.mxu0 %vm408_vm1, %v16405_v37  ;;  %v16768_v37 = vld [vmem:[#allocation3 + $0x131] sm:$0xff] }
 0x6df   : > { %13125 = vmatmul.mubr.msk.f32.gmra.mrb[20].mxu0 %vm408_vm1, %v16409_v28  ;;  %v16764_v28 = vld [vmem:[#allocation3 + $0x121] sm:$0xff] }
 0x6e0   : > { %13127 = vmatprep.mubr.msk.f32.mxu0 %vm408_vm1, %v16413_v38  ;;  %v16760_v38 = vld [vmem:[#allocation3 + $0x119] sm:$0xff] }
 0x6e3   : > { %13128 = vmatmul.mubr.msk.f32.gmra.mrb[22].mxu0 %vm408_vm1, %v16417_v58  ;;  %v16756_v58 = vld [vmem:[#allocation3 + $0x111] sm:$0xff] }
 0x6e4   : > { %13130 = vmatprep.mubr.msk.f32.mxu0 %vm408_vm1, %v16421_v59  ;;  %v16752_v59 = vld [vmem:[#allocation3 + $0x109] sm:$0xff] }
 0x6e7   : > { %13131 = vmatmul.mubr.msk.f32.gmra.mrb[24].mxu0 %vm408_vm1, %v16425_v0  ;;  %v16746_v0 = vld [vmem:[#allocation3 + $0xf9] sm:$0xff] }
 0x6e8   : > { %13133 = vmatprep.mubr.msk.f32.mxu0 %vm408_vm1, %v16429_v14  ;;  %v16744_v14 = vld [vmem:[#allocation3 + $0x101] sm:$0xff] }
 0x6eb   : > { %13134 = vmatmul.mubr.msk.f32.gmra.mrb[26].mxu0 %vm408_vm1, %v16433_v16  ;;  %v16740_v16 = vld [vmem:[#allocation3 + $0xf1] sm:$0xff] }
 0x6ec   : > { %13136 = vmatprep.mubr.msk.f32.mxu0 %vm408_vm1, %v16437_v21  ;;  %v16736_v21 = vld [vmem:[#allocation3 + $0xe9] sm:$0xff] }
 0x6ef   : > { %13137 = vmatmul.mubr.msk.f32.gmra.mrb[28].mxu0 %vm408_vm1, %v16441_v39  ;;  %v16732_v39 = vld [vmem:[#allocation3 + $0xe1] sm:$0xff] }
 0x6f0   : > { %13139 = vmatprep.mubr.msk.f32.mxu0 %vm408_vm1, %v16445_v8  ;;  %v16728_v8 = vld [vmem:[#allocation3 + $0xd9] sm:$0xff] }
 0x6f3   : > { %13140 = vmatmul.mubr.msk.f32.gmra.mrb[30].mxu0 %vm408_vm1, %v16449_v41  ;;  %v16722_v41 = vld [vmem:[#allocation3 + $0xc9] sm:$0xff] }
 0x6f4   : > { %13142 = vmatprep.mubr.msk.f32.mxu0 %vm408_vm1, %v16453_v33  ;;  %v16720_v33 = vld [vmem:[#allocation3 + $0xd1] sm:$0xff] }
 0x6f7   : > { %13143 = vmatmul.mubr.msk.f32.gmra.mrb[32].mxu0 %vm408_vm1, %v16457_v12  ;;  %v16716_v12 = vld [vmem:[#allocation3 + $0xc1] sm:$0xff] }
 0x6f8   : > { %13145 = vmatprep.mubr.msk.f32.mxu0 %vm408_vm1, %v16461_v48  ;;  %v16712_v48 = vld [vmem:[#allocation3 + $0xb9] sm:$0xff] }
 0x6fb   : > { %13146 = vmatmul.mubr.msk.f32.gmra.mrb[34].mxu0 %vm408_vm1, %v16465_v7  ;;  %v16708_v7 = vld [vmem:[#allocation3 + $0xb1] sm:$0xff] }
 0x6fc   : > { %13148 = vmatprep.mubr.msk.f32.mxu0 %vm408_vm1, %v16469_v46  ;;  %v16704_v46 = vld [vmem:[#allocation3 + $0xa9] sm:$0xff] }
 0x6ff   : > { %13149 = vmatmul.mubr.msk.f32.gmra.mrb[36].mxu0 %vm408_vm1, %v16473_v44  ;;  %v16698_v44 = vld [vmem:[#allocation3 + $0x99] sm:$0xff] }
 0x700   : > { %13151 = vmatprep.mubr.msk.f32.mxu0 %vm408_vm1, %v16477_v45  ;;  %v16696_v45 = vld [vmem:[#allocation3 + $0xa1] sm:$0xff] }
 0x703   : > { %13152 = vmatmul.mubr.msk.f32.gmra.mrb[38].mxu0 %vm408_vm1, %v16481_v15  ;;  %v16692_v15 = vld [vmem:[#allocation3 + $0x91] sm:$0xff] }
 0x704   : > { %13154 = vmatprep.mubr.msk.f32.mxu0 %vm408_vm1, %v16485_v62  ;;  %v16688_v62 = vld [vmem:[#allocation3 + $0x89] sm:$0xff] }
 0x707   : > { %13155 = vmatmul.mubr.msk.f32.gmra.mrb[40].mxu0 %vm408_vm1, %v16489_v23  ;;  %v16684_v23 = vld [vmem:[#allocation3 + $0x81] sm:$0xff] }
 0x708   : > { %13157 = vmatprep.mubr.msk.f32.mxu0 %vm408_vm1, %v16493_v26  ;;  %v16680_v26 = vld [vmem:[#allocation3 + $0x79] sm:$0xff] }
 0x70b   : > { %13158 = vmatmul.mubr.msk.f32.gmra.mrb[42].mxu0 %vm408_vm1, %v16497_v29  ;;  %v16674_v29 = vld [vmem:[#allocation3 + $0x69] sm:$0xff] }
 0x70c   : > { %13160 = vmatprep.mubr.msk.f32.mxu0 %vm408_vm1, %v16501_v20  ;;  %v16672_v20 = vld [vmem:[#allocation3 + $0x71] sm:$0xff] }
 0x70f   : > { %13161 = vmatmul.mubr.msk.f32.gmra.mrb[44].mxu0 %vm408_vm1, %v16505_v2  ;;  %v16668_v2 = vld [vmem:[#allocation3 + $0x61] sm:$0xff] }
 0x710   : > { %13163 = vmatprep.mubr.msk.f32.mxu0 %vm408_vm1, %v16509_v10  ;;  %v16664_v10 = vld [vmem:[#allocation3 + $0x59] sm:$0xff] }
 0x713   : > { %13164 = vmatmul.mubr.msk.f32.gmra.mrb[46].mxu0 %vm408_vm1, %v16609_v55  ;;  %v16660_v55 = vld [vmem:[#allocation3 + $0x51] sm:$0xff] }
 0x714   : > { %13166 = vmatprep.mubr.msk.f32.mxu0 %vm408_vm1, %v16613_v54  ;;  %v16656_v54 = vld [vmem:[#allocation3 + $0x49] sm:$0xff] }
 0x717   : > { %13167 = vmatmul.mubr.msk.f32.gmra.mrb[48].mxu0 %vm408_vm1, %v16617_v47  ;;  %v16640_v47 = vld [vmem:[#allocation3 + $0x29] sm:$0xff] }
 0x718   : > { %13171 = vmatprep.mubr.msk.f32.mxu0 %vm408_vm1, %v5681_v53  ;;  %v16636_v53 = vld [vmem:[#allocation3 + $0x21] sm:$0xff] }
 0x71b   : > { %13172 = vmatmul.mubr.msk.f32.vlgmr.msra.gmra.mrb[2].mxu0 %vm408_vm1, %v5682_v50  ;;  %v16648_v50 = vld [vmem:[#allocation3 + $0x41] sm:$0xff] }
 0x71c   : > { %13244 = vmatpush3.msk.msra.mxu0 %vm5925_vm3, %v11105_v4  ;;  %13174 = vmatprep.mubr.msk.f32.mxu0 %vm408_vm1, %v5683_v51  ;;  %v16644_v4 = vld [vmem:[#allocation3 + $0x31] sm:$0xff]  ;;  %v16650_v51 = vld [vmem:[#allocation3 + $0x39] sm:$0xff] }
 0x71d   : > { %13317 = vmatprep.subr.msk.mxu0 %vm5925_vm3, %v16625_v56 }
 0x71f   : > { %13175 = vmatmul.mubr.msk.f32.gmra.mrb[4].mxu0 %vm408_vm1, %v16632_v57 }
 0x720   : > { %13177 = vmatprep.mubr.msk.f32.mxu0 %vm408_vm1, %v16636_v53 }
 0x723   : > { %13178 = vmatmul.mubr.msk.f32.gmra.mrb[6].mxu0 %vm408_vm1, %v16640_v47 }
 0x724   : > { %13180 = vmatprep.mubr.msk.f32.mxu0 %vm408_vm1, %v16644_v4 }
 0x727   : > { %13181 = vmatmul.mubr.msk.f32.gmra.mrb[8].mxu0 %vm408_vm1, %v16650_v51 }
 0x728   : > { %13183 = vmatprep.mubr.msk.f32.mxu0 %vm408_vm1, %v16648_v50 }
 0x72b   : > { %13184 = vmatmul.mubr.msk.f32.gmra.mrb[10].mxu0 %vm408_vm1, %v16656_v54 }
 0x72c   : > { %13186 = vmatprep.mubr.msk.f32.mxu0 %vm408_vm1, %v16660_v55 }
 0x72f   : > { %13187 = vmatmul.mubr.msk.f32.gmra.mrb[12].mxu0 %vm408_vm1, %v16664_v10 }
 0x730   : > { %13189 = vmatprep.mubr.msk.f32.mxu0 %vm408_vm1, %v16668_v2 }
 0x733   : > { %13190 = vmatmul.mubr.msk.f32.gmra.mrb[14].mxu0 %vm408_vm1, %v16674_v29 }
 0x734   : > { %13192 = vmatprep.mubr.msk.f32.mxu0 %vm408_vm1, %v16672_v20 }
 0x737   : > { %13193 = vmatmul.mubr.msk.f32.gmra.mrb[16].mxu0 %vm408_vm1, %v16680_v26 }
 0x738   : > { %13195 = vmatprep.mubr.msk.f32.mxu0 %vm408_vm1, %v16684_v23 }
 0x73b   : > { %13196 = vmatmul.mubr.msk.f32.gmra.mrb[18].mxu0 %vm408_vm1, %v16688_v62 }
 0x73c   : > { %13198 = vmatprep.mubr.msk.f32.mxu0 %vm408_vm1, %v16692_v15 }
 0x73f   : > { %13199 = vmatmul.mubr.msk.f32.gmra.mrb[20].mxu0 %vm408_vm1, %v16698_v44 }
 0x740   : > { %13201 = vmatprep.mubr.msk.f32.mxu0 %vm408_vm1, %v16696_v45 }
 0x743   : > { %13202 = vmatmul.mubr.msk.f32.gmra.mrb[22].mxu0 %vm408_vm1, %v16704_v46 }
 0x744   : > { %13204 = vmatprep.mubr.msk.f32.mxu0 %vm408_vm1, %v16708_v7 }
 0x747   : > { %13205 = vmatmul.mubr.msk.f32.gmra.mrb[24].mxu0 %vm408_vm1, %v16712_v48 }
 0x748   : > { %13207 = vmatprep.mubr.msk.f32.mxu0 %vm408_vm1, %v16716_v12 }
 0x74b   : > { %13208 = vmatmul.mubr.msk.f32.gmra.mrb[26].mxu0 %vm408_vm1, %v16722_v41 }
 0x74c   : > { %13210 = vmatprep.mubr.msk.f32.mxu0 %vm408_vm1, %v16720_v33 }
 0x74f   : > { %13211 = vmatmul.mubr.msk.f32.gmra.mrb[28].mxu0 %vm408_vm1, %v16728_v8 }
 0x750   : > { %13213 = vmatprep.mubr.msk.f32.mxu0 %vm408_vm1, %v16732_v39 }
 0x753   : > { %13214 = vmatmul.mubr.msk.f32.gmra.mrb[30].mxu0 %vm408_vm1, %v16736_v21 }
 0x754   : > { %13216 = vmatprep.mubr.msk.f32.mxu0 %vm408_vm1, %v16740_v16 }
 0x757   : > { %13217 = vmatmul.mubr.msk.f32.gmra.mrb[32].mxu0 %vm408_vm1, %v16746_v0 }
 0x758   : > { %13219 = vmatprep.mubr.msk.f32.mxu0 %vm408_vm1, %v16744_v14 }
 0x75b   : > { %13220 = vmatmul.mubr.msk.f32.gmra.mrb[34].mxu0 %vm408_vm1, %v16752_v59 }
 0x75c   : > { %13222 = vmatprep.mubr.msk.f32.mxu0 %vm408_vm1, %v16756_v58 }
 0x75f   : > { %13223 = vmatmul.mubr.msk.f32.gmra.mrb[36].mxu0 %vm408_vm1, %v16760_v38 }
 0x760   : > { %13225 = vmatprep.mubr.msk.f32.mxu0 %vm408_vm1, %v16764_v28 }
 0x763   : > { %13226 = vmatmul.mubr.msk.f32.gmra.mrb[38].mxu0 %vm408_vm1, %v16770_v9 }
 0x764   : > { %13228 = vmatprep.mubr.msk.f32.mxu0 %vm408_vm1, %v16768_v37 }
 0x767   : > { %13229 = vmatmul.mubr.msk.f32.gmra.mrb[40].mxu0 %vm408_vm1, %v16776_v30 }
 0x768   : > { %13231 = vmatprep.mubr.msk.f32.mxu0 %vm408_vm1, %v16780_v5 }
 0x76b   : > { %13232 = vmatmul.mubr.msk.f32.gmra.mrb[42].mxu0 %vm408_vm1, %v16784_v13 }
 0x76c   : > { %13234 = vmatprep.mubr.msk.f32.mxu0 %vm408_vm1, %v16788_v27 }
 0x76f   : > { %13235 = vmatmul.mubr.msk.f32.gmra.mrb[44].mxu0 %vm408_vm1, %v16794_v22 }
 0x770   : > { %13237 = vmatprep.mubr.msk.f32.mxu0 %vm408_vm1, %v16792_v17 }
 0x773   : > { %13238 = vmatmul.mubr.msk.f32.gmra.mrb[46].mxu0 %vm408_vm1, %v16800_v3 }
 0x774   : > { %13240 = vmatprep.mubr.msk.f32.mxu0 %vm408_vm1, %v16804_v18 }
 0x777   : > { %13241 = vmatmul.mubr.msk.f32.gmra.mrb[48].mxu0 %vm408_vm1, %v16808_v19 }
 0x778   : > { %13245 = vmatprep.mubr.msk.f32.mxu0 %vm408_vm1, %v16632_v57  ;;  %v16916_v57 = vld [vmem:[#allocation3 + $0x191] sm:$0xff] }
 0x779   : > { %17849 = vst [vmem:[#allocation49_spill] sm:$0xff] %v16916_v57 }
 0x77b   : > { %13246 = vmatmul.mubr.msk.f32.vlgmr.msra.gmra.mrb[2].mxu0 %vm408_vm1, %v16636_v53  ;;  %v8094_v53 = vld [vmem:[#allocation3 + $0x1a] sm:$0xff] }
 0x77c   : > { %13318 = vmatpush3.msk.msra.mxu0 %vm5925_vm3, %v16625_v56  ;;  %13248 = vmatprep.mubr.msk.f32.mxu0 %vm408_vm1, %v16640_v47  ;;  %v16908_v47 = vld [vmem:[#allocation3 + $0x181] sm:$0xff]  ;;  %v16912_v56 = vld [vmem:[#allocation3 + $0x189] sm:$0xff] }
 0x77d   : > { %13391 = vmatprep.subr.msk.mxu0 %vm5925_vm3, %v11205_v11  ;;  %17847 = vst [vmem:[#allocation47_spill] sm:$0xff] %v16908_v47  ;;  %17848 = vst [vmem:[#allocation48_spill] sm:$0xff] %v16912_v56 }
 0x77f   : > { %13249 = vmatmul.mubr.msk.f32.gmra.mrb[4].mxu0 %vm408_vm1, %v16644_v4 }
 0x780   : > { %13251 = vmatprep.mubr.msk.f32.mxu0 %vm408_vm1, %v16650_v51 }
 0x783   : > { %13252 = vmatmul.mubr.msk.f32.gmra.mrb[6].mxu0 %vm408_vm1, %v16648_v50 }
 0x784   : > { %13254 = vmatprep.mubr.msk.f32.mxu0 %vm408_vm1, %v16656_v54 }
 0x787   : > { %13255 = vmatmul.mubr.msk.f32.gmra.mrb[8].mxu0 %vm408_vm1, %v16660_v55 }
 0x788   : > { %13257 = vmatprep.mubr.msk.f32.mxu0 %vm408_vm1, %v16664_v10 }
 0x78b   : > { %13258 = vmatmul.mubr.msk.f32.gmra.mrb[10].mxu0 %vm408_vm1, %v16668_v2 }
 0x78c   : > { %13260 = vmatprep.mubr.msk.f32.mxu0 %vm408_vm1, %v16674_v29 }
 0x78f   : > { %13261 = vmatmul.mubr.msk.f32.gmra.mrb[12].mxu0 %vm408_vm1, %v16672_v20 }
 0x790   : > { %13263 = vmatprep.mubr.msk.f32.mxu0 %vm408_vm1, %v16680_v26 }
 0x793   : > { %13264 = vmatmul.mubr.msk.f32.gmra.mrb[14].mxu0 %vm408_vm1, %v16684_v23 }
 0x794   : > { %13266 = vmatprep.mubr.msk.f32.mxu0 %vm408_vm1, %v16688_v62 }
 0x797   : > { %13267 = vmatmul.mubr.msk.f32.gmra.mrb[16].mxu0 %vm408_vm1, %v16692_v15 }
 0x798   : > { %13269 = vmatprep.mubr.msk.f32.mxu0 %vm408_vm1, %v16698_v44 }
 0x79b   : > { %13270 = vmatmul.mubr.msk.f32.gmra.mrb[18].mxu0 %vm408_vm1, %v16696_v45 }
 0x79c   : > { %13272 = vmatprep.mubr.msk.f32.mxu0 %vm408_vm1, %v16704_v46 }
 0x79f   : > { %13273 = vmatmul.mubr.msk.f32.gmra.mrb[20].mxu0 %vm408_vm1, %v16708_v7 }
 0x7a0   : > { %13275 = vmatprep.mubr.msk.f32.mxu0 %vm408_vm1, %v16712_v48 }
 0x7a3   : > { %13276 = vmatmul.mubr.msk.f32.gmra.mrb[22].mxu0 %vm408_vm1, %v16716_v12 }
 0x7a4   : > { %13278 = vmatprep.mubr.msk.f32.mxu0 %vm408_vm1, %v16722_v41 }
 0x7a7   : > { %13279 = vmatmul.mubr.msk.f32.gmra.mrb[24].mxu0 %vm408_vm1, %v16720_v33 }
 0x7a8   : > { %13281 = vmatprep.mubr.msk.f32.mxu0 %vm408_vm1, %v16728_v8 }
 0x7ab   : > { %13282 = vmatmul.mubr.msk.f32.gmra.mrb[26].mxu0 %vm408_vm1, %v16732_v39 }
 0x7ac   : > { %13284 = vmatprep.mubr.msk.f32.mxu0 %vm408_vm1, %v16736_v21 }
 0x7af   : > { %13285 = vmatmul.mubr.msk.f32.gmra.mrb[28].mxu0 %vm408_vm1, %v16740_v16 }
 0x7b0   : > { %13287 = vmatprep.mubr.msk.f32.mxu0 %vm408_vm1, %v16746_v0 }
 0x7b3   : > { %13288 = vmatmul.mubr.msk.f32.gmra.mrb[30].mxu0 %vm408_vm1, %v16744_v14 }
 0x7b4   : > { %13290 = vmatprep.mubr.msk.f32.mxu0 %vm408_vm1, %v16752_v59 }
 0x7b7   : > { %13291 = vmatmul.mubr.msk.f32.gmra.mrb[32].mxu0 %vm408_vm1, %v16756_v58 }
 0x7b8   : > { %13293 = vmatprep.mubr.msk.f32.mxu0 %vm408_vm1, %v16760_v38 }
 0x7bb   : > { %13294 = vmatmul.mubr.msk.f32.gmra.mrb[34].mxu0 %vm408_vm1, %v16764_v28 }
 0x7bc   : > { %13296 = vmatprep.mubr.msk.f32.mxu0 %vm408_vm1, %v16770_v9 }
 0x7bf   : > { %13297 = vmatmul.mubr.msk.f32.gmra.mrb[36].mxu0 %vm408_vm1, %v16768_v37 }
 0x7c0   : > { %13299 = vmatprep.mubr.msk.f32.mxu0 %vm408_vm1, %v16776_v30 }
 0x7c3   : > { %13300 = vmatmul.mubr.msk.f32.gmra.mrb[38].mxu0 %vm408_vm1, %v16780_v5 }
 0x7c4   : > { %13302 = vmatprep.mubr.msk.f32.mxu0 %vm408_vm1, %v16784_v13 }
 0x7c7   : > { %13303 = vmatmul.mubr.msk.f32.gmra.mrb[40].mxu0 %vm408_vm1, %v16788_v27 }
 0x7c8   : > { %13305 = vmatprep.mubr.msk.f32.mxu0 %vm408_vm1, %v16794_v22 }
 0x7cb   : > { %13306 = vmatmul.mubr.msk.f32.gmra.mrb[42].mxu0 %vm408_vm1, %v16792_v17 }
 0x7cc   : > { %13308 = vmatprep.mubr.msk.f32.mxu0 %vm408_vm1, %v16800_v3 }
 0x7cf   : > { %13309 = vmatmul.mubr.msk.f32.gmra.mrb[44].mxu0 %vm408_vm1, %v16804_v18  ;;  %v8095_v18 = vld [vmem:[#allocation3 + $0x22] sm:$0xff] }
 0x7d0   : > { %13311 = vmatprep.mubr.msk.f32.mxu0 %vm408_vm1, %v16808_v19  ;;  %v16924_v19 = vld [vmem:[%s17510_s4 + $0x1c] sm:$0xf] }
 0x7d3   : > { %13312 = vmatmul.mubr.msk.f32.gmra.mrb[46].mxu0 %vm408_vm1, %v16908_v47  ;;  %v8096_v47 = vld [vmem:[#allocation3 + $0x2a] sm:$0xff] }
 0x7d4   : > { %13314 = vmatprep.mubr.msk.f32.mxu0 %vm408_vm1, %v16912_v56  ;;  %v16939_v56 = vld [vmem:[#allocation3 + $0x42] sm:$0xff] }
 0x7d5   : > { %17851 = vst [vmem:[#allocation51_spill] sm:$0xff] %v16939_v56 }
 0x7d7   : > { %13315 = vmatmul.mubr.msk.f32.gmra.mrb[48].mxu0 %vm408_vm1, %v16916_v57  ;;  %v16931_v57 = vld [vmem:[#allocation3 + $0x32] sm:$0xff] }
 0x7d8   : > { %13319 = vmatprep.mubr.msk.f32.mxu0 %vm408_vm1, %v8094_v53  ;;  %v16935_v53 = vld [vmem:[#allocation3 + $0x3a] sm:$0xff] }
 0x7d9   : > { %17850 = vst [vmem:[#allocation50_spill] sm:$0xff] %v16935_v53 }
 0x7db   : > { %13320 = vmatmul.mubr.msk.f32.vlgmr.msra.gmra.mrb[2].mxu0 %vm408_vm1, %v8095_v18  ;;  %v16947_v18 = vld [vmem:[#allocation3 + $0x52] sm:$0xff] }
 0x7dc   : > { %13392 = vmatpush3.msk.msra.mxu0 %vm5925_vm3, %v11205_v11  ;;  %13322 = vmatprep.mubr.msk.f32.mxu0 %vm408_vm1, %v8096_v47  ;;  %v16943_v11 = vld [vmem:[#allocation3 + $0x4a] sm:$0xff]  ;;  %17853 = vst [vmem:[#allocation53_spill] sm:$0xff] %v16947_v18  ;;  %v16951_v47 = vld [vmem:[#allocation3 + $0x5a] sm:$0xff] }
 0x7dd   : > { %13465 = vmatprep.subr.msk.mxu0 %vm5925_vm3, %v16924_v19  ;;  %17852 = vst [vmem:[#allocation52_spill] sm:$0xff] %v16943_v11  ;;  %17854 = vst [vmem:[#allocation54_spill] sm:$0xff] %v16951_v47 }
 0x7df   : > { %13323 = vmatmul.mubr.msk.f32.gmra.mrb[4].mxu0 %vm408_vm1, %v16931_v57 }
 0x7e0   : > { %13325 = vmatprep.mubr.msk.f32.mxu0 %vm408_vm1, %v16935_v53  ;;  %v16955_v53 = vld [vmem:[#allocation3 + $0x62] sm:$0xff] }
 0x7e1   : > { %17855 = vst [vmem:[#allocation55_spill] sm:$0xff] %v16955_v53 }
 0x7e3   : > { %13326 = vmatmul.mubr.msk.f32.gmra.mrb[6].mxu0 %vm408_vm1, %v16939_v56  ;;  %v16959_v56 = vld [vmem:[#allocation3 + $0x6a] sm:$0xff] }
 0x7e4   : > { %13328 = vmatprep.mubr.msk.f32.mxu0 %vm408_vm1, %v16943_v11  ;;  %17856 = vst [vmem:[#allocation56_spill] sm:$0xff] %v16959_v56  ;;  %v16963_v11 = vld [vmem:[#allocation3 + $0x72] sm:$0xff] }
 0x7e5   : > { %17857 = vst [vmem:[#allocation57_spill] sm:$0xff] %v16963_v11 }
 0x7e7   : > { %13329 = vmatmul.mubr.msk.f32.gmra.mrb[8].mxu0 %vm408_vm1, %v16947_v18  ;;  %v16967_v18 = vld [vmem:[#allocation3 + $0x7a] sm:$0xff] }
 0x7e8   : > { %13331 = vmatprep.mubr.msk.f32.mxu0 %vm408_vm1, %v16951_v47  ;;  %17858 = vst [vmem:[#allocation58_spill] sm:$0xff] %v16967_v18  ;;  %v16971_v47 = vld [vmem:[#allocation3 + $0x82] sm:$0xff] }
 0x7e9   : > { %17859 = vst [vmem:[#allocation59_spill] sm:$0xff] %v16971_v47 }
 0x7eb   : > { %13332 = vmatmul.mubr.msk.f32.gmra.mrb[10].mxu0 %vm408_vm1, %v16955_v53  ;;  %v16975_v53 = vld [vmem:[#allocation3 + $0x8a] sm:$0xff] }
 0x7ec   : > { %13334 = vmatprep.mubr.msk.f32.mxu0 %vm408_vm1, %v16959_v56  ;;  %17860 = vst [vmem:[#allocation60_spill] sm:$0xff] %v16975_v53  ;;  %v16979_v56 = vld [vmem:[#allocation3 + $0x92] sm:$0xff] }
 0x7ed   : > { %17861 = vst [vmem:[#allocation61_spill] sm:$0xff] %v16979_v56 }
 0x7ef   : > { %13335 = vmatmul.mubr.msk.f32.gmra.mrb[12].mxu0 %vm408_vm1, %v16963_v11  ;;  %v16983_v11 = vld [vmem:[#allocation3 + $0x9a] sm:$0xff] }
 0x7f0   : > { %13337 = vmatprep.mubr.msk.f32.mxu0 %vm408_vm1, %v16967_v18  ;;  %17862 = vst [vmem:[#allocation62_spill] sm:$0xff] %v16983_v11  ;;  %v16987_v18 = vld [vmem:[#allocation3 + $0xa2] sm:$0xff] }
 0x7f1   : > { %17863 = vst [vmem:[#allocation63_spill] sm:$0xff] %v16987_v18 }
 0x7f3   : > { %13338 = vmatmul.mubr.msk.f32.gmra.mrb[14].mxu0 %vm408_vm1, %v16971_v47  ;;  %v16991_v47 = vld [vmem:[#allocation3 + $0xaa] sm:$0xff] }
 0x7f4   : > { %13340 = vmatprep.mubr.msk.f32.mxu0 %vm408_vm1, %v16975_v53  ;;  %17864 = vst [vmem:[#allocation64_spill] sm:$0xff] %v16991_v47  ;;  %v16995_v53 = vld [vmem:[#allocation3 + $0xb2] sm:$0xff] }
 0x7f5   : > { %17865 = vst [vmem:[#allocation65_spill] sm:$0xff] %v16995_v53 }
 0x7f7   : > { %13341 = vmatmul.mubr.msk.f32.gmra.mrb[16].mxu0 %vm408_vm1, %v16979_v56  ;;  %v16999_v56 = vld [vmem:[#allocation3 + $0xba] sm:$0xff] }
 0x7f8   : > { %13343 = vmatprep.mubr.msk.f32.mxu0 %vm408_vm1, %v16983_v11  ;;  %17866 = vst [vmem:[#allocation66_spill] sm:$0xff] %v16999_v56  ;;  %v17003_v11 = vld [vmem:[#allocation3 + $0xc2] sm:$0xff] }
 0x7f9   : > { %17867 = vst [vmem:[#allocation67_spill] sm:$0xff] %v17003_v11 }
 0x7fb   : > { %13344 = vmatmul.mubr.msk.f32.gmra.mrb[18].mxu0 %vm408_vm1, %v16987_v18  ;;  %v17007_v18 = vld [vmem:[#allocation3 + $0xca] sm:$0xff] }
 0x7fc   : > { %13346 = vmatprep.mubr.msk.f32.mxu0 %vm408_vm1, %v16991_v47  ;;  %17868 = vst [vmem:[#allocation68_spill] sm:$0xff] %v17007_v18  ;;  %v17011_v47 = vld [vmem:[#allocation3 + $0xd2] sm:$0xff] }
 0x7fd   : > { %17869 = vst [vmem:[#allocation69_spill] sm:$0xff] %v17011_v47 }
 0x7ff   : > { %13347 = vmatmul.mubr.msk.f32.gmra.mrb[20].mxu0 %vm408_vm1, %v16995_v53  ;;  %v17015_v53 = vld [vmem:[#allocation3 + $0xda] sm:$0xff] }
 0x800   : > { %13349 = vmatprep.mubr.msk.f32.mxu0 %vm408_vm1, %v16999_v56  ;;  %17870 = vst [vmem:[#allocation70_spill] sm:$0xff] %v17015_v53  ;;  %v17019_v56 = vld [vmem:[#allocation3 + $0xe2] sm:$0xff] }
 0x801   : > { %17871 = vst [vmem:[#allocation71_spill] sm:$0xff] %v17019_v56 }
 0x803   : > { %13350 = vmatmul.mubr.msk.f32.gmra.mrb[22].mxu0 %vm408_vm1, %v17003_v11  ;;  %v17023_v11 = vld [vmem:[#allocation3 + $0xea] sm:$0xff] }
 0x804   : > { %13352 = vmatprep.mubr.msk.f32.mxu0 %vm408_vm1, %v17007_v18  ;;  %17872 = vst [vmem:[#allocation72_spill] sm:$0xff] %v17023_v11  ;;  %v17027_v18 = vld [vmem:[#allocation3 + $0xf2] sm:$0xff] }
 0x807   : > { %13353 = vmatmul.mubr.msk.f32.gmra.mrb[24].mxu0 %vm408_vm1, %v17011_v47  ;;  %v17031_v47 = vld [vmem:[#allocation3 + $0xfa] sm:$0xff] }
 0x808   : > { %13355 = vmatprep.mubr.msk.f32.mxu0 %vm408_vm1, %v17015_v53  ;;  %v17035_v53 = vld [vmem:[#allocation3 + $0x102] sm:$0xff] }
 0x80b   : > { %13356 = vmatmul.mubr.msk.f32.gmra.mrb[26].mxu0 %vm408_vm1, %v17019_v56  ;;  %v17039_v56 = vld [vmem:[#allocation3 + $0x10a] sm:$0xff] }
 0x80c   : > { %13358 = vmatprep.mubr.msk.f32.mxu0 %vm408_vm1, %v17023_v11  ;;  %v17043_v11 = vld [vmem:[#allocation3 + $0x112] sm:$0xff] }
 0x80f   : > { %13359 = vmatmul.mubr.msk.f32.gmra.mrb[28].mxu0 %vm408_vm1, %v17027_v18 }
 0x810   : > { %13361 = vmatprep.mubr.msk.f32.mxu0 %vm408_vm1, %v17031_v47 }
 0x813   : > { %13362 = vmatmul.mubr.msk.f32.gmra.mrb[30].mxu0 %vm408_vm1, %v17035_v53 }
 0x814   : > { %13364 = vmatprep.mubr.msk.f32.mxu0 %vm408_vm1, %v17039_v56 }
 0x817   : > { %13365 = vmatmul.mubr.msk.f32.gmra.mrb[32].mxu0 %vm408_vm1, %v17043_v11 }
 0x818   : > { %13367 = vmatprep.mubr.msk.f32.mxu0 %vm408_vm1, %v16253_v24  ;;  %v17073_v24 = vld [vmem:[#allocation3 + $0x182] sm:$0xff] }
 0x81b   : > { %13368 = vmatmul.mubr.msk.f32.gmra.mrb[34].mxu0 %vm408_vm1, %v16259_v31  ;;  %v17077_v31 = vld [vmem:[#allocation3 + $0x18a] sm:$0xff] }
 0x81c   : > { %13370 = vmatprep.mubr.msk.f32.mxu0 %vm408_vm1, %v16261_v34  ;;  %v17081_v34 = vld [vmem:[#allocation3 + $0x192] sm:$0xff] }
 0x81f   : > { %13371 = vmatmul.mubr.msk.f32.gmra.mrb[36].mxu0 %vm408_vm1, %v16271_v42  ;;  %v11305_v42 = vld [vmem:[%s17510_s4 + $0x20] sm:$0xf] }
 0x820   : > { %13373 = vmatprep.mubr.msk.f32.mxu0 %vm408_vm1, %v16273_v43  ;;  %v17873_v43 = vld [vmem:[#allocation4_spill] sm:$0xff] }
 0x823   : > { %13374 = vmatmul.mubr.msk.f32.gmra.mrb[38].mxu0 %vm408_vm1, %v16282_v63  ;;  %v17874_v63 = vld [vmem:[#allocation5_spill] sm:$0xff] }
 0x824   : > { %13376 = vmatprep.mubr.msk.f32.mxu0 %vm408_vm1, %v16289_v32  ;;  %v17875_v32 = vld [vmem:[#allocation6_spill] sm:$0xff] }
 0x827   : > { %13377 = vmatmul.mubr.msk.f32.gmra.mrb[40].mxu0 %vm408_vm1, %v16295_v6  ;;  %v17876_v6 = vld [vmem:[#allocation7_spill] sm:$0xff] }
 0x828   : > { %13379 = vmatprep.mubr.msk.f32.mxu0 %vm408_vm1, %v16297_v40  ;;  %v17877_v40 = vld [vmem:[#allocation8_spill] sm:$0xff] }
 0x82b   : > { %13380 = vmatmul.mubr.msk.f32.gmra.mrb[42].mxu0 %vm408_vm1, %v16304_v49  ;;  %v17878_v49 = vld [vmem:[#allocation9_spill] sm:$0xff] }
 0x82c   : > { %13382 = vmatprep.mubr.msk.f32.mxu0 %vm408_vm1, %v16306_v52  ;;  %v17879_v52 = vld [vmem:[#allocation10_spill] sm:$0xff] }
 0x82f   : > { %13383 = vmatmul.mubr.msk.f32.gmra.mrb[44].mxu0 %vm408_vm1, %v16313_v36  ;;  %v17880_v36 = vld [vmem:[#allocation11_spill] sm:$0xff] }
 0x830   : > { %13385 = vmatprep.mubr.msk.f32.mxu0 %vm408_vm1, %v16317_v25  ;;  %v17881_v25 = vld [vmem:[#allocation12_spill] sm:$0xff] }
 0x833   : > { %13386 = vmatmul.mubr.msk.f32.gmra.mrb[46].mxu0 %vm408_vm1, %v17073_v24 }
 0x834   : > { %13388 = vmatprep.mubr.msk.f32.mxu0 %vm408_vm1, %v17077_v31 }
 0x837   : > { %13389 = vmatmul.mubr.msk.f32.gmra.mrb[48].mxu0 %vm408_vm1, %v17081_v34 }
 0x838   : > { %13393 = vmatprep.mubr.msk.f32.mxu0 %vm408_vm1, %v16345_v35  ;;  %v17882_v35 = vld [vmem:[#allocation13_spill] sm:$0xff] }
 0x83b   : > { %13394 = vmatmul.mubr.msk.f32.vlgmr.msra.gmra.mrb[2].mxu0 %vm408_vm1, %v16349_v60  ;;  %v17883_v60 = vld [vmem:[#allocation14_spill] sm:$0xff] }
 0x83c   : > { %13466 = vmatpush3.msk.msra.mxu0 %vm5925_vm3, %v16924_v19  ;;  %13396 = vmatprep.mubr.msk.f32.mxu0 %vm408_vm1, %v16353_v61  ;;  %v17884_v61 = vld [vmem:[#allocation15_spill] sm:$0xff]  ;;  %v17886_v19 = vld [vmem:[#allocation17_spill] sm:$0xff] }
 0x83d   : > { %13539 = vmatprep.subr.msk.mxu0 %vm5925_vm3, %v11305_v42 }
 0x83f   : > { %13397 = vmatmul.mubr.msk.f32.gmra.mrb[4].mxu0 %vm408_vm1, %v16357_v1  ;;  %v17885_v1 = vld [vmem:[#allocation16_spill] sm:$0xff] }
 0x840   : > { %13399 = vmatprep.mubr.msk.f32.mxu0 %vm408_vm1, %v17873_v43  ;;  %v17887_v43 = vld [vmem:[#allocation18_spill] sm:$0xff] }
 0x843   : > { %13400 = vmatmul.mubr.msk.f32.gmra.mrb[6].mxu0 %vm408_vm1, %v17874_v63  ;;  %v17888_v63 = vld [vmem:[#allocation19_spill] sm:$0xff] }
 0x844   : > { %13402 = vmatprep.mubr.msk.f32.mxu0 %vm408_vm1, %v17875_v32  ;;  %v17889_v32 = vld [vmem:[#allocation20_spill] sm:$0xff] }
 0x847   : > { %13403 = vmatmul.mubr.msk.f32.gmra.mrb[8].mxu0 %vm408_vm1, %v17876_v6  ;;  %v17890_v6 = vld [vmem:[#allocation21_spill] sm:$0xff] }
 0x848   : > { %13405 = vmatprep.mubr.msk.f32.mxu0 %vm408_vm1, %v17877_v40  ;;  %v17891_v40 = vld [vmem:[#allocation22_spill] sm:$0xff] }
 0x84b   : > { %13406 = vmatmul.mubr.msk.f32.gmra.mrb[10].mxu0 %vm408_vm1, %v17878_v49  ;;  %v17892_v49 = vld [vmem:[#allocation23_spill] sm:$0xff] }
 0x84c   : > { %13408 = vmatprep.mubr.msk.f32.mxu0 %vm408_vm1, %v17879_v52  ;;  %v17893_v52 = vld [vmem:[#allocation24_spill] sm:$0xff] }
 0x84f   : > { %13409 = vmatmul.mubr.msk.f32.gmra.mrb[12].mxu0 %vm408_vm1, %v17880_v36  ;;  %v17894_v36 = vld [vmem:[#allocation25_spill] sm:$0xff] }
 0x850   : > { %13411 = vmatprep.mubr.msk.f32.mxu0 %vm408_vm1, %v17881_v25  ;;  %v17895_v25 = vld [vmem:[#allocation26_spill] sm:$0xff] }
 0x853   : > { %13412 = vmatmul.mubr.msk.f32.gmra.mrb[14].mxu0 %vm408_vm1, %v17882_v35  ;;  %v17896_v35 = vld [vmem:[#allocation27_spill] sm:$0xff] }
 0x854   : > { %13414 = vmatprep.mubr.msk.f32.mxu0 %vm408_vm1, %v17883_v60  ;;  %v17897_v60 = vld [vmem:[#allocation28_spill] sm:$0xff] }
 0x857   : > { %13415 = vmatmul.mubr.msk.f32.gmra.mrb[16].mxu0 %vm408_vm1, %v17884_v61  ;;  %v17898_v61 = vld [vmem:[#allocation29_spill] sm:$0xff] }
 0x858   : > { %13417 = vmatprep.mubr.msk.f32.mxu0 %vm408_vm1, %v17885_v1  ;;  %v17899_v1 = vld [vmem:[#allocation30_spill] sm:$0xff] }
 0x85b   : > { %13418 = vmatmul.mubr.msk.f32.gmra.mrb[18].mxu0 %vm408_vm1, %v17886_v19  ;;  %v17900_v19 = vld [vmem:[#allocation31_spill] sm:$0xff] }
 0x85c   : > { %13420 = vmatprep.mubr.msk.f32.mxu0 %vm408_vm1, %v17887_v43  ;;  %v17901_v43 = vld [vmem:[#allocation32_spill] sm:$0xff] }
 0x85f   : > { %13421 = vmatmul.mubr.msk.f32.gmra.mrb[20].mxu0 %vm408_vm1, %v17888_v63  ;;  %v17902_v63 = vld [vmem:[#allocation33_spill] sm:$0xff] }
 0x860   : > { %13423 = vmatprep.mubr.msk.f32.mxu0 %vm408_vm1, %v17889_v32  ;;  %v17903_v32 = vld [vmem:[#allocation34_spill] sm:$0xff] }
 0x863   : > { %13424 = vmatmul.mubr.msk.f32.gmra.mrb[22].mxu0 %vm408_vm1, %v17890_v6  ;;  %v17904_v6 = vld [vmem:[#allocation35_spill] sm:$0xff] }
 0x864   : > { %13426 = vmatprep.mubr.msk.f32.mxu0 %vm408_vm1, %v17891_v40  ;;  %v17905_v40 = vld [vmem:[#allocation36_spill] sm:$0xff] }
 0x867   : > { %13427 = vmatmul.mubr.msk.f32.gmra.mrb[24].mxu0 %vm408_vm1, %v17892_v49  ;;  %v17906_v49 = vld [vmem:[#allocation37_spill] sm:$0xff] }
 0x868   : > { %13429 = vmatprep.mubr.msk.f32.mxu0 %vm408_vm1, %v17893_v52  ;;  %v17907_v52 = vld [vmem:[#allocation38_spill] sm:$0xff] }
 0x86b   : > { %13430 = vmatmul.mubr.msk.f32.gmra.mrb[26].mxu0 %vm408_vm1, %v17894_v36  ;;  %v17908_v36 = vld [vmem:[#allocation39_spill] sm:$0xff] }
 0x86c   : > { %13432 = vmatprep.mubr.msk.f32.mxu0 %vm408_vm1, %v17895_v25  ;;  %v17909_v25 = vld [vmem:[#allocation40_spill] sm:$0xff] }
 0x86f   : > { %13433 = vmatmul.mubr.msk.f32.gmra.mrb[28].mxu0 %vm408_vm1, %v17896_v35  ;;  %v17910_v35 = vld [vmem:[#allocation41_spill] sm:$0xff] }
 0x870   : > { %13435 = vmatprep.mubr.msk.f32.mxu0 %vm408_vm1, %v17897_v60  ;;  %v17911_v60 = vld [vmem:[#allocation42_spill] sm:$0xff] }
 0x873   : > { %13436 = vmatmul.mubr.msk.f32.gmra.mrb[30].mxu0 %vm408_vm1, %v17898_v61  ;;  %v17912_v61 = vld [vmem:[#allocation43_spill] sm:$0xff] }
 0x874   : > { %13438 = vmatprep.mubr.msk.f32.mxu0 %vm408_vm1, %v17899_v1  ;;  %v17913_v1 = vld [vmem:[#allocation44_spill] sm:$0xff] }
 0x877   : > { %13439 = vmatmul.mubr.msk.f32.gmra.mrb[32].mxu0 %vm408_vm1, %v17900_v19  ;;  %v8657_v19 = vld [vmem:[#allocation3 + $0x198] sm:$0xff] }
 0x878   : > { %13441 = vmatprep.mubr.msk.f32.mxu0 %vm408_vm1, %v17901_v43  ;;  %v8658_v43 = vld [vmem:[#allocation3 + $0x1a0] sm:$0xff] }
 0x87b   : > { %13442 = vmatmul.mubr.msk.f32.gmra.mrb[34].mxu0 %vm408_vm1, %v17902_v63  ;;  %v8659_v63 = vld [vmem:[#allocation3 + $0x1a8] sm:$0xff] }
 0x87c   : > { %13444 = vmatprep.mubr.msk.f32.mxu0 %vm408_vm1, %v17903_v32 }
 0x87f   : > { %13445 = vmatmul.mubr.msk.f32.gmra.mrb[36].mxu0 %vm408_vm1, %v17904_v6 }
 0x880   : > { %13447 = vmatprep.mubr.msk.f32.mxu0 %vm408_vm1, %v17905_v40 }
 0x883   : > { %13448 = vmatmul.mubr.msk.f32.gmra.mrb[38].mxu0 %vm408_vm1, %v17906_v49 }
 0x884   : > { %13450 = vmatprep.mubr.msk.f32.mxu0 %vm408_vm1, %v17907_v52 }
 0x887   : > { %13451 = vmatmul.mubr.msk.f32.gmra.mrb[40].mxu0 %vm408_vm1, %v17908_v36 }
 0x888   : > { %13453 = vmatprep.mubr.msk.f32.mxu0 %vm408_vm1, %v17909_v25 }
 0x88b   : > { %13454 = vmatmul.mubr.msk.f32.gmra.mrb[42].mxu0 %vm408_vm1, %v17910_v35 }
 0x88c   : > { %13456 = vmatprep.mubr.msk.f32.mxu0 %vm408_vm1, %v17911_v60 }
 0x88f   : > { %13457 = vmatmul.mubr.msk.f32.gmra.mrb[44].mxu0 %vm408_vm1, %v17912_v61 }
 0x890   : > { %13459 = vmatprep.mubr.msk.f32.mxu0 %vm408_vm1, %v17913_v1 }
 0x893   : > { %13460 = vmatmul.mubr.msk.f32.gmra.mrb[46].mxu0 %vm408_vm1, %v8657_v19 }
 0x894   : > { %13462 = vmatprep.mubr.msk.f32.mxu0 %vm408_vm1, %v8658_v43 }
 0x897   : > { %13463 = vmatmul.mubr.msk.f32.gmra.mrb[48].mxu0 %vm408_vm1, %v8659_v63 }
 0x898   : > { %13467 = vmatprep.mubr.msk.f32.mxu0 %vm408_vm1, %v16644_v4  ;;  %v9683_v4 = vld [vmem:[#allocation3 + $0x14a] sm:$0xff] }
 0x89b   : > { %13468 = vmatmul.mubr.msk.f32.vlgmr.msra.gmra.mrb[2].mxu0 %vm408_vm1, %v16650_v51  ;;  %v9685_v51 = vld [vmem:[#allocation3 + $0x15a] sm:$0xff] }
 0x89c   : > { %13540 = vmatpush3.msk.msra.mxu0 %vm5925_vm3, %v11305_v42  ;;  %13470 = vmatprep.mubr.msk.f32.mxu0 %vm408_vm1, %v16648_v50  ;;  %v9684_v50 = vld [vmem:[#allocation3 + $0x152] sm:$0xff]  ;;  %v9695_v42 = vld [vmem:[#allocation3 + $0x1aa] sm:$0xff] }
 0x89f   : > { %13471 = vmatmul.mubr.msk.f32.gmra.mrb[4].mxu0 %vm408_vm1, %v16656_v54  ;;  %v9682_v54 = vld [vmem:[#allocation3 + $0x142] sm:$0xff] }
 0x8a0   : > { %13473 = vmatprep.mubr.msk.f32.mxu0 %vm408_vm1, %v16660_v55  ;;  %v9681_v55 = vld [vmem:[#allocation3 + $0x13a] sm:$0xff] }
 0x8a3   : > { %13474 = vmatmul.mubr.msk.f32.gmra.mrb[6].mxu0 %vm408_vm1, %v16664_v10  ;;  %v9680_v10 = vld [vmem:[#allocation3 + $0x132] sm:$0xff] }
 0x8a4   : > { %13476 = vmatprep.mubr.msk.f32.mxu0 %vm408_vm1, %v16668_v2  ;;  %v9679_v2 = vld [vmem:[#allocation3 + $0x12a] sm:$0xff] }
 0x8a7   : > { %13477 = vmatmul.mubr.msk.f32.gmra.mrb[8].mxu0 %vm408_vm1, %v16674_v29  ;;  %v9677_v29 = vld [vmem:[#allocation3 + $0x11a] sm:$0xff] }
 0x8a8   : > { %13479 = vmatprep.mubr.msk.f32.mxu0 %vm408_vm1, %v16672_v20  ;;  %v9678_v20 = vld [vmem:[#allocation3 + $0x122] sm:$0xff] }
 0x8ab   : > { %13480 = vmatmul.mubr.msk.f32.gmra.mrb[10].mxu0 %vm408_vm1, %v16680_v26  ;;  %v17941_v26 = vld [vmem:[#allocation72_spill] sm:$0xff] }
 0x8ac   : > { %13482 = vmatprep.mubr.msk.f32.mxu0 %vm408_vm1, %v16684_v23  ;;  %v17940_v23 = vld [vmem:[#allocation71_spill] sm:$0xff] }
 0x8af   : > { %13483 = vmatmul.mubr.msk.f32.gmra.mrb[12].mxu0 %vm408_vm1, %v16688_v62  ;;  %v17939_v62 = vld [vmem:[#allocation70_spill] sm:$0xff] }
 0x8b0   : > { %13485 = vmatprep.mubr.msk.f32.mxu0 %vm408_vm1, %v16692_v15  ;;  %v17938_v15 = vld [vmem:[#allocation69_spill] sm:$0xff] }
 0x8b3   : > { %13486 = vmatmul.mubr.msk.f32.gmra.mrb[14].mxu0 %vm408_vm1, %v16698_v44  ;;  %v17936_v44 = vld [vmem:[#allocation67_spill] sm:$0xff] }
 0x8b4   : > { %13488 = vmatprep.mubr.msk.f32.mxu0 %vm408_vm1, %v16696_v45  ;;  %v17937_v45 = vld [vmem:[#allocation68_spill] sm:$0xff] }
 0x8b7   : > { %13489 = vmatmul.mubr.msk.f32.gmra.mrb[16].mxu0 %vm408_vm1, %v16704_v46  ;;  %v17935_v46 = vld [vmem:[#allocation66_spill] sm:$0xff] }
 0x8b8   : > { %13491 = vmatprep.mubr.msk.f32.mxu0 %vm408_vm1, %v16708_v7  ;;  %v17934_v7 = vld [vmem:[#allocation65_spill] sm:$0xff] }
 0x8bb   : > { %13492 = vmatmul.mubr.msk.f32.gmra.mrb[18].mxu0 %vm408_vm1, %v16712_v48  ;;  %v17933_v48 = vld [vmem:[#allocation64_spill] sm:$0xff] }
 0x8bc   : > { %13494 = vmatprep.mubr.msk.f32.mxu0 %vm408_vm1, %v16716_v12  ;;  %v17932_v12 = vld [vmem:[#allocation63_spill] sm:$0xff] }
 0x8bf   : > { %13495 = vmatmul.mubr.msk.f32.gmra.mrb[20].mxu0 %vm408_vm1, %v16722_v41  ;;  %v17930_v41 = vld [vmem:[#allocation61_spill] sm:$0xff] }
 0x8c0   : > { %13497 = vmatprep.mubr.msk.f32.mxu0 %vm408_vm1, %v16720_v33  ;;  %v17931_v33 = vld [vmem:[#allocation62_spill] sm:$0xff] }
 0x8c3   : > { %13498 = vmatmul.mubr.msk.f32.gmra.mrb[22].mxu0 %vm408_vm1, %v16728_v8  ;;  %v17929_v8 = vld [vmem:[#allocation60_spill] sm:$0xff] }
 0x8c4   : > { %13500 = vmatprep.mubr.msk.f32.mxu0 %vm408_vm1, %v16732_v39  ;;  %v17928_v39 = vld [vmem:[#allocation59_spill] sm:$0xff] }
 0x8c7   : > { %13501 = vmatmul.mubr.msk.f32.gmra.mrb[24].mxu0 %vm408_vm1, %v16736_v21  ;;  %v17927_v21 = vld [vmem:[#allocation58_spill] sm:$0xff] }
 0x8c8   : > { %13503 = vmatprep.mubr.msk.f32.mxu0 %vm408_vm1, %v16740_v16  ;;  %v17926_v16 = vld [vmem:[#allocation57_spill] sm:$0xff] }
 0x8cb   : > { %13504 = vmatmul.mubr.msk.f32.gmra.mrb[26].mxu0 %vm408_vm1, %v16746_v0  ;;  %v17924_v0 = vld [vmem:[#allocation55_spill] sm:$0xff] }
 0x8cc   : > { %13506 = vmatprep.mubr.msk.f32.mxu0 %vm408_vm1, %v16744_v14  ;;  %v17925_v14 = vld [vmem:[#allocation56_spill] sm:$0xff] }
 0x8cf   : > { %13507 = vmatmul.mubr.msk.f32.gmra.mrb[28].mxu0 %vm408_vm1, %v16752_v59  ;;  %v17923_v59 = vld [vmem:[#allocation54_spill] sm:$0xff] }
 0x8d0   : > { %13509 = vmatprep.mubr.msk.f32.mxu0 %vm408_vm1, %v16756_v58  ;;  %v17922_v58 = vld [vmem:[#allocation53_spill] sm:$0xff] }
 0x8d3   : > { %13510 = vmatmul.mubr.msk.f32.gmra.mrb[30].mxu0 %vm408_vm1, %v16760_v38  ;;  %v17921_v38 = vld [vmem:[#allocation52_spill] sm:$0xff] }
 0x8d4   : > { %13512 = vmatprep.mubr.msk.f32.mxu0 %vm408_vm1, %v16764_v28  ;;  %v17920_v28 = vld [vmem:[#allocation51_spill] sm:$0xff] }
 0x8d7   : > { %13513 = vmatmul.mubr.msk.f32.gmra.mrb[32].mxu0 %vm408_vm1, %v16770_v9  ;;  %v17914_v9 = vld [vmem:[#allocation45_spill] sm:$0xff] }
 0x8d8   : > { %13515 = vmatprep.mubr.msk.f32.mxu0 %vm408_vm1, %v16768_v37  ;;  %v17919_v37 = vld [vmem:[#allocation50_spill] sm:$0xff] }
 0x8db   : > { %13516 = vmatmul.mubr.msk.f32.gmra.mrb[34].mxu0 %vm408_vm1, %v16776_v30  ;;  %v17915_v30 = vld [vmem:[#allocation46_spill] sm:$0xff] }
 0x8dc   : > { %13518 = vmatprep.mubr.msk.f32.mxu0 %vm408_vm1, %v16780_v5  ;;  %v17916_v5 = vld [vmem:[#allocation47_spill] sm:$0xff] }
 0x8df   : > { %13519 = vmatmul.mubr.msk.f32.gmra.mrb[36].mxu0 %vm408_vm1, %v16784_v13  ;;  %v17917_v13 = vld [vmem:[#allocation48_spill] sm:$0xff] }
 0x8e0   : > { %13521 = vmatprep.mubr.msk.f32.mxu0 %vm408_vm1, %v16788_v27  ;;  %v17918_v27 = vld [vmem:[#allocation49_spill] sm:$0xff] }
 0x8e3   : > { %13522 = vmatmul.mubr.msk.f32.gmra.mrb[38].mxu0 %vm408_vm1, %v16794_v22  ;;  %v9175_v22 = vld [vmem:[#allocation3 + $0x199] sm:$0xff] }
 0x8e4   : > { %13524 = vmatprep.mubr.msk.f32.mxu0 %vm408_vm1, %v16792_v17  ;;  %v9176_v17 = vld [vmem:[#allocation3 + $0x1a1] sm:$0xff] }
 0x8e7   : > { %13525 = vmatmul.mubr.msk.f32.gmra.mrb[40].mxu0 %vm408_vm1, %v16800_v3  ;;  %v9177_v3 = vld [vmem:[#allocation3 + $0x1a9] sm:$0xff] }
 0x8e8   : > { %13527 = vmatprep.mubr.msk.f32.mxu0 %vm408_vm1, %v17914_v9 }
 0x8eb   : > { %13528 = vmatmul.mubr.msk.f32.gmra.mrb[42].mxu0 %vm408_vm1, %v17915_v30 }
 0x8ec   : > { %13530 = vmatprep.mubr.msk.f32.mxu0 %vm408_vm1, %v17916_v5 }
 0x8ef   : > { %13531 = vmatmul.mubr.msk.f32.gmra.mrb[44].mxu0 %vm408_vm1, %v17917_v13 }
 0x8f0   : > { %13533 = vmatprep.mubr.msk.f32.mxu0 %vm408_vm1, %v17918_v27 }
 0x8f3   : > { %13534 = vmatmul.mubr.msk.f32.gmra.mrb[46].mxu0 %vm408_vm1, %v9175_v22 }
 0x8f4   : > { %13536 = vmatprep.mubr.msk.f32.mxu0 %vm408_vm1, %v9176_v17 }
 0x8f7   : > { %13537 = vmatmul.mubr.msk.f32.gmra.mrb[48].mxu0 %vm408_vm1, %v9177_v3 }
 0x8f8   : > { %13541 = vmatprep.mubr.msk.f32.mxu0 %vm408_vm1, %v16931_v57  ;;  %v9687_v57 = vld [vmem:[#allocation3 + $0x16a] sm:$0xff] }
 0x8fb   : > { %13542 = vmatmul.mubr.msk.f32.vlgmr.msra.gmra.mrb[2].mxu0 %vm408_vm1, %v17919_v37 }
 0x8fc   : > { %13544 = vmatprep.mubr.msk.f32.mxu0 %vm408_vm1, %v17920_v28 }
 0x8ff   : > { %13545 = vmatmul.mubr.msk.f32.gmra.mrb[4].mxu0 %vm408_vm1, %v17921_v38 }
 0x900   : > { %13547 = vmatprep.mubr.msk.f32.mxu0 %vm408_vm1, %v17922_v58 }
 0x903   : > { %13548 = vmatmul.mubr.msk.f32.gmra.mrb[6].mxu0 %vm408_vm1, %v17923_v59 }
 0x904   : > { %13550 = vmatprep.mubr.msk.f32.mxu0 %vm408_vm1, %v17924_v0 }
 0x907   : > { %13551 = vmatmul.mubr.msk.f32.gmra.mrb[8].mxu0 %vm408_vm1, %v17925_v14 }
 0x908   : > { %13553 = vmatprep.mubr.msk.f32.mxu0 %vm408_vm1, %v17926_v16 }
 0x90b   : > { %13554 = vmatmul.mubr.msk.f32.gmra.mrb[10].mxu0 %vm408_vm1, %v17927_v21 }
 0x90c   : > { %13556 = vmatprep.mubr.msk.f32.mxu0 %vm408_vm1, %v17928_v39 }
 0x90f   : > { %13557 = vmatmul.mubr.msk.f32.gmra.mrb[12].mxu0 %vm408_vm1, %v17929_v8 }
 0x910   : > { %13559 = vmatprep.mubr.msk.f32.mxu0 %vm408_vm1, %v17930_v41 }
 0x913   : > { %13560 = vmatmul.mubr.msk.f32.gmra.mrb[14].mxu0 %vm408_vm1, %v17931_v33 }
 0x914   : > { %13562 = vmatprep.mubr.msk.f32.mxu0 %vm408_vm1, %v17932_v12 }
 0x917   : > { %13563 = vmatmul.mubr.msk.f32.gmra.mrb[16].mxu0 %vm408_vm1, %v17933_v48 }
 0x918   : > { %13565 = vmatprep.mubr.msk.f32.mxu0 %vm408_vm1, %v17934_v7 }
 0x91b   : > { %13566 = vmatmul.mubr.msk.f32.gmra.mrb[18].mxu0 %vm408_vm1, %v17935_v46 }
 0x91c   : > { %13568 = vmatprep.mubr.msk.f32.mxu0 %vm408_vm1, %v17936_v44 }
 0x91f   : > { %13569 = vmatmul.mubr.msk.f32.gmra.mrb[20].mxu0 %vm408_vm1, %v17937_v45 }
 0x920   : > { %13571 = vmatprep.mubr.msk.f32.mxu0 %vm408_vm1, %v17938_v15 }
 0x923   : > { %13572 = vmatmul.mubr.msk.f32.gmra.mrb[22].mxu0 %vm408_vm1, %v17939_v62 }
 0x924   : > { %13574 = vmatprep.mubr.msk.f32.mxu0 %vm408_vm1, %v17940_v23 }
 0x927   : > { %13575 = vmatmul.mubr.msk.f32.gmra.mrb[24].mxu0 %vm408_vm1, %v17941_v26 }
 0x928   : > { %13577 = vmatprep.mubr.msk.f32.mxu0 %vm408_vm1, %v17027_v18  ;;  %v9693_v18 = vld [vmem:[#allocation3 + $0x19a] sm:$0xff] }
 0x92b   : > { %13578 = vmatmul.mubr.msk.f32.gmra.mrb[26].mxu0 %vm408_vm1, %v17031_v47  ;;  %v9694_v47 = vld [vmem:[#allocation3 + $0x1a2] sm:$0xff] }
 0x92c   : > { %13580 = vmatprep.mubr.msk.f32.mxu0 %vm408_vm1, %v17035_v53  ;;  %v9688_v53 = vld [vmem:[#allocation3 + $0x172] sm:$0xff] }
 0x92f   : > { %13581 = vmatmul.mubr.msk.f32.gmra.mrb[28].mxu0 %vm408_vm1, %v17039_v56  ;;  %v9686_v56 = vld [vmem:[#allocation3 + $0x162] sm:$0xff] }
 0x930   : > { %13583 = vmatprep.mubr.msk.f32.mxu0 %vm408_vm1, %v17043_v11  ;;  %v9689_v11 = vld [vmem:[#allocation3 + $0x17a] sm:$0xff] }
 0x933   : > { %13584 = vmatmul.mubr.msk.f32.gmra.mrb[30].mxu0 %vm408_vm1, %v9677_v29 }
 0x934   : > { %13586 = vmatprep.mubr.msk.f32.mxu0 %vm408_vm1, %v9678_v20 }
 0x937   : > { %13587 = vmatmul.mubr.msk.f32.gmra.mrb[32].mxu0 %vm408_vm1, %v9679_v2 }
 0x938   : > { %13589 = vmatprep.mubr.msk.f32.mxu0 %vm408_vm1, %v9680_v10 }
 0x93b   : > { %13590 = vmatmul.mubr.msk.f32.gmra.mrb[34].mxu0 %vm408_vm1, %v9681_v55 }
 0x93c   : > { %13592 = vmatprep.mubr.msk.f32.mxu0 %vm408_vm1, %v9682_v54 }
 0x93f   : > { %13593 = vmatmul.mubr.msk.f32.gmra.mrb[36].mxu0 %vm408_vm1, %v9683_v4 }
 0x940   : > { %13595 = vmatprep.mubr.msk.f32.mxu0 %vm408_vm1, %v9684_v50 }
 0x943   : > { %13596 = vmatmul.mubr.msk.f32.gmra.mrb[38].mxu0 %vm408_vm1, %v9685_v51 }
 0x944   : > { %13598 = vmatprep.mubr.msk.f32.mxu0 %vm408_vm1, %v9686_v56 }
 0x947   : > { %13599 = vmatmul.mubr.msk.f32.gmra.mrb[40].mxu0 %vm408_vm1, %v9687_v57 }
 0x948   : > { %13601 = vmatprep.mubr.msk.f32.mxu0 %vm408_vm1, %v9688_v53 }
 0x94b   : > { %13602 = vmatmul.mubr.msk.f32.gmra.mrb[42].mxu0 %vm408_vm1, %v9689_v11 }
 0x94c   : > { %13604 = vmatprep.mubr.msk.f32.mxu0 %vm408_vm1, %v17073_v24  ;;  %v17361_v24 = vld [vmem:[%s17513_s7] ss:$0 sm:$0xff] }
 0x94f   : > { %13605 = vmatmul.mubr.msk.f32.gmra.mrb[44].mxu0 %vm408_vm1, %v17077_v31  ;;  %v17366_v31 = vld [vmem:[%s17514_s8] ss:$0 sm:$0xff] }
 0x950   : > { %13607 = vmatprep.mubr.msk.f32.mxu0 %vm408_vm1, %v17081_v34 }
 0x953   : > { %13608 = vmatmul.mubr.msk.f32.gmra.mrb[46].mxu0 %vm408_vm1, %v9693_v18 }
 0x954   : > { %13610 = vmatprep.mubr.msk.f32.mxu0 %vm408_vm1, %v9694_v47 }
 0x957   : > { %13611 = vmatmul.mubr.msk.f32.gmra.mrb[48].mxu0 %vm408_vm1, %v9695_v42 }
 0x9ce   : > { %v13543_v32 = vpop.f32.mrb[2].mxu0 }
 0x9cf   : > { %v10206_v34 = vmul.f32 %v13543_v32, %v17361_v24  ;;  %v9911_v6 = vpop.f32.mrb[3].mxu0 }
 0x9d0   : > { %v10205_v40 = vmul.f32 %v17361_v24, %v9911_v6 }
 0x9d1   : > { %v10245_v49 = vadd.f32 %v17366_v31, %v10206_v34 }
 0x9d2   : > { %v10244_v52 = vadd.f32 %v17366_v31, %v10205_v40  ;;  %v13546_v36 = vpop.f32.mrb[4].mxu0 }
 0x9d3   : > { %v10277_v25 = vmax.f32 %v10245_v49, 0.0  ;;  %v10207_v35 = vmul.f32 %v13546_v36, %v17361_v24  ;;  %v9921_v60 = vpop.f32.mrb[5].mxu0 }
 0x9d4   : > { %v10276_v61 = vmax.f32 %v10244_v52, 0.0 }
 0x9d5   : > { %10309 = vst.msk [vmem:[%s17376_s20 + $0x8] sm:$0xff] %vm408_vm1, %v10277_v25  ;;  %v10246_v1 = vadd.f32 %v17366_v31, %v10207_v35 }
 0x9d6   : > { %10308 = vst.msk [vmem:[%s17376_s20] sm:$0xff] %vm408_vm1, %v10276_v61  ;;  %v13549_v19 = vpop.f32.mrb[6].mxu0 }
 0x9d7   : > { %v10278_v43 = vmax.f32 %v10246_v1, 0.0  ;;  %v9930_v63 = vpop.f32.mrb[7].mxu0 }
 0x9d8   : > { %v10208_v9 = vmul.f32 %v17361_v24, %v9930_v63 }
 0x9d9   : > { %11357 = vst.msk [vmem:[%s17376_s20 + $0x10] sm:$0xff] %vm408_vm1, %v10278_v43 }
 0x9da   : > { %v10247_v30 = vadd.f32 %v17366_v31, %v10208_v9  ;;  %v13552_v5 = vpop.f32.mrb[8].mxu0 }
 0x9db   : > { %v10210_v13 = vmul.f32 %v13552_v5, %v17361_v24  ;;  %v9939_v27 = vpop.f32.mrb[9].mxu0 }
 0x9dc   : > { %v10279_v22 = vmax.f32 %v10247_v30, 0.0  ;;  %v10209_v17 = vmul.f32 %v17361_v24, %v9939_v27 }
 0x9dd   : > { %v10249_v3 = vadd.f32 %v17366_v31, %v10210_v13 }
 0x9de   : > { %11358 = vst.msk [vmem:[%s17376_s20 + $0x18] sm:$0xff] %vm408_vm1, %v10279_v22  ;;  %v10248_v37 = vadd.f32 %v17366_v31, %v10209_v17  ;;  %v13555_v28 = vpop.f32.mrb[10].mxu0 }
 0x9df   : > { %v10281_v38 = vmax.f32 %v10249_v3, 0.0  ;;  %v10211_v58 = vmul.f32 %v13555_v28, %v17361_v24  ;;  %v9949_v59 = vpop.f32.mrb[11].mxu0 }
 0x9e0   : > { %v10280_v0 = vmax.f32 %v10248_v37, 0.0 }
 0x9e1   : > { %11360 = vst.msk [vmem:[%s17376_s20 + $0x28] sm:$0xff] %vm408_vm1, %v10281_v38  ;;  %v10250_v14 = vadd.f32 %v17366_v31, %v10211_v58 }
 0x9e2   : > { %11359 = vst.msk [vmem:[%s17376_s20 + $0x20] sm:$0xff] %vm408_vm1, %v10280_v0  ;;  %v13558_v16 = vpop.f32.mrb[12].mxu0 }
 0x9e3   : > { %v10282_v21 = vmax.f32 %v10250_v14, 0.0  ;;  %v9958_v39 = vpop.f32.mrb[13].mxu0 }
 0x9e4   : > { %v10212_v8 = vmul.f32 %v17361_v24, %v9958_v39 }
 0x9e5   : > { %11361 = vst.msk [vmem:[%s17376_s20 + $0x30] sm:$0xff] %vm408_vm1, %v10282_v21 }
 0x9e6   : > { %v10251_v41 = vadd.f32 %v17366_v31, %v10212_v8  ;;  %v13561_v33 = vpop.f32.mrb[14].mxu0 }
 0x9e7   : > { %v10214_v12 = vmul.f32 %v13561_v33, %v17361_v24  ;;  %v9967_v48 = vpop.f32.mrb[15].mxu0 }
 0x9e8   : > { %v10283_v7 = vmax.f32 %v10251_v41, 0.0  ;;  %v10213_v46 = vmul.f32 %v17361_v24, %v9967_v48 }
 0x9e9   : > { %v10253_v44 = vadd.f32 %v17366_v31, %v10214_v12 }
 0x9ea   : > { %11362 = vst.msk [vmem:[%s17376_s20 + $0x38] sm:$0xff] %vm408_vm1, %v10283_v7  ;;  %v10252_v45 = vadd.f32 %v17366_v31, %v10213_v46  ;;  %v13564_v15 = vpop.f32.mrb[16].mxu0 }
 0x9eb   : > { %v10285_v62 = vmax.f32 %v10253_v44, 0.0  ;;  %v10215_v23 = vmul.f32 %v13564_v15, %v17361_v24  ;;  %v9977_v26 = vpop.f32.mrb[17].mxu0 }
 0x9ec   : > { %v10284_v29 = vmax.f32 %v10252_v45, 0.0 }
 0x9ed   : > { %11364 = vst.msk [vmem:[%s17376_s20 + $0x48] sm:$0xff] %vm408_vm1, %v10285_v62  ;;  %v10254_v20 = vadd.f32 %v17366_v31, %v10215_v23 }
 0x9ee   : > { %11363 = vst.msk [vmem:[%s17376_s20 + $0x40] sm:$0xff] %vm408_vm1, %v10284_v29  ;;  %v13567_v2 = vpop.f32.mrb[18].mxu0 }
 0x9ef   : > { %v10286_v10 = vmax.f32 %v10254_v20, 0.0  ;;  %v9986_v55 = vpop.f32.mrb[19].mxu0 }
 0x9f0   : > { %v10216_v54 = vmul.f32 %v17361_v24, %v9986_v55 }
 0x9f1   : > { %11365 = vst.msk [vmem:[%s17376_s20 + $0x50] sm:$0xff] %vm408_vm1, %v10286_v10 }
 0x9f2   : > { %v10255_v4 = vadd.f32 %v17366_v31, %v10216_v54  ;;  %v13570_v50 = vpop.f32.mrb[20].mxu0 }
 0x9f3   : > { %v10218_v51 = vmul.f32 %v13570_v50, %v17361_v24  ;;  %v9995_v56 = vpop.f32.mrb[21].mxu0 }
 0x9f4   : > { %v10287_v57 = vmax.f32 %v10255_v4, 0.0  ;;  %v10217_v53 = vmul.f32 %v17361_v24, %v9995_v56 }
 0x9f5   : > { %v10257_v11 = vadd.f32 %v17366_v31, %v10218_v51 }
 0x9f6   : > { %11366 = vst.msk [vmem:[%s17376_s20 + $0x58] sm:$0xff] %vm408_vm1, %v10287_v57  ;;  %v10256_v18 = vadd.f32 %v17366_v31, %v10217_v53  ;;  %v13573_v47 = vpop.f32.mrb[22].mxu0 }
 0x9f7   : > { %v10289_v42 = vmax.f32 %v10257_v11, 0.0  ;;  %v10219_v32 = vmul.f32 %v13573_v47, %v17361_v24  ;;  %v10005_v34 = vpop.f32.mrb[23].mxu0 }
 0x9f8   : > { %v10288_v6 = vmax.f32 %v10256_v18, 0.0 }
 0x9f9   : > { %11368 = vst.msk [vmem:[%s17376_s20 + $0x68] sm:$0xff] %vm408_vm1, %v10289_v42  ;;  %v10258_v40 = vadd.f32 %v17366_v31, %v10219_v32 }
 0x9fa   : > { %11367 = vst.msk [vmem:[%s17376_s20 + $0x60] sm:$0xff] %vm408_vm1, %v10288_v6  ;;  %v13576_v49 = vpop.f32.mrb[24].mxu0 }
 0x9fb   : > { %v10290_v52 = vmax.f32 %v10258_v40, 0.0  ;;  %v10014_v36 = vpop.f32.mrb[25].mxu0 }
 0x9fc   : > { %v10220_v25 = vmul.f32 %v17361_v24, %v10014_v36 }
 0x9fd   : > { %11369 = vst.msk [vmem:[%s17376_s20 + $0x70] sm:$0xff] %vm408_vm1, %v10290_v52 }
 0x9fe   : > { %v10259_v35 = vadd.f32 %v17366_v31, %v10220_v25  ;;  %v13579_v60 = vpop.f32.mrb[26].mxu0 }
 0x9ff   : > { %v10222_v61 = vmul.f32 %v13579_v60, %v17361_v24  ;;  %v10023_v1 = vpop.f32.mrb[27].mxu0 }
 0xa00   : > { %v10291_v19 = vmax.f32 %v10259_v35, 0.0  ;;  %v10221_v43 = vmul.f32 %v17361_v24, %v10023_v1 }
 0xa01   : > { %v10261_v63 = vadd.f32 %v17366_v31, %v10222_v61 }
 0xa02   : > { %11370 = vst.msk [vmem:[%s17376_s20 + $0x78] sm:$0xff] %vm408_vm1, %v10291_v19  ;;  %v10260_v9 = vadd.f32 %v17366_v31, %v10221_v43  ;;  %v13582_v30 = vpop.f32.mrb[28].mxu0 }
 0xa03   : > { %v10293_v5 = vmax.f32 %v10261_v63, 0.0  ;;  %v10223_v13 = vmul.f32 %v13582_v30, %v17361_v24  ;;  %v10033_v27 = vpop.f32.mrb[29].mxu0 }
 0xa04   : > { %v10292_v22 = vmax.f32 %v10260_v9, 0.0 }
 0xa05   : > { %11372 = vst.msk [vmem:[%s17376_s20 + $0x88] sm:$0xff] %vm408_vm1, %v10293_v5  ;;  %v10262_v17 = vadd.f32 %v17366_v31, %v10223_v13 }
 0xa06   : > { %11371 = vst.msk [vmem:[%s17376_s20 + $0x80] sm:$0xff] %vm408_vm1, %v10292_v22  ;;  %v13585_v3 = vpop.f32.mrb[30].mxu0 }
 0xa07   : > { %v10294_v37 = vmax.f32 %v10262_v17, 0.0  ;;  %v10042_v28 = vpop.f32.mrb[31].mxu0 }
 0xa08   : > { %v10224_v38 = vmul.f32 %v17361_v24, %v10042_v28 }
 0xa09   : > { %11373 = vst.msk [vmem:[%s17376_s20 + $0x90] sm:$0xff] %vm408_vm1, %v10294_v37 }
 0xa0a   : > { %v10263_v58 = vadd.f32 %v17366_v31, %v10224_v38  ;;  %v13588_v59 = vpop.f32.mrb[32].mxu0 }
 0xa0b   : > { %v10226_v0 = vmul.f32 %v13588_v59, %v17361_v24  ;;  %v10051_v14 = vpop.f32.mrb[33].mxu0 }
 0xa0c   : > { %v10295_v16 = vmax.f32 %v10263_v58, 0.0  ;;  %v10225_v21 = vmul.f32 %v17361_v24, %v10051_v14 }
 0xa0d   : > { %v10265_v39 = vadd.f32 %v17366_v31, %v10226_v0 }
 0xa0e   : > { %11374 = vst.msk [vmem:[%s17376_s20 + $0x98] sm:$0xff] %vm408_vm1, %v10295_v16  ;;  %v10264_v8 = vadd.f32 %v17366_v31, %v10225_v21  ;;  %v13591_v41 = vpop.f32.mrb[34].mxu0 }
 0xa0f   : > { %v10297_v33 = vmax.f32 %v10265_v39, 0.0  ;;  %v10227_v12 = vmul.f32 %v13591_v41, %v17361_v24  ;;  %v10061_v48 = vpop.f32.mrb[35].mxu0 }
 0xa10   : > { %v10296_v7 = vmax.f32 %v10264_v8, 0.0 }
 0xa11   : > { %11376 = vst.msk [vmem:[%s17376_s20 + $0xa8] sm:$0xff] %vm408_vm1, %v10297_v33  ;;  %v10266_v46 = vadd.f32 %v17366_v31, %v10227_v12 }
 0xa12   : > { %11375 = vst.msk [vmem:[%s17376_s20 + $0xa0] sm:$0xff] %vm408_vm1, %v10296_v7  ;;  %v13594_v44 = vpop.f32.mrb[36].mxu0 }
 0xa13   : > { %v10298_v45 = vmax.f32 %v10266_v46, 0.0  ;;  %v10070_v15 = vpop.f32.mrb[37].mxu0 }
 0xa14   : > { %v10228_v62 = vmul.f32 %v17361_v24, %v10070_v15 }
 0xa15   : > { %11377 = vst.msk [vmem:[%s17376_s20 + $0xb0] sm:$0xff] %vm408_vm1, %v10298_v45 }
 0xa16   : > { %v10267_v23 = vadd.f32 %v17366_v31, %v10228_v62  ;;  %v13597_v26 = vpop.f32.mrb[38].mxu0 }
 0xa17   : > { %v10230_v29 = vmul.f32 %v13597_v26, %v17361_v24  ;;  %v10079_v20 = vpop.f32.mrb[39].mxu0 }
 0xa18   : > { %v10299_v2 = vmax.f32 %v10267_v23, 0.0  ;;  %v10229_v10 = vmul.f32 %v17361_v24, %v10079_v20 }
 0xa19   : > { %v10269_v55 = vadd.f32 %v17366_v31, %v10230_v29 }
 0xa1a   : > { %11378 = vst.msk [vmem:[%s17376_s20 + $0xb8] sm:$0xff] %vm408_vm1, %v10299_v2  ;;  %v10268_v54 = vadd.f32 %v17366_v31, %v10229_v10  ;;  %v13600_v4 = vpop.f32.mrb[40].mxu0 }
 0xa1b   : > { %v10301_v50 = vmax.f32 %v10269_v55, 0.0  ;;  %v10231_v51 = vmul.f32 %v13600_v4, %v17361_v24  ;;  %v10089_v56 = vpop.f32.mrb[41].mxu0 }
 0xa1c   : > { %v10300_v57 = vmax.f32 %v10268_v54, 0.0 }
 0xa1d   : > { %11380 = vst.msk [vmem:[%s17376_s20 + $0xc8] sm:$0xff] %vm408_vm1, %v10301_v50  ;;  %v10270_v53 = vadd.f32 %v17366_v31, %v10231_v51 }
 0xa1e   : > { %11379 = vst.msk [vmem:[%s17376_s20 + $0xc0] sm:$0xff] %vm408_vm1, %v10300_v57  ;;  %v13603_v11 = vpop.f32.mrb[42].mxu0 }
 0xa1f   : > { %v10302_v18 = vmax.f32 %v10270_v53, 0.0  ;;  %v10098_v47 = vpop.f32.mrb[43].mxu0 }
 0xa20   : > { %v10232_v42 = vmul.f32 %v17361_v24, %v10098_v47 }
 0xa21   : > { %11381 = vst.msk [vmem:[%s17376_s20 + $0xd0] sm:$0xff] %vm408_vm1, %v10302_v18 }
 0xa22   : > { %v10271_v32 = vadd.f32 %v17366_v31, %v10232_v42  ;;  %v13606_v34 = vpop.f32.mrb[44].mxu0 }
 0xa23   : > { %v10234_v6 = vmul.f32 %v13606_v34, %v17361_v24  ;;  %v10107_v40 = vpop.f32.mrb[45].mxu0 }
 0xa24   : > { %v10303_v49 = vmax.f32 %v10271_v32, 0.0  ;;  %v10233_v52 = vmul.f32 %v17361_v24, %v10107_v40 }
 0xa25   : > { %v10273_v36 = vadd.f32 %v17366_v31, %v10234_v6 }
 0xa26   : > { %11382 = vst.msk [vmem:[%s17376_s20 + $0xd8] sm:$0xff] %vm408_vm1, %v10303_v49  ;;  %v10272_v25 = vadd.f32 %v17366_v31, %v10233_v52  ;;  %v13609_v35 = vpop.f32.mrb[46].mxu0 }
 0xa27   : > { %v10305_v60 = vmax.f32 %v10273_v36, 0.0  ;;  %v10235_v61 = vmul.f32 %v13609_v35, %v17361_v24  ;;  %v10117_v1 = vpop.f32.mrb[47].mxu0 }
 0xa28   : > { %v10304_v19 = vmax.f32 %v10272_v25, 0.0 }
 0xa29   : > { %11384 = vst.msk [vmem:[%s17376_s20 + $0xe8] sm:$0xff] %vm408_vm1, %v10305_v60  ;;  %v10274_v43 = vadd.f32 %v17366_v31, %v10235_v61 }
 0xa2a   : > { %11383 = vst.msk [vmem:[%s17376_s20 + $0xe0] sm:$0xff] %vm408_vm1, %v10304_v19  ;;  %v13612_v63 = vpop.f32.mrb[48].mxu0 }
 0xa2b   : > { %v10306_v9 = vmax.f32 %v10274_v43, 0.0  ;;  %v10126_v30 = vpop.f32.mrb[49].mxu0 }
 0xa2c   : > { %v10236_v5 = vmul.f32 %v17361_v24, %v10126_v30 }
 0xa2d   : > { %11385 = vst.msk [vmem:[%s17376_s20 + $0xf0] sm:$0xff] %vm408_vm1, %v10306_v9 }
 0xa2e   : > { %v10275_v13 = vadd.f32 %v17366_v31, %v10236_v5 }
 0xa30   : > { %v10307_v27 = vmax.f32 %v10275_v13, 0.0 }
 0xa32   : > { %11386 = vst.msk [vmem:[%s17376_s20 + $0xf8] sm:$0xff] %vm408_vm1, %v10307_v27 }
 0xa33 PF: > { %s19_s30 = sadd.s32 1, %s14404_s30  }
 0xa34   : > { %p16_p4 = scmp.ge.s32.totalorder %s19_s30, 4  }
 0xa36   :  { %18 = sbr.rel (!%p16_p4) target bundleno = 1 (0x1), region = 135 }

</bundles_post_ra>
